<compile_context>
chip_gen: v5e
topology: v5e:2x2
jax: 0.10.0
libtpu: 0.0.40
codegen_flags: <defaults>
</compile_context>

<pallas_src>
import math

import jax
import jax.numpy as jnp
from jax.experimental import pallas as pl

# ---------------- model dims (small, synthetic) ----------------
BATCH = 2        # batch
S = 8            # sequence length
H = 32           # hidden size
NH = 4           # attention heads
DH = H // NH     # head dim (8 -> sublane-tile aligned)
FFN = 64         # intermediate size
L = 3            # encoder layers (need >= 3 hidden states for h_conc)
VOCAB = 50
N_CLASS = 1
LN_EPS = 1e-12
ATT_SCALE = 1.0 / math.sqrt(DH)

# packed vector-slab layout: one vector per row, values in lanes [0:width)
_VEC_W = max(H, FFN)
_R_EMB_G, _R_EMB_B, _R_HEAD_B = 0, 1, 2
_R_LAYER0 = 3            # then 7 rows/layer: bo, ln1_g, ln1_b, b1, b2, ln2_g, ln2_b
_VEC_ROWS = _R_LAYER0 + 7 * L
# packed matrix-slab layout (per layer): rows [0:H]=Wo, [H:2H]=W1, [2H:2H+FFN]=W2
_MAT_ROWS = 2 * H + FFN
_MAT_W = max(H, FFN)


# ---------------- fused Pallas kernel ----------------
def _layernorm(y, g, b):
    mu = jnp.mean(y, axis=-1, keepdims=True)
    var = jnp.mean((y - mu) * (y - mu), axis=-1, keepdims=True)
    return (y - mu) * jax.lax.rsqrt(var + LN_EPS) * g + b


def _fused_bert_kernel(x_ref, mask_ref, wqkv_ref, bqkvc_ref, mats_ref, vecs_ref,
                       hw_ref, out_ref):
    n = x_ref.shape[0]                      # B*S rows
    nb = n // S                             # batch size

    def vec(row, width):                    # [1, width] row from the vector slab
        return vecs_ref[row:row + 1, 0:width]

    x = x_ref[...]                          # [N, H] raw embedding sum
    mask = mask_ref[...]                    # [N, N] block-diagonal additive mask

    # Embedding LayerNorm.
    x = _layernorm(x, vec(_R_EMB_G, H), vec(_R_EMB_B, H))

    cls_rows = []                           # per-layer [nb, H] CLS rows
    for l in range(L):                      # static unroll, L == 3
        base = _R_LAYER0 + 7 * l
        # Fused QKV projection directly in transposed [3H, N] layout: per-head
        # q/k/v become sublane(row)-aligned slices (no lane-offset slicing).
        qkvT = jax.lax.dot_general(
            wqkv_ref[l], x, (((0,), (1,)), ((), ())),
            preferred_element_type=jnp.float32) + bqkvc_ref[l]        # [3H, N]

        attn = jnp.zeros((n, H), jnp.float32)
        for h in range(NH):                 # static unroll, NH == 4
            qT = qkvT[h * DH:(h + 1) * DH, :]                         # [DH, N]
            kT = qkvT[H + h * DH:H + (h + 1) * DH, :]                 # [DH, N]
            vT = qkvT[2 * H + h * DH:2 * H + (h + 1) * DH, :]         # [DH, N]
            # s[i, j] = q_i . k_j  (contract shared DH dim, no explicit .T)
            s = jax.lax.dot_general(qT, kT, (((0,), (0,)), ((), ())),
                                    preferred_element_type=jnp.float32)
            s = s * ATT_SCALE + mask
            s = s - jnp.max(s, axis=-1, keepdims=True)
            p = jnp.exp(s)
            p = p / jnp.sum(p, axis=-1, keepdims=True)                # exact division
            ctx = jax.lax.dot_general(p, vT, (((1,), (1,)), ((), ())),
                                      preferred_element_type=jnp.float32)  # [N, DH]
            # concat(ctx_h) @ Wo == sum_h ctx_h @ Wo[h-block] (aligned row slice)
            attn = attn + jnp.dot(ctx, mats_ref[l, h * DH:(h + 1) * DH, 0:H],
                                  preferred_element_type=jnp.float32)
        attn = attn + vec(base + 0, H)                                # + bo

        h1 = _layernorm(attn + x, vec(base + 1, H), vec(base + 2, H))
        # TODO(synk): HF BERT uses exact (erf) GELU; tanh approximation kept here.
        f = jax.nn.gelu(
            jnp.dot(h1, mats_ref[l, H:2 * H, 0:FFN],
                    preferred_element_type=jnp.float32) + vec(base + 3, FFN),
            approximate=True)
        f = jnp.dot(f, mats_ref[l, 2 * H:2 * H + FFN, 0:H],
                    preferred_element_type=jnp.float32) + vec(base + 4, H)
        x = _layernorm(f + h1, vec(base + 5, H), vec(base + 6, H))

        # CLS row of batch element b sits at row b*S (sublane-aligned, S == 8).
        cls_rows.append(jnp.concatenate(
            [x[b * S:b * S + 1, :] for b in range(nb)], axis=0))      # [nb, H]

    # Head: logits = concat(CLS[-1], CLS[-2], CLS[-3]) @ W + b as ONE dot.
    # TODO(synk): training-mode dropout (p=0.15) not implemented (identity at inference).
    h_conc = jnp.concatenate(
        [cls_rows[L - 1], cls_rows[L - 2], cls_rows[L - 3]], axis=1)  # [nb, 3H]
    logits = jnp.dot(h_conc, hw_ref[...], preferred_element_type=jnp.float32)
    logits = logits + vec(_R_HEAD_B, N_CLASS)
    out_ref[...] = logits.astype(out_ref.dtype)


# ---------------- parameter construction (deterministic) ----------------
def init_params(key):
    ks = jax.random.split(key, 8 + L * 12)
    p = {}
    p["tok_emb"] = 0.02 * jax.random.normal(ks[0], (VOCAB, H), jnp.float32)
    p["pos_emb"] = 0.02 * jax.random.normal(ks[1], (S, H), jnp.float32)
    p["typ_emb"] = 0.02 * jax.random.normal(ks[2], (2, H), jnp.float32)
    p["emb_ln_g"] = jnp.ones((H,), jnp.float32)
    p["emb_ln_b"] = jnp.zeros((H,), jnp.float32)
    layers = []
    for l in range(L):
        k = ks[8 + l * 12: 8 + (l + 1) * 12]
        layers.append(dict(
            wqkv=0.02 * jax.random.normal(k[0], (H, 3 * H), jnp.float32),
            bqkv=jnp.zeros((3 * H,), jnp.float32),
            wo=0.02 * jax.random.normal(k[1], (H, H), jnp.float32),
            bo=jnp.zeros((H,), jnp.float32),
            ln1_g=jnp.ones((H,), jnp.float32),
            ln1_b=jnp.zeros((H,), jnp.float32),
            w1=0.02 * jax.random.normal(k[2], (H, FFN), jnp.float32),
            b1=jnp.zeros((FFN,), jnp.float32),
            w2=0.02 * jax.random.normal(k[3], (FFN, H), jnp.float32),
            b2=jnp.zeros((H,), jnp.float32),
            ln2_g=jnp.ones((H,), jnp.float32),
            ln2_b=jnp.zeros((H,), jnp.float32),
        ))
    p["layers"] = layers
    # classification head: Linear(hidden_size * 3, n_class), xavier_uniform, zero bias
    fan_in, fan_out = 3 * H, N_CLASS
    bound = math.sqrt(6.0 / (fan_in + fan_out))
    p["head_w"] = jax.random.uniform(ks[3], (3 * H, N_CLASS), jnp.float32,
                                     minval=-bound, maxval=bound)
    p["head_b"] = jnp.zeros((N_CLASS,), jnp.float32)
    return p


def pack_params(p):
    """Pack all weights into a handful of slabs ONCE (hoisted out of call path)."""
    wqkv = jnp.stack([lp["wqkv"] for lp in p["layers"]])                 # [L, H, 3H]
    bqkv_col = jnp.stack([lp["bqkv"] for lp in p["layers"]])[..., None]  # [L, 3H, 1]

    mats = jnp.zeros((L, _MAT_ROWS, _MAT_W), jnp.float32)
    vecs = jnp.zeros((_VEC_ROWS, _VEC_W), jnp.float32)
    vecs = vecs.at[_R_EMB_G, 0:H].set(p["emb_ln_g"])
    vecs = vecs.at[_R_EMB_B, 0:H].set(p["emb_ln_b"])
    vecs = vecs.at[_R_HEAD_B, 0:N_CLASS].set(p["head_b"])
    for l, lp in enumerate(p["layers"]):
        mats = mats.at[l, 0:H, 0:H].set(lp["wo"])
        mats = mats.at[l, H:2 * H, 0:FFN].set(lp["w1"])
        mats = mats.at[l, 2 * H:2 * H + FFN, 0:H].set(lp["w2"])
        base = _R_LAYER0 + 7 * l
        vecs = vecs.at[base + 0, 0:H].set(lp["bo"])
        vecs = vecs.at[base + 1, 0:H].set(lp["ln1_g"])
        vecs = vecs.at[base + 2, 0:H].set(lp["ln1_b"])
        vecs = vecs.at[base + 3, 0:FFN].set(lp["b1"])
        vecs = vecs.at[base + 4, 0:H].set(lp["b2"])
        vecs = vecs.at[base + 5, 0:H].set(lp["ln2_g"])
        vecs = vecs.at[base + 6, 0:H].set(lp["ln2_b"])
    return dict(tok_emb=p["tok_emb"], pos_emb=p["pos_emb"], typ_emb=p["typ_emb"],
                wqkv=wqkv, bqkv_col=bqkv_col, mats=mats, vecs=vecs,
                head_w=p["head_w"])


# ---------------- forward: gather/mask glue in XLA, everything else fused ----------------
def _full_spec(shape):
    nd = len(shape)
    return pl.BlockSpec(shape, lambda i, _nd=nd: (0,) * _nd)


@jax.jit
def bert_classification_head_model1(packed, input_ids, attention_mask, token_type_ids):
    b, s = input_ids.shape
    n = b * s
    # Embedding gathers are data-dependent -> pre-kernel glue.
    positions = jnp.arange(s)[None, :]
    emb = (jnp.take(packed["tok_emb"], input_ids, axis=0)
           + jnp.take(packed["pos_emb"], positions, axis=0)
           + jnp.take(packed["typ_emb"], token_type_ids, axis=0))        # [B, S, H]
    x0 = emb.reshape(n, H)
    # Block-diagonal additive mask: query (b,i) may only attend key (b,j) with mask=1.
    att = attention_mask.astype(jnp.float32)                             # [B, S]
    allowed = jnp.eye(b, dtype=jnp.float32)[:, None, :, None] * att[None, None, :, :]
    mask = (1.0 - jnp.broadcast_to(allowed, (b, s, b, s)).reshape(n, n)) * -1e9

    operands = (x0, mask, packed["wqkv"], packed["bqkv_col"], packed["mats"],
                packed["vecs"], packed["head_w"])
    logits = pl.pallas_call(
        _fused_bert_kernel,
        out_shape=jax.ShapeDtypeStruct((b, N_CLASS), jnp.float32),
        grid=(1,),                                        # single fat step
        in_specs=[_full_spec(op.shape) for op in operands],
        out_specs=_full_spec((b, N_CLASS)),
    )(*operands)
    return logits                                                         # [B, N_CLASS]


if __name__ == "__main__":
    key = jax.random.PRNGKey(0)
    k_param, k_ids = jax.random.split(key)
    packed = pack_params(init_params(k_param))            # pre-packed once at init

    input_ids = jax.random.randint(k_ids, (BATCH, S), 0, VOCAB, dtype=jnp.int32)
    attention_mask = jnp.ones((BATCH, S), jnp.int32)
    token_type_ids = jnp.zeros((BATCH, S), jnp.int32)

    logits = bert_classification_head_model1(packed, input_ids, attention_mask,
                                              token_type_ids)
    logits = jax.block_until_ready(logits)
    assert logits.shape == (BATCH, N_CLASS)
    assert bool(jnp.all(jnp.isfinite(logits)))
    print("KERNEL_OK")
</pallas_src>

<mosaic_0001>
module attributes {stable_mosaic.version = 11 : i64} {
  func.func @_fused_bert_kernel(%arg0: i32, %arg1: memref<16x32xf32, #tpu.memory_space<vmem>>, %arg2: memref<16x16xf32, #tpu.memory_space<vmem>>, %arg3: memref<3x32x96xf32, #tpu.memory_space<vmem>>, %arg4: memref<3x96x1xf32, #tpu.memory_space<vmem>>, %arg5: memref<3x128x64xf32, #tpu.memory_space<vmem>>, %arg6: memref<24x64xf32, #tpu.memory_space<vmem>>, %arg7: memref<96x1xf32, #tpu.memory_space<vmem>>, %arg8: memref<2x1xf32, #tpu.memory_space<vmem>>) attributes {dimension_semantics = [#tpu.dimension_semantics<arbitrary>], iteration_bounds = array<i64: 1>, scalar_prefetch = 0 : i64, scratch_operands = 0 : i64, tpu.core_type = #tpu.core_type<tc>, window_params = [{pipeline_mode = #tpu.pipeline_mode<synchronous>, transform_indices = @transform_0, window_bounds = array<i64: 16, 32>}, {pipeline_mode = #tpu.pipeline_mode<synchronous>, transform_indices = @transform_1, window_bounds = array<i64: 16, 16>}, {pipeline_mode = #tpu.pipeline_mode<synchronous>, transform_indices = @transform_2, window_bounds = array<i64: 3, 32, 96>}, {pipeline_mode = #tpu.pipeline_mode<synchronous>, transform_indices = @transform_3, window_bounds = array<i64: 3, 96, 1>}, {pipeline_mode = #tpu.pipeline_mode<synchronous>, transform_indices = @transform_4, window_bounds = array<i64: 3, 128, 64>}, {pipeline_mode = #tpu.pipeline_mode<synchronous>, transform_indices = @transform_5, window_bounds = array<i64: 24, 64>}, {pipeline_mode = #tpu.pipeline_mode<synchronous>, transform_indices = @transform_6, window_bounds = array<i64: 96, 1>}, {pipeline_mode = #tpu.pipeline_mode<synchronous>, transform_indices = @transform_7, window_bounds = array<i64: 2, 1>}]} {
    %c0 = arith.constant 0 : index
    %c0_0 = arith.constant 0 : index
    %0 = vector.load %arg1[%c0, %c0_0] : memref<16x32xf32, #tpu.memory_space<vmem>>, vector<16x32xf32>
    %c0_1 = arith.constant 0 : index
    %c0_2 = arith.constant 0 : index
    %1 = vector.load %arg2[%c0_1, %c0_2] : memref<16x16xf32, #tpu.memory_space<vmem>>, vector<16x16xf32>
    %c0_3 = arith.constant 0 : index
    %c0_4 = arith.constant 0 : index
    %2 = vector.load %arg6[%c0_3, %c0_4] : memref<24x64xf32, #tpu.memory_space<vmem>>, vector<1x32xf32>
    %c1 = arith.constant 1 : index
    %c0_5 = arith.constant 0 : index
    %3 = vector.load %arg6[%c1, %c0_5] : memref<24x64xf32, #tpu.memory_space<vmem>>, vector<1x32xf32>
    %cst = arith.constant dense<0.000000e+00> : vector<16xf32>
    %4 = vector.multi_reduction <add>, %0, %cst [1] : vector<16x32xf32> to vector<16xf32>
    %5 = vector.shape_cast %4 : vector<16xf32> to vector<16x1xf32>
    %cst_6 = arith.constant 3.200000e+01 : f32
    %6 = vector.broadcast %cst_6 : f32 to vector<16x1xf32>
    %7 = arith.divf %5, %6 : vector<16x1xf32>
    %8 = vector.broadcast %7 : vector<16x1xf32> to vector<16x32xf32>
    %9 = arith.subf %0, %8 : vector<16x32xf32>
    %10 = vector.broadcast %7 : vector<16x1xf32> to vector<16x32xf32>
    %11 = arith.subf %0, %10 : vector<16x32xf32>
    %12 = arith.mulf %9, %11 : vector<16x32xf32>
    %cst_7 = arith.constant dense<0.000000e+00> : vector<16xf32>
    %13 = vector.multi_reduction <add>, %12, %cst_7 [1] : vector<16x32xf32> to vector<16xf32>
    %14 = vector.shape_cast %13 : vector<16xf32> to vector<16x1xf32>
    %cst_8 = arith.constant 3.200000e+01 : f32
    %15 = vector.broadcast %cst_8 : f32 to vector<16x1xf32>
    %16 = arith.divf %14, %15 : vector<16x1xf32>
    %17 = vector.broadcast %7 : vector<16x1xf32> to vector<16x32xf32>
    %18 = arith.subf %0, %17 : vector<16x32xf32>
    %cst_9 = arith.constant 9.99999996E-13 : f32
    %19 = vector.broadcast %cst_9 : f32 to vector<16x1xf32>
    %20 = arith.addf %16, %19 : vector<16x1xf32>
    %21 = math.rsqrt %20 : vector<16x1xf32>
    %22 = vector.broadcast %21 : vector<16x1xf32> to vector<16x32xf32>
    %23 = arith.mulf %18, %22 : vector<16x32xf32>
    %24 = vector.broadcast %2 : vector<1x32xf32> to vector<16x32xf32>
    %25 = arith.mulf %23, %24 : vector<16x32xf32>
    %26 = vector.broadcast %3 : vector<1x32xf32> to vector<16x32xf32>
    %27 = arith.addf %25, %26 : vector<16x32xf32>
    %c0_10 = arith.constant 0 : index
    %c0_11 = arith.constant 0 : index
    %c0_12 = arith.constant 0 : index
    %28 = vector.load %arg3[%c0_10, %c0_11, %c0_12] : memref<3x32x96xf32, #tpu.memory_space<vmem>>, vector<1x32x96xf32>
    %29 = vector.shape_cast %28 : vector<1x32x96xf32> to vector<32x96xf32>
    %cst_13 = arith.constant dense<0.000000e+00> : vector<96x16xf32>
    %30 = tpu.matmul %29, %27, %cst_13 {dimension_numbers = #tpu.dot_dimension_numbers<[0], [1], [1], [0], [0, 1, 1, 0], [], []>} : vector<32x96xf32>, vector<16x32xf32>, vector<96x16xf32> -> vector<96x16xf32>
    %c0_14 = arith.constant 0 : index
    %c0_15 = arith.constant 0 : index
    %c0_16 = arith.constant 0 : index
    %31 = vector.load %arg4[%c0_14, %c0_15, %c0_16] : memref<3x96x1xf32, #tpu.memory_space<vmem>>, vector<1x96x1xf32>
    %32 = vector.shape_cast %31 : vector<1x96x1xf32> to vector<96x1xf32>
    %33 = vector.broadcast %32 : vector<96x1xf32> to vector<96x16xf32>
    %34 = arith.addf %30, %33 : vector<96x16xf32>
    %cst_17 = arith.constant 0.000000e+00 : f32
    %35 = vector.broadcast %cst_17 : f32 to vector<16x32xf32>
    %36 = vector.extract_strided_slice %34 {offsets = [0, 0], sizes = [8, 16], strides = [1, 1]} : vector<96x16xf32> to vector<8x16xf32>
    %37 = vector.extract_strided_slice %34 {offsets = [32, 0], sizes = [8, 16], strides = [1, 1]} : vector<96x16xf32> to vector<8x16xf32>
    %38 = vector.extract_strided_slice %34 {offsets = [64, 0], sizes = [8, 16], strides = [1, 1]} : vector<96x16xf32> to vector<8x16xf32>
    %cst_18 = arith.constant dense<0.000000e+00> : vector<16x16xf32>
    %39 = tpu.matmul %36, %37, %cst_18 {dimension_numbers = #tpu.dot_dimension_numbers<[0], [0], [1], [1], [0, 1, 1, 1], [], []>} : vector<8x16xf32>, vector<8x16xf32>, vector<16x16xf32> -> vector<16x16xf32>
    %cst_19 = arith.constant 0.353553385 : f32
    %40 = vector.broadcast %cst_19 : f32 to vector<16x16xf32>
    %41 = arith.mulf %39, %40 : vector<16x16xf32>
    %42 = arith.addf %41, %1 : vector<16x16xf32>
    %cst_20 = arith.constant dense<0xFF800000> : vector<16xf32>
    %43 = vector.multi_reduction <maximumf>, %42, %cst_20 [1] : vector<16x16xf32> to vector<16xf32>
    %44 = vector.shape_cast %43 : vector<16xf32> to vector<16x1xf32>
    %45 = vector.broadcast %44 : vector<16x1xf32> to vector<16x16xf32>
    %46 = arith.subf %42, %45 : vector<16x16xf32>
    %47 = math.exp %46 : vector<16x16xf32>
    %cst_21 = arith.constant dense<0.000000e+00> : vector<16xf32>
    %48 = vector.multi_reduction <add>, %47, %cst_21 [1] : vector<16x16xf32> to vector<16xf32>
    %49 = vector.shape_cast %48 : vector<16xf32> to vector<16x1xf32>
    %50 = vector.broadcast %49 : vector<16x1xf32> to vector<16x16xf32>
    %51 = arith.divf %47, %50 : vector<16x16xf32>
    %cst_22 = arith.constant dense<0.000000e+00> : vector<16x8xf32>
    %52 = tpu.matmul %51, %38, %cst_22 {dimension_numbers = #tpu.dot_dimension_numbers<[1], [1], [0], [0], [0, 0, 1, 0], [], []>} : vector<16x16xf32>, vector<8x16xf32>, vector<16x8xf32> -> vector<16x8xf32>
    %c0_23 = arith.constant 0 : index
    %c0_24 = arith.constant 0 : index
    %c0_25 = arith.constant 0 : index
    %53 = vector.load %arg5[%c0_23, %c0_24, %c0_25] : memref<3x128x64xf32, #tpu.memory_space<vmem>>, vector<1x8x32xf32>
    %54 = vector.shape_cast %53 : vector<1x8x32xf32> to vector<8x32xf32>
    %cst_26 = arith.constant dense<0.000000e+00> : vector<16x32xf32>
    %55 = tpu.matmul %52, %54, %cst_26 {dimension_numbers = #tpu.dot_dimension_numbers<[1], [0], [0], [1], [0, 0, 1, 1], [], []>} : vector<16x8xf32>, vector<8x32xf32>, vector<16x32xf32> -> vector<16x32xf32>
    %56 = arith.addf %35, %55 : vector<16x32xf32>
    %57 = vector.extract_strided_slice %34 {offsets = [8, 0], sizes = [8, 16], strides = [1, 1]} : vector<96x16xf32> to vector<8x16xf32>
    %58 = vector.extract_strided_slice %34 {offsets = [40, 0], sizes = [8, 16], strides = [1, 1]} : vector<96x16xf32> to vector<8x16xf32>
    %59 = vector.extract_strided_slice %34 {offsets = [72, 0], sizes = [8, 16], strides = [1, 1]} : vector<96x16xf32> to vector<8x16xf32>
    %cst_27 = arith.constant dense<0.000000e+00> : vector<16x16xf32>
    %60 = tpu.matmul %57, %58, %cst_27 {dimension_numbers = #tpu.dot_dimension_numbers<[0], [0], [1], [1], [0, 1, 1, 1], [], []>} : vector<8x16xf32>, vector<8x16xf32>, vector<16x16xf32> -> vector<16x16xf32>
    %cst_28 = arith.constant 0.353553385 : f32
    %61 = vector.broadcast %cst_28 : f32 to vector<16x16xf32>
    %62 = arith.mulf %60, %61 : vector<16x16xf32>
    %63 = arith.addf %62, %1 : vector<16x16xf32>
    %cst_29 = arith.constant dense<0xFF800000> : vector<16xf32>
    %64 = vector.multi_reduction <maximumf>, %63, %cst_29 [1] : vector<16x16xf32> to vector<16xf32>
    %65 = vector.shape_cast %64 : vector<16xf32> to vector<16x1xf32>
    %66 = vector.broadcast %65 : vector<16x1xf32> to vector<16x16xf32>
    %67 = arith.subf %63, %66 : vector<16x16xf32>
    %68 = math.exp %67 : vector<16x16xf32>
    %cst_30 = arith.constant dense<0.000000e+00> : vector<16xf32>
    %69 = vector.multi_reduction <add>, %68, %cst_30 [1] : vector<16x16xf32> to vector<16xf32>
    %70 = vector.shape_cast %69 : vector<16xf32> to vector<16x1xf32>
    %71 = vector.broadcast %70 : vector<16x1xf32> to vector<16x16xf32>
    %72 = arith.divf %68, %71 : vector<16x16xf32>
    %cst_31 = arith.constant dense<0.000000e+00> : vector<16x8xf32>
    %73 = tpu.matmul %72, %59, %cst_31 {dimension_numbers = #tpu.dot_dimension_numbers<[1], [1], [0], [0], [0, 0, 1, 0], [], []>} : vector<16x16xf32>, vector<8x16xf32>, vector<16x8xf32> -> vector<16x8xf32>
    %c0_32 = arith.constant 0 : index
    %c8 = arith.constant 8 : index
    %c0_33 = arith.constant 0 : index
    %74 = vector.load %arg5[%c0_32, %c8, %c0_33] : memref<3x128x64xf32, #tpu.memory_space<vmem>>, vector<1x8x32xf32>
    %75 = vector.shape_cast %74 : vector<1x8x32xf32> to vector<8x32xf32>
    %cst_34 = arith.constant dense<0.000000e+00> : vector<16x32xf32>
    %76 = tpu.matmul %73, %75, %cst_34 {dimension_numbers = #tpu.dot_dimension_numbers<[1], [0], [0], [1], [0, 0, 1, 1], [], []>} : vector<16x8xf32>, vector<8x32xf32>, vector<16x32xf32> -> vector<16x32xf32>
    %77 = arith.addf %56, %76 : vector<16x32xf32>
    %78 = vector.extract_strided_slice %34 {offsets = [16, 0], sizes = [8, 16], strides = [1, 1]} : vector<96x16xf32> to vector<8x16xf32>
    %79 = vector.extract_strided_slice %34 {offsets = [48, 0], sizes = [8, 16], strides = [1, 1]} : vector<96x16xf32> to vector<8x16xf32>
    %80 = vector.extract_strided_slice %34 {offsets = [80, 0], sizes = [8, 16], strides = [1, 1]} : vector<96x16xf32> to vector<8x16xf32>
    %cst_35 = arith.constant dense<0.000000e+00> : vector<16x16xf32>
    %81 = tpu.matmul %78, %79, %cst_35 {dimension_numbers = #tpu.dot_dimension_numbers<[0], [0], [1], [1], [0, 1, 1, 1], [], []>} : vector<8x16xf32>, vector<8x16xf32>, vector<16x16xf32> -> vector<16x16xf32>
    %cst_36 = arith.constant 0.353553385 : f32
    %82 = vector.broadcast %cst_36 : f32 to vector<16x16xf32>
    %83 = arith.mulf %81, %82 : vector<16x16xf32>
    %84 = arith.addf %83, %1 : vector<16x16xf32>
    %cst_37 = arith.constant dense<0xFF800000> : vector<16xf32>
    %85 = vector.multi_reduction <maximumf>, %84, %cst_37 [1] : vector<16x16xf32> to vector<16xf32>
    %86 = vector.shape_cast %85 : vector<16xf32> to vector<16x1xf32>
    %87 = vector.broadcast %86 : vector<16x1xf32> to vector<16x16xf32>
    %88 = arith.subf %84, %87 : vector<16x16xf32>
    %89 = math.exp %88 : vector<16x16xf32>
    %cst_38 = arith.constant dense<0.000000e+00> : vector<16xf32>
    %90 = vector.multi_reduction <add>, %89, %cst_38 [1] : vector<16x16xf32> to vector<16xf32>
    %91 = vector.shape_cast %90 : vector<16xf32> to vector<16x1xf32>
    %92 = vector.broadcast %91 : vector<16x1xf32> to vector<16x16xf32>
    %93 = arith.divf %89, %92 : vector<16x16xf32>
    %cst_39 = arith.constant dense<0.000000e+00> : vector<16x8xf32>
    %94 = tpu.matmul %93, %80, %cst_39 {dimension_numbers = #tpu.dot_dimension_numbers<[1], [1], [0], [0], [0, 0, 1, 0], [], []>} : vector<16x16xf32>, vector<8x16xf32>, vector<16x8xf32> -> vector<16x8xf32>
    %c0_40 = arith.constant 0 : index
    %c16 = arith.constant 16 : index
    %c0_41 = arith.constant 0 : index
    %95 = vector.load %arg5[%c0_40, %c16, %c0_41] : memref<3x128x64xf32, #tpu.memory_space<vmem>>, vector<1x8x32xf32>
    %96 = vector.shape_cast %95 : vector<1x8x32xf32> to vector<8x32xf32>
    %cst_42 = arith.constant dense<0.000000e+00> : vector<16x32xf32>
    %97 = tpu.matmul %94, %96, %cst_42 {dimension_numbers = #tpu.dot_dimension_numbers<[1], [0], [0], [1], [0, 0, 1, 1], [], []>} : vector<16x8xf32>, vector<8x32xf32>, vector<16x32xf32> -> vector<16x32xf32>
    %98 = arith.addf %77, %97 : vector<16x32xf32>
    %99 = vector.extract_strided_slice %34 {offsets = [24, 0], sizes = [8, 16], strides = [1, 1]} : vector<96x16xf32> to vector<8x16xf32>
    %100 = vector.extract_strided_slice %34 {offsets = [56, 0], sizes = [8, 16], strides = [1, 1]} : vector<96x16xf32> to vector<8x16xf32>
    %101 = vector.extract_strided_slice %34 {offsets = [88, 0], sizes = [8, 16], strides = [1, 1]} : vector<96x16xf32> to vector<8x16xf32>
    %cst_43 = arith.constant dense<0.000000e+00> : vector<16x16xf32>
    %102 = tpu.matmul %99, %100, %cst_43 {dimension_numbers = #tpu.dot_dimension_numbers<[0], [0], [1], [1], [0, 1, 1, 1], [], []>} : vector<8x16xf32>, vector<8x16xf32>, vector<16x16xf32> -> vector<16x16xf32>
    %cst_44 = arith.constant 0.353553385 : f32
    %103 = vector.broadcast %cst_44 : f32 to vector<16x16xf32>
    %104 = arith.mulf %102, %103 : vector<16x16xf32>
    %105 = arith.addf %104, %1 : vector<16x16xf32>
    %cst_45 = arith.constant dense<0xFF800000> : vector<16xf32>
    %106 = vector.multi_reduction <maximumf>, %105, %cst_45 [1] : vector<16x16xf32> to vector<16xf32>
    %107 = vector.shape_cast %106 : vector<16xf32> to vector<16x1xf32>
    %108 = vector.broadcast %107 : vector<16x1xf32> to vector<16x16xf32>
    %109 = arith.subf %105, %108 : vector<16x16xf32>
    %110 = math.exp %109 : vector<16x16xf32>
    %cst_46 = arith.constant dense<0.000000e+00> : vector<16xf32>
    %111 = vector.multi_reduction <add>, %110, %cst_46 [1] : vector<16x16xf32> to vector<16xf32>
    %112 = vector.shape_cast %111 : vector<16xf32> to vector<16x1xf32>
    %113 = vector.broadcast %112 : vector<16x1xf32> to vector<16x16xf32>
    %114 = arith.divf %110, %113 : vector<16x16xf32>
    %cst_47 = arith.constant dense<0.000000e+00> : vector<16x8xf32>
    %115 = tpu.matmul %114, %101, %cst_47 {dimension_numbers = #tpu.dot_dimension_numbers<[1], [1], [0], [0], [0, 0, 1, 0], [], []>} : vector<16x16xf32>, vector<8x16xf32>, vector<16x8xf32> -> vector<16x8xf32>
    %c0_48 = arith.constant 0 : index
    %c24 = arith.constant 24 : index
    %c0_49 = arith.constant 0 : index
    %116 = vector.load %arg5[%c0_48, %c24, %c0_49] : memref<3x128x64xf32, #tpu.memory_space<vmem>>, vector<1x8x32xf32>
    %117 = vector.shape_cast %116 : vector<1x8x32xf32> to vector<8x32xf32>
    %cst_50 = arith.constant dense<0.000000e+00> : vector<16x32xf32>
    %118 = tpu.matmul %115, %117, %cst_50 {dimension_numbers = #tpu.dot_dimension_numbers<[1], [0], [0], [1], [0, 0, 1, 1], [], []>} : vector<16x8xf32>, vector<8x32xf32>, vector<16x32xf32> -> vector<16x32xf32>
    %119 = arith.addf %98, %118 : vector<16x32xf32>
    %c3 = arith.constant 3 : index
    %c0_51 = arith.constant 0 : index
    %120 = vector.load %arg6[%c3, %c0_51] : memref<24x64xf32, #tpu.memory_space<vmem>>, vector<1x32xf32>
    %121 = vector.broadcast %120 : vector<1x32xf32> to vector<16x32xf32>
    %122 = arith.addf %119, %121 : vector<16x32xf32>
    %123 = arith.addf %122, %27 : vector<16x32xf32>
    %c4 = arith.constant 4 : index
    %c0_52 = arith.constant 0 : index
    %124 = vector.load %arg6[%c4, %c0_52] : memref<24x64xf32, #tpu.memory_space<vmem>>, vector<1x32xf32>
    %c5 = arith.constant 5 : index
    %c0_53 = arith.constant 0 : index
    %125 = vector.load %arg6[%c5, %c0_53] : memref<24x64xf32, #tpu.memory_space<vmem>>, vector<1x32xf32>
    %cst_54 = arith.constant dense<0.000000e+00> : vector<16xf32>
    %126 = vector.multi_reduction <add>, %123, %cst_54 [1] : vector<16x32xf32> to vector<16xf32>
    %127 = vector.shape_cast %126 : vector<16xf32> to vector<16x1xf32>
    %cst_55 = arith.constant 3.200000e+01 : f32
    %128 = vector.broadcast %cst_55 : f32 to vector<16x1xf32>
    %129 = arith.divf %127, %128 : vector<16x1xf32>
    %130 = vector.broadcast %129 : vector<16x1xf32> to vector<16x32xf32>
    %131 = arith.subf %123, %130 : vector<16x32xf32>
    %132 = vector.broadcast %129 : vector<16x1xf32> to vector<16x32xf32>
    %133 = arith.subf %123, %132 : vector<16x32xf32>
    %134 = arith.mulf %131, %133 : vector<16x32xf32>
    %cst_56 = arith.constant dense<0.000000e+00> : vector<16xf32>
    %135 = vector.multi_reduction <add>, %134, %cst_56 [1] : vector<16x32xf32> to vector<16xf32>
    %136 = vector.shape_cast %135 : vector<16xf32> to vector<16x1xf32>
    %cst_57 = arith.constant 3.200000e+01 : f32
    %137 = vector.broadcast %cst_57 : f32 to vector<16x1xf32>
    %138 = arith.divf %136, %137 : vector<16x1xf32>
    %139 = vector.broadcast %129 : vector<16x1xf32> to vector<16x32xf32>
    %140 = arith.subf %123, %139 : vector<16x32xf32>
    %cst_58 = arith.constant 9.99999996E-13 : f32
    %141 = vector.broadcast %cst_58 : f32 to vector<16x1xf32>
    %142 = arith.addf %138, %141 : vector<16x1xf32>
    %143 = math.rsqrt %142 : vector<16x1xf32>
    %144 = vector.broadcast %143 : vector<16x1xf32> to vector<16x32xf32>
    %145 = arith.mulf %140, %144 : vector<16x32xf32>
    %146 = vector.broadcast %124 : vector<1x32xf32> to vector<16x32xf32>
    %147 = arith.mulf %145, %146 : vector<16x32xf32>
    %148 = vector.broadcast %125 : vector<1x32xf32> to vector<16x32xf32>
    %149 = arith.addf %147, %148 : vector<16x32xf32>
    %c0_59 = arith.constant 0 : index
    %c32 = arith.constant 32 : index
    %c0_60 = arith.constant 0 : index
    %150 = vector.load %arg5[%c0_59, %c32, %c0_60] : memref<3x128x64xf32, #tpu.memory_space<vmem>>, vector<1x32x64xf32>
    %151 = vector.shape_cast %150 : vector<1x32x64xf32> to vector<32x64xf32>
    %cst_61 = arith.constant dense<0.000000e+00> : vector<16x64xf32>
    %152 = tpu.matmul %149, %151, %cst_61 {dimension_numbers = #tpu.dot_dimension_numbers<[1], [0], [0], [1], [0, 0, 1, 1], [], []>} : vector<16x32xf32>, vector<32x64xf32>, vector<16x64xf32> -> vector<16x64xf32>
    %c6 = arith.constant 6 : index
    %c0_62 = arith.constant 0 : index
    %153 = vector.load %arg6[%c6, %c0_62] : memref<24x64xf32, #tpu.memory_space<vmem>>, vector<1x64xf32>
    %154 = vector.broadcast %153 : vector<1x64xf32> to vector<16x64xf32>
    %155 = arith.addf %152, %154 : vector<16x64xf32>
    %156 = arith.mulf %155, %155 : vector<16x64xf32>
    %157 = arith.mulf %155, %156 : vector<16x64xf32>
    %cst_63 = arith.constant 4.471500e-02 : f32
    %158 = vector.broadcast %cst_63 : f32 to vector<16x64xf32>
    %159 = arith.mulf %158, %157 : vector<16x64xf32>
    %160 = arith.addf %155, %159 : vector<16x64xf32>
    %cst_64 = arith.constant 0.797884583 : f32
    %161 = vector.broadcast %cst_64 : f32 to vector<16x64xf32>
    %162 = arith.mulf %161, %160 : vector<16x64xf32>
    %163 = math.tanh %162 : vector<16x64xf32>
    %cst_65 = arith.constant 1.000000e+00 : f32
    %164 = vector.broadcast %cst_65 : f32 to vector<16x64xf32>
    %165 = arith.addf %164, %163 : vector<16x64xf32>
    %cst_66 = arith.constant 5.000000e-01 : f32
    %166 = vector.broadcast %cst_66 : f32 to vector<16x64xf32>
    %167 = arith.mulf %166, %165 : vector<16x64xf32>
    %168 = arith.mulf %155, %167 : vector<16x64xf32>
    %c0_67 = arith.constant 0 : index
    %c64 = arith.constant 64 : index
    %c0_68 = arith.constant 0 : index
    %169 = vector.load %arg5[%c0_67, %c64, %c0_68] : memref<3x128x64xf32, #tpu.memory_space<vmem>>, vector<1x64x32xf32>
    %170 = vector.shape_cast %169 : vector<1x64x32xf32> to vector<64x32xf32>
    %cst_69 = arith.constant dense<0.000000e+00> : vector<16x32xf32>
    %171 = tpu.matmul %168, %170, %cst_69 {dimension_numbers = #tpu.dot_dimension_numbers<[1], [0], [0], [1], [0, 0, 1, 1], [], []>} : vector<16x64xf32>, vector<64x32xf32>, vector<16x32xf32> -> vector<16x32xf32>
    %c7 = arith.constant 7 : index
    %c0_70 = arith.constant 0 : index
    %172 = vector.load %arg6[%c7, %c0_70] : memref<24x64xf32, #tpu.memory_space<vmem>>, vector<1x32xf32>
    %173 = vector.broadcast %172 : vector<1x32xf32> to vector<16x32xf32>
    %174 = arith.addf %171, %173 : vector<16x32xf32>
    %175 = arith.addf %174, %149 : vector<16x32xf32>
    %c8_71 = arith.constant 8 : index
    %c0_72 = arith.constant 0 : index
    %176 = vector.load %arg6[%c8_71, %c0_72] : memref<24x64xf32, #tpu.memory_space<vmem>>, vector<1x32xf32>
    %c9 = arith.constant 9 : index
    %c0_73 = arith.constant 0 : index
    %177 = vector.load %arg6[%c9, %c0_73] : memref<24x64xf32, #tpu.memory_space<vmem>>, vector<1x32xf32>
    %cst_74 = arith.constant dense<0.000000e+00> : vector<16xf32>
    %178 = vector.multi_reduction <add>, %175, %cst_74 [1] : vector<16x32xf32> to vector<16xf32>
    %179 = vector.shape_cast %178 : vector<16xf32> to vector<16x1xf32>
    %cst_75 = arith.constant 3.200000e+01 : f32
    %180 = vector.broadcast %cst_75 : f32 to vector<16x1xf32>
    %181 = arith.divf %179, %180 : vector<16x1xf32>
    %182 = vector.broadcast %181 : vector<16x1xf32> to vector<16x32xf32>
    %183 = arith.subf %175, %182 : vector<16x32xf32>
    %184 = vector.broadcast %181 : vector<16x1xf32> to vector<16x32xf32>
    %185 = arith.subf %175, %184 : vector<16x32xf32>
    %186 = arith.mulf %183, %185 : vector<16x32xf32>
    %cst_76 = arith.constant dense<0.000000e+00> : vector<16xf32>
    %187 = vector.multi_reduction <add>, %186, %cst_76 [1] : vector<16x32xf32> to vector<16xf32>
    %188 = vector.shape_cast %187 : vector<16xf32> to vector<16x1xf32>
    %cst_77 = arith.constant 3.200000e+01 : f32
    %189 = vector.broadcast %cst_77 : f32 to vector<16x1xf32>
    %190 = arith.divf %188, %189 : vector<16x1xf32>
    %191 = vector.broadcast %181 : vector<16x1xf32> to vector<16x32xf32>
    %192 = arith.subf %175, %191 : vector<16x32xf32>
    %cst_78 = arith.constant 9.99999996E-13 : f32
    %193 = vector.broadcast %cst_78 : f32 to vector<16x1xf32>
    %194 = arith.addf %190, %193 : vector<16x1xf32>
    %195 = math.rsqrt %194 : vector<16x1xf32>
    %196 = vector.broadcast %195 : vector<16x1xf32> to vector<16x32xf32>
    %197 = arith.mulf %192, %196 : vector<16x32xf32>
    %198 = vector.broadcast %176 : vector<1x32xf32> to vector<16x32xf32>
    %199 = arith.mulf %197, %198 : vector<16x32xf32>
    %200 = vector.broadcast %177 : vector<1x32xf32> to vector<16x32xf32>
    %201 = arith.addf %199, %200 : vector<16x32xf32>
    %202 = vector.extract_strided_slice %201 {offsets = [0, 0], sizes = [1, 32], strides = [1, 1]} : vector<16x32xf32> to vector<1x32xf32>
    %203 = vector.extract_strided_slice %201 {offsets = [8, 0], sizes = [1, 32], strides = [1, 1]} : vector<16x32xf32> to vector<1x32xf32>
    %204 = tpu.concatenate %202, %203 in 0 : vector<1x32xf32>, vector<1x32xf32> -> vector<2x32xf32>
    %c1_79 = arith.constant 1 : index
    %c0_80 = arith.constant 0 : index
    %c0_81 = arith.constant 0 : index
    %205 = vector.load %arg3[%c1_79, %c0_80, %c0_81] : memref<3x32x96xf32, #tpu.memory_space<vmem>>, vector<1x32x96xf32>
    %206 = vector.shape_cast %205 : vector<1x32x96xf32> to vector<32x96xf32>
    %cst_82 = arith.constant dense<0.000000e+00> : vector<96x16xf32>
    %207 = tpu.matmul %206, %201, %cst_82 {dimension_numbers = #tpu.dot_dimension_numbers<[0], [1], [1], [0], [0, 1, 1, 0], [], []>} : vector<32x96xf32>, vector<16x32xf32>, vector<96x16xf32> -> vector<96x16xf32>
    %c1_83 = arith.constant 1 : index
    %c0_84 = arith.constant 0 : index
    %c0_85 = arith.constant 0 : index
    %208 = vector.load %arg4[%c1_83, %c0_84, %c0_85] : memref<3x96x1xf32, #tpu.memory_space<vmem>>, vector<1x96x1xf32>
    %209 = vector.shape_cast %208 : vector<1x96x1xf32> to vector<96x1xf32>
    %210 = vector.broadcast %209 : vector<96x1xf32> to vector<96x16xf32>
    %211 = arith.addf %207, %210 : vector<96x16xf32>
    %cst_86 = arith.constant 0.000000e+00 : f32
    %212 = vector.broadcast %cst_86 : f32 to vector<16x32xf32>
    %213 = vector.extract_strided_slice %211 {offsets = [0, 0], sizes = [8, 16], strides = [1, 1]} : vector<96x16xf32> to vector<8x16xf32>
    %214 = vector.extract_strided_slice %211 {offsets = [32, 0], sizes = [8, 16], strides = [1, 1]} : vector<96x16xf32> to vector<8x16xf32>
    %215 = vector.extract_strided_slice %211 {offsets = [64, 0], sizes = [8, 16], strides = [1, 1]} : vector<96x16xf32> to vector<8x16xf32>
    %cst_87 = arith.constant dense<0.000000e+00> : vector<16x16xf32>
    %216 = tpu.matmul %213, %214, %cst_87 {dimension_numbers = #tpu.dot_dimension_numbers<[0], [0], [1], [1], [0, 1, 1, 1], [], []>} : vector<8x16xf32>, vector<8x16xf32>, vector<16x16xf32> -> vector<16x16xf32>
    %cst_88 = arith.constant 0.353553385 : f32
    %217 = vector.broadcast %cst_88 : f32 to vector<16x16xf32>
    %218 = arith.mulf %216, %217 : vector<16x16xf32>
    %219 = arith.addf %218, %1 : vector<16x16xf32>
    %cst_89 = arith.constant dense<0xFF800000> : vector<16xf32>
    %220 = vector.multi_reduction <maximumf>, %219, %cst_89 [1] : vector<16x16xf32> to vector<16xf32>
    %221 = vector.shape_cast %220 : vector<16xf32> to vector<16x1xf32>
    %222 = vector.broadcast %221 : vector<16x1xf32> to vector<16x16xf32>
    %223 = arith.subf %219, %222 : vector<16x16xf32>
    %224 = math.exp %223 : vector<16x16xf32>
    %cst_90 = arith.constant dense<0.000000e+00> : vector<16xf32>
    %225 = vector.multi_reduction <add>, %224, %cst_90 [1] : vector<16x16xf32> to vector<16xf32>
    %226 = vector.shape_cast %225 : vector<16xf32> to vector<16x1xf32>
    %227 = vector.broadcast %226 : vector<16x1xf32> to vector<16x16xf32>
    %228 = arith.divf %224, %227 : vector<16x16xf32>
    %cst_91 = arith.constant dense<0.000000e+00> : vector<16x8xf32>
    %229 = tpu.matmul %228, %215, %cst_91 {dimension_numbers = #tpu.dot_dimension_numbers<[1], [1], [0], [0], [0, 0, 1, 0], [], []>} : vector<16x16xf32>, vector<8x16xf32>, vector<16x8xf32> -> vector<16x8xf32>
    %c1_92 = arith.constant 1 : index
    %c0_93 = arith.constant 0 : index
    %c0_94 = arith.constant 0 : index
    %230 = vector.load %arg5[%c1_92, %c0_93, %c0_94] : memref<3x128x64xf32, #tpu.memory_space<vmem>>, vector<1x8x32xf32>
    %231 = vector.shape_cast %230 : vector<1x8x32xf32> to vector<8x32xf32>
    %cst_95 = arith.constant dense<0.000000e+00> : vector<16x32xf32>
    %232 = tpu.matmul %229, %231, %cst_95 {dimension_numbers = #tpu.dot_dimension_numbers<[1], [0], [0], [1], [0, 0, 1, 1], [], []>} : vector<16x8xf32>, vector<8x32xf32>, vector<16x32xf32> -> vector<16x32xf32>
    %233 = arith.addf %212, %232 : vector<16x32xf32>
    %234 = vector.extract_strided_slice %211 {offsets = [8, 0], sizes = [8, 16], strides = [1, 1]} : vector<96x16xf32> to vector<8x16xf32>
    %235 = vector.extract_strided_slice %211 {offsets = [40, 0], sizes = [8, 16], strides = [1, 1]} : vector<96x16xf32> to vector<8x16xf32>
    %236 = vector.extract_strided_slice %211 {offsets = [72, 0], sizes = [8, 16], strides = [1, 1]} : vector<96x16xf32> to vector<8x16xf32>
    %cst_96 = arith.constant dense<0.000000e+00> : vector<16x16xf32>
    %237 = tpu.matmul %234, %235, %cst_96 {dimension_numbers = #tpu.dot_dimension_numbers<[0], [0], [1], [1], [0, 1, 1, 1], [], []>} : vector<8x16xf32>, vector<8x16xf32>, vector<16x16xf32> -> vector<16x16xf32>
    %cst_97 = arith.constant 0.353553385 : f32
    %238 = vector.broadcast %cst_97 : f32 to vector<16x16xf32>
    %239 = arith.mulf %237, %238 : vector<16x16xf32>
    %240 = arith.addf %239, %1 : vector<16x16xf32>
    %cst_98 = arith.constant dense<0xFF800000> : vector<16xf32>
    %241 = vector.multi_reduction <maximumf>, %240, %cst_98 [1] : vector<16x16xf32> to vector<16xf32>
    %242 = vector.shape_cast %241 : vector<16xf32> to vector<16x1xf32>
    %243 = vector.broadcast %242 : vector<16x1xf32> to vector<16x16xf32>
    %244 = arith.subf %240, %243 : vector<16x16xf32>
    %245 = math.exp %244 : vector<16x16xf32>
    %cst_99 = arith.constant dense<0.000000e+00> : vector<16xf32>
    %246 = vector.multi_reduction <add>, %245, %cst_99 [1] : vector<16x16xf32> to vector<16xf32>
    %247 = vector.shape_cast %246 : vector<16xf32> to vector<16x1xf32>
    %248 = vector.broadcast %247 : vector<16x1xf32> to vector<16x16xf32>
    %249 = arith.divf %245, %248 : vector<16x16xf32>
    %cst_100 = arith.constant dense<0.000000e+00> : vector<16x8xf32>
    %250 = tpu.matmul %249, %236, %cst_100 {dimension_numbers = #tpu.dot_dimension_numbers<[1], [1], [0], [0], [0, 0, 1, 0], [], []>} : vector<16x16xf32>, vector<8x16xf32>, vector<16x8xf32> -> vector<16x8xf32>
    %c1_101 = arith.constant 1 : index
    %c8_102 = arith.constant 8 : index
    %c0_103 = arith.constant 0 : index
    %251 = vector.load %arg5[%c1_101, %c8_102, %c0_103] : memref<3x128x64xf32, #tpu.memory_space<vmem>>, vector<1x8x32xf32>
    %252 = vector.shape_cast %251 : vector<1x8x32xf32> to vector<8x32xf32>
    %cst_104 = arith.constant dense<0.000000e+00> : vector<16x32xf32>
    %253 = tpu.matmul %250, %252, %cst_104 {dimension_numbers = #tpu.dot_dimension_numbers<[1], [0], [0], [1], [0, 0, 1, 1], [], []>} : vector<16x8xf32>, vector<8x32xf32>, vector<16x32xf32> -> vector<16x32xf32>
    %254 = arith.addf %233, %253 : vector<16x32xf32>
    %255 = vector.extract_strided_slice %211 {offsets = [16, 0], sizes = [8, 16], strides = [1, 1]} : vector<96x16xf32> to vector<8x16xf32>
    %256 = vector.extract_strided_slice %211 {offsets = [48, 0], sizes = [8, 16], strides = [1, 1]} : vector<96x16xf32> to vector<8x16xf32>
    %257 = vector.extract_strided_slice %211 {offsets = [80, 0], sizes = [8, 16], strides = [1, 1]} : vector<96x16xf32> to vector<8x16xf32>
    %cst_105 = arith.constant dense<0.000000e+00> : vector<16x16xf32>
    %258 = tpu.matmul %255, %256, %cst_105 {dimension_numbers = #tpu.dot_dimension_numbers<[0], [0], [1], [1], [0, 1, 1, 1], [], []>} : vector<8x16xf32>, vector<8x16xf32>, vector<16x16xf32> -> vector<16x16xf32>
    %cst_106 = arith.constant 0.353553385 : f32
    %259 = vector.broadcast %cst_106 : f32 to vector<16x16xf32>
    %260 = arith.mulf %258, %259 : vector<16x16xf32>
    %261 = arith.addf %260, %1 : vector<16x16xf32>
    %cst_107 = arith.constant dense<0xFF800000> : vector<16xf32>
    %262 = vector.multi_reduction <maximumf>, %261, %cst_107 [1] : vector<16x16xf32> to vector<16xf32>
    %263 = vector.shape_cast %262 : vector<16xf32> to vector<16x1xf32>
    %264 = vector.broadcast %263 : vector<16x1xf32> to vector<16x16xf32>
    %265 = arith.subf %261, %264 : vector<16x16xf32>
    %266 = math.exp %265 : vector<16x16xf32>
    %cst_108 = arith.constant dense<0.000000e+00> : vector<16xf32>
    %267 = vector.multi_reduction <add>, %266, %cst_108 [1] : vector<16x16xf32> to vector<16xf32>
    %268 = vector.shape_cast %267 : vector<16xf32> to vector<16x1xf32>
    %269 = vector.broadcast %268 : vector<16x1xf32> to vector<16x16xf32>
    %270 = arith.divf %266, %269 : vector<16x16xf32>
    %cst_109 = arith.constant dense<0.000000e+00> : vector<16x8xf32>
    %271 = tpu.matmul %270, %257, %cst_109 {dimension_numbers = #tpu.dot_dimension_numbers<[1], [1], [0], [0], [0, 0, 1, 0], [], []>} : vector<16x16xf32>, vector<8x16xf32>, vector<16x8xf32> -> vector<16x8xf32>
    %c1_110 = arith.constant 1 : index
    %c16_111 = arith.constant 16 : index
    %c0_112 = arith.constant 0 : index
    %272 = vector.load %arg5[%c1_110, %c16_111, %c0_112] : memref<3x128x64xf32, #tpu.memory_space<vmem>>, vector<1x8x32xf32>
    %273 = vector.shape_cast %272 : vector<1x8x32xf32> to vector<8x32xf32>
    %cst_113 = arith.constant dense<0.000000e+00> : vector<16x32xf32>
    %274 = tpu.matmul %271, %273, %cst_113 {dimension_numbers = #tpu.dot_dimension_numbers<[1], [0], [0], [1], [0, 0, 1, 1], [], []>} : vector<16x8xf32>, vector<8x32xf32>, vector<16x32xf32> -> vector<16x32xf32>
    %275 = arith.addf %254, %274 : vector<16x32xf32>
    %276 = vector.extract_strided_slice %211 {offsets = [24, 0], sizes = [8, 16], strides = [1, 1]} : vector<96x16xf32> to vector<8x16xf32>
    %277 = vector.extract_strided_slice %211 {offsets = [56, 0], sizes = [8, 16], strides = [1, 1]} : vector<96x16xf32> to vector<8x16xf32>
    %278 = vector.extract_strided_slice %211 {offsets = [88, 0], sizes = [8, 16], strides = [1, 1]} : vector<96x16xf32> to vector<8x16xf32>
    %cst_114 = arith.constant dense<0.000000e+00> : vector<16x16xf32>
    %279 = tpu.matmul %276, %277, %cst_114 {dimension_numbers = #tpu.dot_dimension_numbers<[0], [0], [1], [1], [0, 1, 1, 1], [], []>} : vector<8x16xf32>, vector<8x16xf32>, vector<16x16xf32> -> vector<16x16xf32>
    %cst_115 = arith.constant 0.353553385 : f32
    %280 = vector.broadcast %cst_115 : f32 to vector<16x16xf32>
    %281 = arith.mulf %279, %280 : vector<16x16xf32>
    %282 = arith.addf %281, %1 : vector<16x16xf32>
    %cst_116 = arith.constant dense<0xFF800000> : vector<16xf32>
    %283 = vector.multi_reduction <maximumf>, %282, %cst_116 [1] : vector<16x16xf32> to vector<16xf32>
    %284 = vector.shape_cast %283 : vector<16xf32> to vector<16x1xf32>
    %285 = vector.broadcast %284 : vector<16x1xf32> to vector<16x16xf32>
    %286 = arith.subf %282, %285 : vector<16x16xf32>
    %287 = math.exp %286 : vector<16x16xf32>
    %cst_117 = arith.constant dense<0.000000e+00> : vector<16xf32>
    %288 = vector.multi_reduction <add>, %287, %cst_117 [1] : vector<16x16xf32> to vector<16xf32>
    %289 = vector.shape_cast %288 : vector<16xf32> to vector<16x1xf32>
    %290 = vector.broadcast %289 : vector<16x1xf32> to vector<16x16xf32>
    %291 = arith.divf %287, %290 : vector<16x16xf32>
    %cst_118 = arith.constant dense<0.000000e+00> : vector<16x8xf32>
    %292 = tpu.matmul %291, %278, %cst_118 {dimension_numbers = #tpu.dot_dimension_numbers<[1], [1], [0], [0], [0, 0, 1, 0], [], []>} : vector<16x16xf32>, vector<8x16xf32>, vector<16x8xf32> -> vector<16x8xf32>
    %c1_119 = arith.constant 1 : index
    %c24_120 = arith.constant 24 : index
    %c0_121 = arith.constant 0 : index
    %293 = vector.load %arg5[%c1_119, %c24_120, %c0_121] : memref<3x128x64xf32, #tpu.memory_space<vmem>>, vector<1x8x32xf32>
    %294 = vector.shape_cast %293 : vector<1x8x32xf32> to vector<8x32xf32>
    %cst_122 = arith.constant dense<0.000000e+00> : vector<16x32xf32>
    %295 = tpu.matmul %292, %294, %cst_122 {dimension_numbers = #tpu.dot_dimension_numbers<[1], [0], [0], [1], [0, 0, 1, 1], [], []>} : vector<16x8xf32>, vector<8x32xf32>, vector<16x32xf32> -> vector<16x32xf32>
    %296 = arith.addf %275, %295 : vector<16x32xf32>
    %c10 = arith.constant 10 : index
    %c0_123 = arith.constant 0 : index
    %297 = vector.load %arg6[%c10, %c0_123] : memref<24x64xf32, #tpu.memory_space<vmem>>, vector<1x32xf32>
    %298 = vector.broadcast %297 : vector<1x32xf32> to vector<16x32xf32>
    %299 = arith.addf %296, %298 : vector<16x32xf32>
    %300 = arith.addf %299, %201 : vector<16x32xf32>
    %c11 = arith.constant 11 : index
    %c0_124 = arith.constant 0 : index
    %301 = vector.load %arg6[%c11, %c0_124] : memref<24x64xf32, #tpu.memory_space<vmem>>, vector<1x32xf32>
    %c12 = arith.constant 12 : index
    %c0_125 = arith.constant 0 : index
    %302 = vector.load %arg6[%c12, %c0_125] : memref<24x64xf32, #tpu.memory_space<vmem>>, vector<1x32xf32>
    %cst_126 = arith.constant dense<0.000000e+00> : vector<16xf32>
    %303 = vector.multi_reduction <add>, %300, %cst_126 [1] : vector<16x32xf32> to vector<16xf32>
    %304 = vector.shape_cast %303 : vector<16xf32> to vector<16x1xf32>
    %cst_127 = arith.constant 3.200000e+01 : f32
    %305 = vector.broadcast %cst_127 : f32 to vector<16x1xf32>
    %306 = arith.divf %304, %305 : vector<16x1xf32>
    %307 = vector.broadcast %306 : vector<16x1xf32> to vector<16x32xf32>
    %308 = arith.subf %300, %307 : vector<16x32xf32>
    %309 = vector.broadcast %306 : vector<16x1xf32> to vector<16x32xf32>
    %310 = arith.subf %300, %309 : vector<16x32xf32>
    %311 = arith.mulf %308, %310 : vector<16x32xf32>
    %cst_128 = arith.constant dense<0.000000e+00> : vector<16xf32>
    %312 = vector.multi_reduction <add>, %311, %cst_128 [1] : vector<16x32xf32> to vector<16xf32>
    %313 = vector.shape_cast %312 : vector<16xf32> to vector<16x1xf32>
    %cst_129 = arith.constant 3.200000e+01 : f32
    %314 = vector.broadcast %cst_129 : f32 to vector<16x1xf32>
    %315 = arith.divf %313, %314 : vector<16x1xf32>
    %316 = vector.broadcast %306 : vector<16x1xf32> to vector<16x32xf32>
    %317 = arith.subf %300, %316 : vector<16x32xf32>
    %cst_130 = arith.constant 9.99999996E-13 : f32
    %318 = vector.broadcast %cst_130 : f32 to vector<16x1xf32>
    %319 = arith.addf %315, %318 : vector<16x1xf32>
    %320 = math.rsqrt %319 : vector<16x1xf32>
    %321 = vector.broadcast %320 : vector<16x1xf32> to vector<16x32xf32>
    %322 = arith.mulf %317, %321 : vector<16x32xf32>
    %323 = vector.broadcast %301 : vector<1x32xf32> to vector<16x32xf32>
    %324 = arith.mulf %322, %323 : vector<16x32xf32>
    %325 = vector.broadcast %302 : vector<1x32xf32> to vector<16x32xf32>
    %326 = arith.addf %324, %325 : vector<16x32xf32>
    %c1_131 = arith.constant 1 : index
    %c32_132 = arith.constant 32 : index
    %c0_133 = arith.constant 0 : index
    %327 = vector.load %arg5[%c1_131, %c32_132, %c0_133] : memref<3x128x64xf32, #tpu.memory_space<vmem>>, vector<1x32x64xf32>
    %328 = vector.shape_cast %327 : vector<1x32x64xf32> to vector<32x64xf32>
    %cst_134 = arith.constant dense<0.000000e+00> : vector<16x64xf32>
    %329 = tpu.matmul %326, %328, %cst_134 {dimension_numbers = #tpu.dot_dimension_numbers<[1], [0], [0], [1], [0, 0, 1, 1], [], []>} : vector<16x32xf32>, vector<32x64xf32>, vector<16x64xf32> -> vector<16x64xf32>
    %c13 = arith.constant 13 : index
    %c0_135 = arith.constant 0 : index
    %330 = vector.load %arg6[%c13, %c0_135] : memref<24x64xf32, #tpu.memory_space<vmem>>, vector<1x64xf32>
    %331 = vector.broadcast %330 : vector<1x64xf32> to vector<16x64xf32>
    %332 = arith.addf %329, %331 : vector<16x64xf32>
    %333 = arith.mulf %332, %332 : vector<16x64xf32>
    %334 = arith.mulf %332, %333 : vector<16x64xf32>
    %cst_136 = arith.constant 4.471500e-02 : f32
    %335 = vector.broadcast %cst_136 : f32 to vector<16x64xf32>
    %336 = arith.mulf %335, %334 : vector<16x64xf32>
    %337 = arith.addf %332, %336 : vector<16x64xf32>
    %cst_137 = arith.constant 0.797884583 : f32
    %338 = vector.broadcast %cst_137 : f32 to vector<16x64xf32>
    %339 = arith.mulf %338, %337 : vector<16x64xf32>
    %340 = math.tanh %339 : vector<16x64xf32>
    %cst_138 = arith.constant 1.000000e+00 : f32
    %341 = vector.broadcast %cst_138 : f32 to vector<16x64xf32>
    %342 = arith.addf %341, %340 : vector<16x64xf32>
    %cst_139 = arith.constant 5.000000e-01 : f32
    %343 = vector.broadcast %cst_139 : f32 to vector<16x64xf32>
    %344 = arith.mulf %343, %342 : vector<16x64xf32>
    %345 = arith.mulf %332, %344 : vector<16x64xf32>
    %c1_140 = arith.constant 1 : index
    %c64_141 = arith.constant 64 : index
    %c0_142 = arith.constant 0 : index
    %346 = vector.load %arg5[%c1_140, %c64_141, %c0_142] : memref<3x128x64xf32, #tpu.memory_space<vmem>>, vector<1x64x32xf32>
    %347 = vector.shape_cast %346 : vector<1x64x32xf32> to vector<64x32xf32>
    %cst_143 = arith.constant dense<0.000000e+00> : vector<16x32xf32>
    %348 = tpu.matmul %345, %347, %cst_143 {dimension_numbers = #tpu.dot_dimension_numbers<[1], [0], [0], [1], [0, 0, 1, 1], [], []>} : vector<16x64xf32>, vector<64x32xf32>, vector<16x32xf32> -> vector<16x32xf32>
    %c14 = arith.constant 14 : index
    %c0_144 = arith.constant 0 : index
    %349 = vector.load %arg6[%c14, %c0_144] : memref<24x64xf32, #tpu.memory_space<vmem>>, vector<1x32xf32>
    %350 = vector.broadcast %349 : vector<1x32xf32> to vector<16x32xf32>
    %351 = arith.addf %348, %350 : vector<16x32xf32>
    %352 = arith.addf %351, %326 : vector<16x32xf32>
    %c15 = arith.constant 15 : index
    %c0_145 = arith.constant 0 : index
    %353 = vector.load %arg6[%c15, %c0_145] : memref<24x64xf32, #tpu.memory_space<vmem>>, vector<1x32xf32>
    %c16_146 = arith.constant 16 : index
    %c0_147 = arith.constant 0 : index
    %354 = vector.load %arg6[%c16_146, %c0_147] : memref<24x64xf32, #tpu.memory_space<vmem>>, vector<1x32xf32>
    %cst_148 = arith.constant dense<0.000000e+00> : vector<16xf32>
    %355 = vector.multi_reduction <add>, %352, %cst_148 [1] : vector<16x32xf32> to vector<16xf32>
    %356 = vector.shape_cast %355 : vector<16xf32> to vector<16x1xf32>
    %cst_149 = arith.constant 3.200000e+01 : f32
    %357 = vector.broadcast %cst_149 : f32 to vector<16x1xf32>
    %358 = arith.divf %356, %357 : vector<16x1xf32>
    %359 = vector.broadcast %358 : vector<16x1xf32> to vector<16x32xf32>
    %360 = arith.subf %352, %359 : vector<16x32xf32>
    %361 = vector.broadcast %358 : vector<16x1xf32> to vector<16x32xf32>
    %362 = arith.subf %352, %361 : vector<16x32xf32>
    %363 = arith.mulf %360, %362 : vector<16x32xf32>
    %cst_150 = arith.constant dense<0.000000e+00> : vector<16xf32>
    %364 = vector.multi_reduction <add>, %363, %cst_150 [1] : vector<16x32xf32> to vector<16xf32>
    %365 = vector.shape_cast %364 : vector<16xf32> to vector<16x1xf32>
    %cst_151 = arith.constant 3.200000e+01 : f32
    %366 = vector.broadcast %cst_151 : f32 to vector<16x1xf32>
    %367 = arith.divf %365, %366 : vector<16x1xf32>
    %368 = vector.broadcast %358 : vector<16x1xf32> to vector<16x32xf32>
    %369 = arith.subf %352, %368 : vector<16x32xf32>
    %cst_152 = arith.constant 9.99999996E-13 : f32
    %370 = vector.broadcast %cst_152 : f32 to vector<16x1xf32>
    %371 = arith.addf %367, %370 : vector<16x1xf32>
    %372 = math.rsqrt %371 : vector<16x1xf32>
    %373 = vector.broadcast %372 : vector<16x1xf32> to vector<16x32xf32>
    %374 = arith.mulf %369, %373 : vector<16x32xf32>
    %375 = vector.broadcast %353 : vector<1x32xf32> to vector<16x32xf32>
    %376 = arith.mulf %374, %375 : vector<16x32xf32>
    %377 = vector.broadcast %354 : vector<1x32xf32> to vector<16x32xf32>
    %378 = arith.addf %376, %377 : vector<16x32xf32>
    %379 = vector.extract_strided_slice %378 {offsets = [0, 0], sizes = [1, 32], strides = [1, 1]} : vector<16x32xf32> to vector<1x32xf32>
    %380 = vector.extract_strided_slice %378 {offsets = [8, 0], sizes = [1, 32], strides = [1, 1]} : vector<16x32xf32> to vector<1x32xf32>
    %381 = tpu.concatenate %379, %380 in 0 : vector<1x32xf32>, vector<1x32xf32> -> vector<2x32xf32>
    %c2 = arith.constant 2 : index
    %c0_153 = arith.constant 0 : index
    %c0_154 = arith.constant 0 : index
    %382 = vector.load %arg3[%c2, %c0_153, %c0_154] : memref<3x32x96xf32, #tpu.memory_space<vmem>>, vector<1x32x96xf32>
    %383 = vector.shape_cast %382 : vector<1x32x96xf32> to vector<32x96xf32>
    %cst_155 = arith.constant dense<0.000000e+00> : vector<96x16xf32>
    %384 = tpu.matmul %383, %378, %cst_155 {dimension_numbers = #tpu.dot_dimension_numbers<[0], [1], [1], [0], [0, 1, 1, 0], [], []>} : vector<32x96xf32>, vector<16x32xf32>, vector<96x16xf32> -> vector<96x16xf32>
    %c2_156 = arith.constant 2 : index
    %c0_157 = arith.constant 0 : index
    %c0_158 = arith.constant 0 : index
    %385 = vector.load %arg4[%c2_156, %c0_157, %c0_158] : memref<3x96x1xf32, #tpu.memory_space<vmem>>, vector<1x96x1xf32>
    %386 = vector.shape_cast %385 : vector<1x96x1xf32> to vector<96x1xf32>
    %387 = vector.broadcast %386 : vector<96x1xf32> to vector<96x16xf32>
    %388 = arith.addf %384, %387 : vector<96x16xf32>
    %cst_159 = arith.constant 0.000000e+00 : f32
    %389 = vector.broadcast %cst_159 : f32 to vector<16x32xf32>
    %390 = vector.extract_strided_slice %388 {offsets = [0, 0], sizes = [8, 16], strides = [1, 1]} : vector<96x16xf32> to vector<8x16xf32>
    %391 = vector.extract_strided_slice %388 {offsets = [32, 0], sizes = [8, 16], strides = [1, 1]} : vector<96x16xf32> to vector<8x16xf32>
    %392 = vector.extract_strided_slice %388 {offsets = [64, 0], sizes = [8, 16], strides = [1, 1]} : vector<96x16xf32> to vector<8x16xf32>
    %cst_160 = arith.constant dense<0.000000e+00> : vector<16x16xf32>
    %393 = tpu.matmul %390, %391, %cst_160 {dimension_numbers = #tpu.dot_dimension_numbers<[0], [0], [1], [1], [0, 1, 1, 1], [], []>} : vector<8x16xf32>, vector<8x16xf32>, vector<16x16xf32> -> vector<16x16xf32>
    %cst_161 = arith.constant 0.353553385 : f32
    %394 = vector.broadcast %cst_161 : f32 to vector<16x16xf32>
    %395 = arith.mulf %393, %394 : vector<16x16xf32>
    %396 = arith.addf %395, %1 : vector<16x16xf32>
    %cst_162 = arith.constant dense<0xFF800000> : vector<16xf32>
    %397 = vector.multi_reduction <maximumf>, %396, %cst_162 [1] : vector<16x16xf32> to vector<16xf32>
    %398 = vector.shape_cast %397 : vector<16xf32> to vector<16x1xf32>
    %399 = vector.broadcast %398 : vector<16x1xf32> to vector<16x16xf32>
    %400 = arith.subf %396, %399 : vector<16x16xf32>
    %401 = math.exp %400 : vector<16x16xf32>
    %cst_163 = arith.constant dense<0.000000e+00> : vector<16xf32>
    %402 = vector.multi_reduction <add>, %401, %cst_163 [1] : vector<16x16xf32> to vector<16xf32>
    %403 = vector.shape_cast %402 : vector<16xf32> to vector<16x1xf32>
    %404 = vector.broadcast %403 : vector<16x1xf32> to vector<16x16xf32>
    %405 = arith.divf %401, %404 : vector<16x16xf32>
    %cst_164 = arith.constant dense<0.000000e+00> : vector<16x8xf32>
    %406 = tpu.matmul %405, %392, %cst_164 {dimension_numbers = #tpu.dot_dimension_numbers<[1], [1], [0], [0], [0, 0, 1, 0], [], []>} : vector<16x16xf32>, vector<8x16xf32>, vector<16x8xf32> -> vector<16x8xf32>
    %c2_165 = arith.constant 2 : index
    %c0_166 = arith.constant 0 : index
    %c0_167 = arith.constant 0 : index
    %407 = vector.load %arg5[%c2_165, %c0_166, %c0_167] : memref<3x128x64xf32, #tpu.memory_space<vmem>>, vector<1x8x32xf32>
    %408 = vector.shape_cast %407 : vector<1x8x32xf32> to vector<8x32xf32>
    %cst_168 = arith.constant dense<0.000000e+00> : vector<16x32xf32>
    %409 = tpu.matmul %406, %408, %cst_168 {dimension_numbers = #tpu.dot_dimension_numbers<[1], [0], [0], [1], [0, 0, 1, 1], [], []>} : vector<16x8xf32>, vector<8x32xf32>, vector<16x32xf32> -> vector<16x32xf32>
    %410 = arith.addf %389, %409 : vector<16x32xf32>
    %411 = vector.extract_strided_slice %388 {offsets = [8, 0], sizes = [8, 16], strides = [1, 1]} : vector<96x16xf32> to vector<8x16xf32>
    %412 = vector.extract_strided_slice %388 {offsets = [40, 0], sizes = [8, 16], strides = [1, 1]} : vector<96x16xf32> to vector<8x16xf32>
    %413 = vector.extract_strided_slice %388 {offsets = [72, 0], sizes = [8, 16], strides = [1, 1]} : vector<96x16xf32> to vector<8x16xf32>
    %cst_169 = arith.constant dense<0.000000e+00> : vector<16x16xf32>
    %414 = tpu.matmul %411, %412, %cst_169 {dimension_numbers = #tpu.dot_dimension_numbers<[0], [0], [1], [1], [0, 1, 1, 1], [], []>} : vector<8x16xf32>, vector<8x16xf32>, vector<16x16xf32> -> vector<16x16xf32>
    %cst_170 = arith.constant 0.353553385 : f32
    %415 = vector.broadcast %cst_170 : f32 to vector<16x16xf32>
    %416 = arith.mulf %414, %415 : vector<16x16xf32>
    %417 = arith.addf %416, %1 : vector<16x16xf32>
    %cst_171 = arith.constant dense<0xFF800000> : vector<16xf32>
    %418 = vector.multi_reduction <maximumf>, %417, %cst_171 [1] : vector<16x16xf32> to vector<16xf32>
    %419 = vector.shape_cast %418 : vector<16xf32> to vector<16x1xf32>
    %420 = vector.broadcast %419 : vector<16x1xf32> to vector<16x16xf32>
    %421 = arith.subf %417, %420 : vector<16x16xf32>
    %422 = math.exp %421 : vector<16x16xf32>
    %cst_172 = arith.constant dense<0.000000e+00> : vector<16xf32>
    %423 = vector.multi_reduction <add>, %422, %cst_172 [1] : vector<16x16xf32> to vector<16xf32>
    %424 = vector.shape_cast %423 : vector<16xf32> to vector<16x1xf32>
    %425 = vector.broadcast %424 : vector<16x1xf32> to vector<16x16xf32>
    %426 = arith.divf %422, %425 : vector<16x16xf32>
    %cst_173 = arith.constant dense<0.000000e+00> : vector<16x8xf32>
    %427 = tpu.matmul %426, %413, %cst_173 {dimension_numbers = #tpu.dot_dimension_numbers<[1], [1], [0], [0], [0, 0, 1, 0], [], []>} : vector<16x16xf32>, vector<8x16xf32>, vector<16x8xf32> -> vector<16x8xf32>
    %c2_174 = arith.constant 2 : index
    %c8_175 = arith.constant 8 : index
    %c0_176 = arith.constant 0 : index
    %428 = vector.load %arg5[%c2_174, %c8_175, %c0_176] : memref<3x128x64xf32, #tpu.memory_space<vmem>>, vector<1x8x32xf32>
    %429 = vector.shape_cast %428 : vector<1x8x32xf32> to vector<8x32xf32>
    %cst_177 = arith.constant dense<0.000000e+00> : vector<16x32xf32>
    %430 = tpu.matmul %427, %429, %cst_177 {dimension_numbers = #tpu.dot_dimension_numbers<[1], [0], [0], [1], [0, 0, 1, 1], [], []>} : vector<16x8xf32>, vector<8x32xf32>, vector<16x32xf32> -> vector<16x32xf32>
    %431 = arith.addf %410, %430 : vector<16x32xf32>
    %432 = vector.extract_strided_slice %388 {offsets = [16, 0], sizes = [8, 16], strides = [1, 1]} : vector<96x16xf32> to vector<8x16xf32>
    %433 = vector.extract_strided_slice %388 {offsets = [48, 0], sizes = [8, 16], strides = [1, 1]} : vector<96x16xf32> to vector<8x16xf32>
    %434 = vector.extract_strided_slice %388 {offsets = [80, 0], sizes = [8, 16], strides = [1, 1]} : vector<96x16xf32> to vector<8x16xf32>
    %cst_178 = arith.constant dense<0.000000e+00> : vector<16x16xf32>
    %435 = tpu.matmul %432, %433, %cst_178 {dimension_numbers = #tpu.dot_dimension_numbers<[0], [0], [1], [1], [0, 1, 1, 1], [], []>} : vector<8x16xf32>, vector<8x16xf32>, vector<16x16xf32> -> vector<16x16xf32>
    %cst_179 = arith.constant 0.353553385 : f32
    %436 = vector.broadcast %cst_179 : f32 to vector<16x16xf32>
    %437 = arith.mulf %435, %436 : vector<16x16xf32>
    %438 = arith.addf %437, %1 : vector<16x16xf32>
    %cst_180 = arith.constant dense<0xFF800000> : vector<16xf32>
    %439 = vector.multi_reduction <maximumf>, %438, %cst_180 [1] : vector<16x16xf32> to vector<16xf32>
    %440 = vector.shape_cast %439 : vector<16xf32> to vector<16x1xf32>
    %441 = vector.broadcast %440 : vector<16x1xf32> to vector<16x16xf32>
    %442 = arith.subf %438, %441 : vector<16x16xf32>
    %443 = math.exp %442 : vector<16x16xf32>
    %cst_181 = arith.constant dense<0.000000e+00> : vector<16xf32>
    %444 = vector.multi_reduction <add>, %443, %cst_181 [1] : vector<16x16xf32> to vector<16xf32>
    %445 = vector.shape_cast %444 : vector<16xf32> to vector<16x1xf32>
    %446 = vector.broadcast %445 : vector<16x1xf32> to vector<16x16xf32>
    %447 = arith.divf %443, %446 : vector<16x16xf32>
    %cst_182 = arith.constant dense<0.000000e+00> : vector<16x8xf32>
    %448 = tpu.matmul %447, %434, %cst_182 {dimension_numbers = #tpu.dot_dimension_numbers<[1], [1], [0], [0], [0, 0, 1, 0], [], []>} : vector<16x16xf32>, vector<8x16xf32>, vector<16x8xf32> -> vector<16x8xf32>
    %c2_183 = arith.constant 2 : index
    %c16_184 = arith.constant 16 : index
    %c0_185 = arith.constant 0 : index
    %449 = vector.load %arg5[%c2_183, %c16_184, %c0_185] : memref<3x128x64xf32, #tpu.memory_space<vmem>>, vector<1x8x32xf32>
    %450 = vector.shape_cast %449 : vector<1x8x32xf32> to vector<8x32xf32>
    %cst_186 = arith.constant dense<0.000000e+00> : vector<16x32xf32>
    %451 = tpu.matmul %448, %450, %cst_186 {dimension_numbers = #tpu.dot_dimension_numbers<[1], [0], [0], [1], [0, 0, 1, 1], [], []>} : vector<16x8xf32>, vector<8x32xf32>, vector<16x32xf32> -> vector<16x32xf32>
    %452 = arith.addf %431, %451 : vector<16x32xf32>
    %453 = vector.extract_strided_slice %388 {offsets = [24, 0], sizes = [8, 16], strides = [1, 1]} : vector<96x16xf32> to vector<8x16xf32>
    %454 = vector.extract_strided_slice %388 {offsets = [56, 0], sizes = [8, 16], strides = [1, 1]} : vector<96x16xf32> to vector<8x16xf32>
    %455 = vector.extract_strided_slice %388 {offsets = [88, 0], sizes = [8, 16], strides = [1, 1]} : vector<96x16xf32> to vector<8x16xf32>
    %cst_187 = arith.constant dense<0.000000e+00> : vector<16x16xf32>
    %456 = tpu.matmul %453, %454, %cst_187 {dimension_numbers = #tpu.dot_dimension_numbers<[0], [0], [1], [1], [0, 1, 1, 1], [], []>} : vector<8x16xf32>, vector<8x16xf32>, vector<16x16xf32> -> vector<16x16xf32>
    %cst_188 = arith.constant 0.353553385 : f32
    %457 = vector.broadcast %cst_188 : f32 to vector<16x16xf32>
    %458 = arith.mulf %456, %457 : vector<16x16xf32>
    %459 = arith.addf %458, %1 : vector<16x16xf32>
    %cst_189 = arith.constant dense<0xFF800000> : vector<16xf32>
    %460 = vector.multi_reduction <maximumf>, %459, %cst_189 [1] : vector<16x16xf32> to vector<16xf32>
    %461 = vector.shape_cast %460 : vector<16xf32> to vector<16x1xf32>
    %462 = vector.broadcast %461 : vector<16x1xf32> to vector<16x16xf32>
    %463 = arith.subf %459, %462 : vector<16x16xf32>
    %464 = math.exp %463 : vector<16x16xf32>
    %cst_190 = arith.constant dense<0.000000e+00> : vector<16xf32>
    %465 = vector.multi_reduction <add>, %464, %cst_190 [1] : vector<16x16xf32> to vector<16xf32>
    %466 = vector.shape_cast %465 : vector<16xf32> to vector<16x1xf32>
    %467 = vector.broadcast %466 : vector<16x1xf32> to vector<16x16xf32>
    %468 = arith.divf %464, %467 : vector<16x16xf32>
    %cst_191 = arith.constant dense<0.000000e+00> : vector<16x8xf32>
    %469 = tpu.matmul %468, %455, %cst_191 {dimension_numbers = #tpu.dot_dimension_numbers<[1], [1], [0], [0], [0, 0, 1, 0], [], []>} : vector<16x16xf32>, vector<8x16xf32>, vector<16x8xf32> -> vector<16x8xf32>
    %c2_192 = arith.constant 2 : index
    %c24_193 = arith.constant 24 : index
    %c0_194 = arith.constant 0 : index
    %470 = vector.load %arg5[%c2_192, %c24_193, %c0_194] : memref<3x128x64xf32, #tpu.memory_space<vmem>>, vector<1x8x32xf32>
    %471 = vector.shape_cast %470 : vector<1x8x32xf32> to vector<8x32xf32>
    %cst_195 = arith.constant dense<0.000000e+00> : vector<16x32xf32>
    %472 = tpu.matmul %469, %471, %cst_195 {dimension_numbers = #tpu.dot_dimension_numbers<[1], [0], [0], [1], [0, 0, 1, 1], [], []>} : vector<16x8xf32>, vector<8x32xf32>, vector<16x32xf32> -> vector<16x32xf32>
    %473 = arith.addf %452, %472 : vector<16x32xf32>
    %c17 = arith.constant 17 : index
    %c0_196 = arith.constant 0 : index
    %474 = vector.load %arg6[%c17, %c0_196] : memref<24x64xf32, #tpu.memory_space<vmem>>, vector<1x32xf32>
    %475 = vector.broadcast %474 : vector<1x32xf32> to vector<16x32xf32>
    %476 = arith.addf %473, %475 : vector<16x32xf32>
    %477 = arith.addf %476, %378 : vector<16x32xf32>
    %c18 = arith.constant 18 : index
    %c0_197 = arith.constant 0 : index
    %478 = vector.load %arg6[%c18, %c0_197] : memref<24x64xf32, #tpu.memory_space<vmem>>, vector<1x32xf32>
    %c19 = arith.constant 19 : index
    %c0_198 = arith.constant 0 : index
    %479 = vector.load %arg6[%c19, %c0_198] : memref<24x64xf32, #tpu.memory_space<vmem>>, vector<1x32xf32>
    %cst_199 = arith.constant dense<0.000000e+00> : vector<16xf32>
    %480 = vector.multi_reduction <add>, %477, %cst_199 [1] : vector<16x32xf32> to vector<16xf32>
    %481 = vector.shape_cast %480 : vector<16xf32> to vector<16x1xf32>
    %cst_200 = arith.constant 3.200000e+01 : f32
    %482 = vector.broadcast %cst_200 : f32 to vector<16x1xf32>
    %483 = arith.divf %481, %482 : vector<16x1xf32>
    %484 = vector.broadcast %483 : vector<16x1xf32> to vector<16x32xf32>
    %485 = arith.subf %477, %484 : vector<16x32xf32>
    %486 = vector.broadcast %483 : vector<16x1xf32> to vector<16x32xf32>
    %487 = arith.subf %477, %486 : vector<16x32xf32>
    %488 = arith.mulf %485, %487 : vector<16x32xf32>
    %cst_201 = arith.constant dense<0.000000e+00> : vector<16xf32>
    %489 = vector.multi_reduction <add>, %488, %cst_201 [1] : vector<16x32xf32> to vector<16xf32>
    %490 = vector.shape_cast %489 : vector<16xf32> to vector<16x1xf32>
    %cst_202 = arith.constant 3.200000e+01 : f32
    %491 = vector.broadcast %cst_202 : f32 to vector<16x1xf32>
    %492 = arith.divf %490, %491 : vector<16x1xf32>
    %493 = vector.broadcast %483 : vector<16x1xf32> to vector<16x32xf32>
    %494 = arith.subf %477, %493 : vector<16x32xf32>
    %cst_203 = arith.constant 9.99999996E-13 : f32
    %495 = vector.broadcast %cst_203 : f32 to vector<16x1xf32>
    %496 = arith.addf %492, %495 : vector<16x1xf32>
    %497 = math.rsqrt %496 : vector<16x1xf32>
    %498 = vector.broadcast %497 : vector<16x1xf32> to vector<16x32xf32>
    %499 = arith.mulf %494, %498 : vector<16x32xf32>
    %500 = vector.broadcast %478 : vector<1x32xf32> to vector<16x32xf32>
    %501 = arith.mulf %499, %500 : vector<16x32xf32>
    %502 = vector.broadcast %479 : vector<1x32xf32> to vector<16x32xf32>
    %503 = arith.addf %501, %502 : vector<16x32xf32>
    %c2_204 = arith.constant 2 : index
    %c32_205 = arith.constant 32 : index
    %c0_206 = arith.constant 0 : index
    %504 = vector.load %arg5[%c2_204, %c32_205, %c0_206] : memref<3x128x64xf32, #tpu.memory_space<vmem>>, vector<1x32x64xf32>
    %505 = vector.shape_cast %504 : vector<1x32x64xf32> to vector<32x64xf32>
    %cst_207 = arith.constant dense<0.000000e+00> : vector<16x64xf32>
    %506 = tpu.matmul %503, %505, %cst_207 {dimension_numbers = #tpu.dot_dimension_numbers<[1], [0], [0], [1], [0, 0, 1, 1], [], []>} : vector<16x32xf32>, vector<32x64xf32>, vector<16x64xf32> -> vector<16x64xf32>
    %c20 = arith.constant 20 : index
    %c0_208 = arith.constant 0 : index
    %507 = vector.load %arg6[%c20, %c0_208] : memref<24x64xf32, #tpu.memory_space<vmem>>, vector<1x64xf32>
    %508 = vector.broadcast %507 : vector<1x64xf32> to vector<16x64xf32>
    %509 = arith.addf %506, %508 : vector<16x64xf32>
    %510 = arith.mulf %509, %509 : vector<16x64xf32>
    %511 = arith.mulf %509, %510 : vector<16x64xf32>
    %cst_209 = arith.constant 4.471500e-02 : f32
    %512 = vector.broadcast %cst_209 : f32 to vector<16x64xf32>
    %513 = arith.mulf %512, %511 : vector<16x64xf32>
    %514 = arith.addf %509, %513 : vector<16x64xf32>
    %cst_210 = arith.constant 0.797884583 : f32
    %515 = vector.broadcast %cst_210 : f32 to vector<16x64xf32>
    %516 = arith.mulf %515, %514 : vector<16x64xf32>
    %517 = math.tanh %516 : vector<16x64xf32>
    %cst_211 = arith.constant 1.000000e+00 : f32
    %518 = vector.broadcast %cst_211 : f32 to vector<16x64xf32>
    %519 = arith.addf %518, %517 : vector<16x64xf32>
    %cst_212 = arith.constant 5.000000e-01 : f32
    %520 = vector.broadcast %cst_212 : f32 to vector<16x64xf32>
    %521 = arith.mulf %520, %519 : vector<16x64xf32>
    %522 = arith.mulf %509, %521 : vector<16x64xf32>
    %c2_213 = arith.constant 2 : index
    %c64_214 = arith.constant 64 : index
    %c0_215 = arith.constant 0 : index
    %523 = vector.load %arg5[%c2_213, %c64_214, %c0_215] : memref<3x128x64xf32, #tpu.memory_space<vmem>>, vector<1x64x32xf32>
    %524 = vector.shape_cast %523 : vector<1x64x32xf32> to vector<64x32xf32>
    %cst_216 = arith.constant dense<0.000000e+00> : vector<16x32xf32>
    %525 = tpu.matmul %522, %524, %cst_216 {dimension_numbers = #tpu.dot_dimension_numbers<[1], [0], [0], [1], [0, 0, 1, 1], [], []>} : vector<16x64xf32>, vector<64x32xf32>, vector<16x32xf32> -> vector<16x32xf32>
    %c21 = arith.constant 21 : index
    %c0_217 = arith.constant 0 : index
    %526 = vector.load %arg6[%c21, %c0_217] : memref<24x64xf32, #tpu.memory_space<vmem>>, vector<1x32xf32>
    %527 = vector.broadcast %526 : vector<1x32xf32> to vector<16x32xf32>
    %528 = arith.addf %525, %527 : vector<16x32xf32>
    %529 = arith.addf %528, %503 : vector<16x32xf32>
    %c22 = arith.constant 22 : index
    %c0_218 = arith.constant 0 : index
    %530 = vector.load %arg6[%c22, %c0_218] : memref<24x64xf32, #tpu.memory_space<vmem>>, vector<1x32xf32>
    %c23 = arith.constant 23 : index
    %c0_219 = arith.constant 0 : index
    %531 = vector.load %arg6[%c23, %c0_219] : memref<24x64xf32, #tpu.memory_space<vmem>>, vector<1x32xf32>
    %cst_220 = arith.constant dense<0.000000e+00> : vector<16xf32>
    %532 = vector.multi_reduction <add>, %529, %cst_220 [1] : vector<16x32xf32> to vector<16xf32>
    %533 = vector.shape_cast %532 : vector<16xf32> to vector<16x1xf32>
    %cst_221 = arith.constant 3.200000e+01 : f32
    %534 = vector.broadcast %cst_221 : f32 to vector<16x1xf32>
    %535 = arith.divf %533, %534 : vector<16x1xf32>
    %536 = vector.broadcast %535 : vector<16x1xf32> to vector<16x32xf32>
    %537 = arith.subf %529, %536 : vector<16x32xf32>
    %538 = vector.broadcast %535 : vector<16x1xf32> to vector<16x32xf32>
    %539 = arith.subf %529, %538 : vector<16x32xf32>
    %540 = arith.mulf %537, %539 : vector<16x32xf32>
    %cst_222 = arith.constant dense<0.000000e+00> : vector<16xf32>
    %541 = vector.multi_reduction <add>, %540, %cst_222 [1] : vector<16x32xf32> to vector<16xf32>
    %542 = vector.shape_cast %541 : vector<16xf32> to vector<16x1xf32>
    %cst_223 = arith.constant 3.200000e+01 : f32
    %543 = vector.broadcast %cst_223 : f32 to vector<16x1xf32>
    %544 = arith.divf %542, %543 : vector<16x1xf32>
    %545 = vector.broadcast %535 : vector<16x1xf32> to vector<16x32xf32>
    %546 = arith.subf %529, %545 : vector<16x32xf32>
    %cst_224 = arith.constant 9.99999996E-13 : f32
    %547 = vector.broadcast %cst_224 : f32 to vector<16x1xf32>
    %548 = arith.addf %544, %547 : vector<16x1xf32>
    %549 = math.rsqrt %548 : vector<16x1xf32>
    %550 = vector.broadcast %549 : vector<16x1xf32> to vector<16x32xf32>
    %551 = arith.mulf %546, %550 : vector<16x32xf32>
    %552 = vector.broadcast %530 : vector<1x32xf32> to vector<16x32xf32>
    %553 = arith.mulf %551, %552 : vector<16x32xf32>
    %554 = vector.broadcast %531 : vector<1x32xf32> to vector<16x32xf32>
    %555 = arith.addf %553, %554 : vector<16x32xf32>
    %556 = vector.extract_strided_slice %555 {offsets = [0, 0], sizes = [1, 32], strides = [1, 1]} : vector<16x32xf32> to vector<1x32xf32>
    %557 = vector.extract_strided_slice %555 {offsets = [8, 0], sizes = [1, 32], strides = [1, 1]} : vector<16x32xf32> to vector<1x32xf32>
    %558 = tpu.concatenate %556, %557 in 0 : vector<1x32xf32>, vector<1x32xf32> -> vector<2x32xf32>
    %559 = tpu.concatenate %558, %381, %204 in 1 : vector<2x32xf32>, vector<2x32xf32>, vector<2x32xf32> -> vector<2x96xf32>
    %c0_225 = arith.constant 0 : index
    %c0_226 = arith.constant 0 : index
    %560 = vector.load %arg7[%c0_225, %c0_226] : memref<96x1xf32, #tpu.memory_space<vmem>>, vector<96x1xf32>
    %cst_227 = arith.constant dense<0.000000e+00> : vector<2x1xf32>
    %561 = tpu.matmul %559, %560, %cst_227 {dimension_numbers = #tpu.dot_dimension_numbers<[1], [0], [0], [1], [0, 0, 1, 1], [], []>} : vector<2x96xf32>, vector<96x1xf32>, vector<2x1xf32> -> vector<2x1xf32>
    %c2_228 = arith.constant 2 : index
    %c0_229 = arith.constant 0 : index
    %562 = vector.load %arg6[%c2_228, %c0_229] : memref<24x64xf32, #tpu.memory_space<vmem>>, vector<1x1xf32>
    %563 = vector.broadcast %562 : vector<1x1xf32> to vector<2x1xf32>
    %564 = arith.addf %561, %563 : vector<2x1xf32>
    %c0_230 = arith.constant 0 : index
    %c0_231 = arith.constant 0 : index
    %565 = vector.load %arg8[%c0_230, %c0_231] : memref<2x1xf32, #tpu.memory_space<vmem>>, vector<2x1xf32>
    tpu.vector_store %arg8[%c0_230, %c0_231], %564 {strides = array<i32>} : memref<2x1xf32, #tpu.memory_space<vmem>>, vector<2x1xf32>,
    return
  }
  func.func @transform_0(%arg0: i32) -> (i32, i32) {
    %c0_i32 = arith.constant 0 : i32
    %c0_i32_0 = arith.constant 0 : i32
    %c0_i32_1 = arith.constant 0 : i32
    return %c0_i32, %c0_i32_0 : i32, i32
  }
  func.func @transform_1(%arg0: i32) -> (i32, i32) {
    %c0_i32 = arith.constant 0 : i32
    %c0_i32_0 = arith.constant 0 : i32
    %c0_i32_1 = arith.constant 0 : i32
    return %c0_i32, %c0_i32_0 : i32, i32
  }
  func.func @transform_2(%arg0: i32) -> (i32, i32, i32) {
    %c0_i32 = arith.constant 0 : i32
    %c0_i32_0 = arith.constant 0 : i32
    %c0_i32_1 = arith.constant 0 : i32
    %c0_i32_2 = arith.constant 0 : i32
    return %c0_i32, %c0_i32_0, %c0_i32_1 : i32, i32, i32
  }
  func.func @transform_3(%arg0: i32) -> (i32, i32, i32) {
    %c0_i32 = arith.constant 0 : i32
    %c0_i32_0 = arith.constant 0 : i32
    %c0_i32_1 = arith.constant 0 : i32
    %c0_i32_2 = arith.constant 0 : i32
    return %c0_i32, %c0_i32_0, %c0_i32_1 : i32, i32, i32
  }
  func.func @transform_4(%arg0: i32) -> (i32, i32, i32) {
    %c0_i32 = arith.constant 0 : i32
    %c0_i32_0 = arith.constant 0 : i32
    %c0_i32_1 = arith.constant 0 : i32
    %c0_i32_2 = arith.constant 0 : i32
    return %c0_i32, %c0_i32_0, %c0_i32_1 : i32, i32, i32
  }
  func.func @transform_5(%arg0: i32) -> (i32, i32) {
    %c0_i32 = arith.constant 0 : i32
    %c0_i32_0 = arith.constant 0 : i32
    %c0_i32_1 = arith.constant 0 : i32
    return %c0_i32, %c0_i32_0 : i32, i32
  }
  func.func @transform_6(%arg0: i32) -> (i32, i32) {
    %c0_i32 = arith.constant 0 : i32
    %c0_i32_0 = arith.constant 0 : i32
    %c0_i32_1 = arith.constant 0 : i32
    return %c0_i32, %c0_i32_0 : i32, i32
  }
  func.func @transform_7(%arg0: i32) -> (i32, i32) {
    %c0_i32 = arith.constant 0 : i32
    %c0_i32_0 = arith.constant 0 : i32
    %c0_i32_1 = arith.constant 0 : i32
    return %c0_i32, %c0_i32_0 : i32, i32
  }
}

</mosaic_0001>

<bundles_post_ra>
// kernel: bert_classification_head_model1.1
= control target key start
LH: loop header
LB: loop body
LE: loop exit
PB: predicated region body
PF: predicated region fallthrough
CT: control target
= control target key end

     0   :  { %vm32_vm0 = vcmask 261120   ;;  %v3875_v4 = vmov 32.0   ;;  %v3876_v36 = vmov 0   ;;  %vm325_vm8 = vcmask 64512   ;;  %s3877_s22 = smov 32   ;;  %s3878_s27 = smov 64   ;;  %s4792_s0 = inlined_call_operand.vmem [shape: f32[16,32], index: 0, kind: input, shape index: {}]   ;;  %s4793_s2 = inlined_call_operand.vmem [shape: f32[3,32,96], index: 2, kind: input, shape index: {}]   ;;  %s4794_s5 = inlined_call_operand.vmem [shape: f32[24,64], index: 5, kind: input, shape index: {}]   ;;  %s4795_s3 = inlined_call_operand.vmem [shape: f32[3,96,1], index: 3, kind: input, shape index: {}]   ;;  %s4796_s1 = inlined_call_operand.vmem [shape: f32[16,16], index: 1, kind: input, shape index: {}]   ;;  %s4797_s4 = inlined_call_operand.vmem [shape: f32[3,128,64], index: 4, kind: input, shape index: {}]   ;;  %s4798_s6 = inlined_call_operand.vmem [shape: f32[96,1], index: 6, kind: input, shape index: {}]   ;;  %s4799_s7 = inlined_call_operand.vmem [shape: f32[2,1], index: 7, kind: output, shape index: {}]  }
   0x1   :  { %v27_v0 = vld [vmem:[%s4792_s0 + $0x8] sm:$0xff]  ;;  %v26_v2 = vld [vmem:[%s4792_s0] sm:$0xff]  ;;  %3733 = vrcp.f32 %v3875_v4  ;;  %v92_v11 = vld [vmem:[%s4793_s2 + $0x10] sm:$0xff]  ;;  %3706 = vset.pattern.permute.xlu0 %v3876_v36  ;;  %3707 = vset.pattern.permute.xlu1 %v3876_v36  ;;  %vm359_vm9 = vcmask 130048  }
   0x2   :  { %v36_v1 = vsel %vm32_vm0, %v27_v0, 0.0  ;;  %v33_v3 = vsel %vm32_vm0, %v26_v2, 0.0  ;;  %v90_v5 = vld [vmem:[%s4793_s2] sm:$0xff]  ;;  %v91_v8 = vld [vmem:[%s4793_s2 + $0x8] sm:$0xff]  ;;  %v93_v14 = vld [vmem:[%s4793_s2 + $0x18] sm:$0xff] }
   0x3   :  { %37 = vadd.xlane.f32.xlu0 %v36_v1  ;;  %166 = vxpose.xlu2.b32.start [1/4] (short) (narrow) %v90_v5, 96  ;;  %v94_v35 = vld [vmem:[%s4795_s3] sm:$0xff]  ;;  %v95_v47 = vld [vmem:[%s4795_s3 + $0x8] sm:$0xff] }
   0x4   :  { %v3709_v41 = vld [vmem:[%s4794_s5] ss:$0 sm:$0xff]  ;;  %v3710_v45 = vld [vmem:[%s4794_s5 + $0x1] ss:$0 sm:$0xff]  ;;  %v99_v55 = vld [vmem:[%s4795_s3 + $0x28] sm:$0xff] }
   0x5   :  { %v98_v60 = vld [vmem:[%s4795_s3 + $0x20] sm:$0xff] }
   0x7   :  { %v3734_v6 = vpop.eup %3733 }
   0x8   :  { %v40_v7 = vmul.f32 32.0, %v3734_v6  ;;  %vm44_vm1 = vweird.f32 %v3734_v6 }
   0xa   :  { %v41_v9 = vsub.f32 1.0, %v40_v7 }
   0xb   :  { %34 = vadd.xlane.f32.xlu0 %v33_v3  ;;  %167 = vxpose.xlu2.b32.cont [2/4] (short) (narrow) %v91_v8, 96 }
   0xc   :  { %v42_v10 = vmul.f32 %v3734_v6, %v41_v9 }
   0xe   :  { %v43_v12 = vadd.f32 %v3734_v6, %v42_v10 }
  0x10   :  { %v3936_v13 = vsel %vm44_vm1, %v3734_v6, %v43_v12 }
  0x13   :  { %168 = vxpose.xlu2.b32.cont [3/4] (short) (narrow) %v92_v11, 96 }
  0x1b   :  { %169 = vxpose.xlu2.b32.end [4/4] (short) (narrow) %v93_v14, 96 }
  0x1f   :  { %108 = vperm.xlu0 %3706, %v94_v35  }
  0x76   :  { %v38_v15 = vpop.xlane.xlu0 %37 }
  0x77   :  { %v47_v16 = vmul.f32 %v3936_v13, %v38_v15 }
  0x79   :  { %v49_v17 = vsub.f32 %v27_v0, %v47_v16 }
  0x7b   :  { %v51_v18 = vmul.f32 %v49_v17, %v49_v17 }
  0x7d   :  { %v55_v19 = vsel %vm32_vm0, %v51_v18, 0.0  ;;  %3708 = vset.pattern.permute.xlu2 %v3876_v36  ;;  %v103_v36 = vld [vmem:[%s4795_s3 + $0x48] sm:$0xff] }
  0x7e   :  { %56 = vadd.xlane.f32.xlu1 %v55_v19  ;;  %v35_v20 = vpop.xlane.xlu0 %34 }
  0x7f   :  { %v46_v21 = vmul.f32 %v3936_v13, %v35_v20 }
  0x81   :  { %v48_v22 = vsub.f32 %v26_v2, %v46_v21 }
  0x83   :  { %v50_v23 = vmul.f32 %v48_v22, %v48_v22 }
  0x85   :  { %v52_v24 = vsel %vm32_vm0, %v50_v23, 0.0 }
  0x86   :  { %53 = vadd.xlane.f32.xlu1 %v52_v24 }
  0x91   :  { %v109_v6 = vpop.permute.xlu0 %108 }
  0x9c   :  { %v182_v51 = vpop.trf.xlu2 }
  0x9f   :  { %113 = vperm.xlu1 %3707, %v95_v47  }
  0xa4   :  { %v183_v58 = vpop.trf.xlu2 }
  0xa7   :  { %133 = vperm.xlu1 %3707, %v99_v55  }
  0xac   :  { %v184_v59 = vpop.trf.xlu2 }
  0xb4   :  { %v185_v61 = vpop.trf.xlu2 }
  0xbc   :  { %v186_v62 = vpop.trf.xlu2 }
  0xc4   :  { %128 = vperm.xlu2 %3708, %v98_v60   ;;  %v187_v63 = vpop.trf.xlu2 }
  0xcc   :  { %v188_v0 = vpop.trf.xlu2 }
  0xd4   :  { %v189_v1 = vpop.trf.xlu2 }
  0xdc   :  { %v190_v2 = vpop.trf.xlu2 }
  0xe4   :  { %v191_v3 = vpop.trf.xlu2 }
  0xec   :  { %v192_v4 = vpop.trf.xlu2 }
  0xf1   :  { %v57_v25 = vpop.xlane.xlu1 %56 }
  0xf2   :  { %v59_v26 = vmul.f32 %v57_v25, %v3936_v13 }
  0xf4   :  { %v61_v27 = vadd.f32 1e-12, %v59_v26  ;;  %v193_v5 = vpop.trf.xlu2 }
  0xf6   :  { %3735 = vrsqrt.f32 %v61_v27  ;;  %vm78_vm3 = vweird.f32 %v61_v27 }
  0xf9   :  { %v54_v28 = vpop.xlane.xlu1 %53 }
  0xfa   :  { %v58_v29 = vmul.f32 %v54_v28, %v3936_v13  ;;  %v3998_v28 = vld [vmem:[%s4796_s1] sm:$0xff] }
  0xfc   :  { %v3736_v30 = vpop.eup %3735  ;;  %v60_v31 = vadd.f32 1e-12, %v58_v29 }
  0xfd   :  { %v73_v32 = vmul.f32 %v3736_v30, %v61_v27  ;;  %vm79_vm2 = vweird.f32 %v3736_v30 }
  0xfe   :  { %3737 = vrsqrt.f32 %v60_v31  ;;  %vm80_vm4 = vmor %vm78_vm3, %vm79_vm2  ;;  %vm68_vm6 = vweird.f32 %v60_v31 }
  0xff   :  { %v74_v33 = vmul.f32 %v3736_v30, %v73_v32 }
 0x101   :  { %v75_v34 = vmul.f32 0.5, %v74_v33  ;;  %v4005_v33 = vld [vmem:[%s4796_s1 + $0x8] sm:$0xff] }
 0x103   :  { %v76_v37 = vsub.f32 1.5, %v75_v34 }
 0x104   :  { %v3738_v38 = vpop.eup %3737 }
 0x105   :  { %v63_v39 = vmul.f32 %v3738_v38, %v60_v31  ;;  %v77_v40 = vmul.f32 %v3736_v30, %v76_v37  ;;  %vm69_vm5 = vweird.f32 %v3738_v38  ;;  %v100_v37 = vld [vmem:[%s4795_s3 + $0x30] sm:$0xff] }
 0x106   :  { %vm70_vm7 = vmor %vm68_vm6, %vm69_vm5 }
 0x107   :  { %v64_v42 = vmul.f32 %v3738_v38, %v63_v39  ;;  %v81_v43 = vsel %vm80_vm4, %v3736_v30, %v77_v40  ;;  %v97_v39 = vld [vmem:[%s4795_s3 + $0x18] sm:$0xff] }
 0x108   :  { %v83_v44 = vmul.f32 %v81_v43, %v49_v17 }
 0x109   :  { %v65_v46 = vmul.f32 0.5, %v64_v42 }
 0x10a   :  { %v86_v48 = vmul.f32 %v3709_v41, %v83_v44 }
 0x10b   :  { %v66_v49 = vsub.f32 1.5, %v65_v46 }
 0x10c   :  { %v3959_v50 = vadd.f32 %v3710_v45, %v86_v48 }
 0x10d   :  { %v67_v52 = vmul.f32 %v3738_v38, %v66_v49 }
 0x10e   :  { %3497 = vmatpush.xpose.msk.msra.mxu0 %vm32_vm0, %v3959_v50 }
 0x10f   :  { %v71_v53 = vsel %vm70_vm7, %v3738_v38, %v67_v52  ;;  %v96_v38 = vld [vmem:[%s4795_s3 + $0x10] sm:$0xff] }
 0x110   :  { %v82_v54 = vmul.f32 %v71_v53, %v48_v22 }
 0x111   :  { %v114_v10 = vpop.permute.xlu1 %113 }
 0x112   :  { %v85_v56 = vmul.f32 %v3709_v41, %v82_v54 }
 0x114   :  { %v3966_v57 = vadd.f32 %v3710_v45, %v85_v56 }
 0x116   :  { %3498 = vmatpush.xpose.msk.msra.mxu0 %vm32_vm0, %v3966_v57 }
 0x119   :  { %3499 = vmatmul.msk.f32.vlgmr.msra.gmra.mxu0 %vm32_vm0, %v182_v51  ;;  %v134_v18 = vpop.permute.xlu1 %133 }
 0x11e   :  { %v129_v15 = vpop.permute.xlu2 %128 }
 0x121   :  { %3500 = vmatmul.msk.f32.gmra.mxu0 %vm32_vm0, %v183_v58 }
 0x129   :  { %3501 = vmatmul.msk.f32.gmra.mxu0 %vm32_vm0, %v184_v59 }
 0x131   :  { %3502 = vmatmul.msk.f32.gmra.mxu0 %vm32_vm0, %v185_v61 }
 0x139   :  { %3503 = vmatmul.msk.f32.gmra.mxu0 %vm32_vm0, %v186_v62  ;;  %v101_v62 = vld [vmem:[%s4795_s3 + $0x38] sm:$0xff] }
 0x141   :  { %3504 = vmatmul.msk.f32.gmra.mxu0 %vm32_vm0, %v187_v63 }
 0x149   :  { %3505 = vmatmul.msk.f32.gmra.mxu0 %vm32_vm0, %v188_v0 }
 0x151   :  { %3506 = vmatmul.msk.f32.gmra.mxu0 %vm32_vm0, %v189_v1 }
 0x159   :  { %3507 = vmatmul.msk.f32.gmra.mxu0 %vm32_vm0, %v190_v2 }
 0x161   :  { %3508 = vmatmul.msk.f32.gmra.mxu0 %vm32_vm0, %v191_v3 }
 0x169   :  { %3509 = vmatmul.msk.f32.gmra.mxu0 %vm32_vm0, %v192_v4 }
 0x171   :  { %3510 = vmatmul.msk.f32.gmra.mxu0 %vm32_vm0, %v193_v5 }
 0x196   :  { %v257_v7 = vpop.f32.mrf.mxu0 }
 0x197   :  { %v258_v8 = vadd.f32 %v257_v7, %v109_v6 }
 0x199   :  { %293 = vxpose.xlu1.b32.start.end [1/1] (short) (narrow) %v258_v8, 16 }
 0x19e   :  { %v260_v9 = vpop.f32.mrf.mxu0 }
 0x19f   :  { %v261_v11 = vadd.f32 %v260_v9, %v114_v10 }
 0x1a1   :  { %441 = vxpose.xlu0.b32.start.end [1/1] (short) (narrow) %v261_v11, 16 }
 0x1a6   :  { %v3985_v12 = vpop.f32.mrf.mxu0 }
 0x1ae   :  { %v3987_v14 = vpop.f32.mrf.mxu0 }
 0x1b6   :  { %v269_v16 = vpop.f32.mrf.mxu0 }
 0x1b7   :  { %v270_v17 = vadd.f32 %v269_v16, %v129_v15 }
 0x1b9   :  { %3700 = vmatpush.msra.mxu3 %v270_v17  ;;  %347 = vmatpush.msra.mxu1 %v270_v17 }
 0x1be   :  { %v272_v19 = vpop.f32.mrf.mxu0 }
 0x1bf   :  { %v273_v20 = vadd.f32 %v272_v19, %v134_v18 }
 0x1c1   :  { %494 = vmatpush.msrb.mxu3 %v273_v20 }
 0x1c6   :  { %v275_v40 = vpop.f32.mrf.mxu0 }
 0x1ce   :  { %v4021_v41 = vpop.f32.mrf.mxu0 }
 0x1d6   :  { %v4023_v46 = vpop.f32.mrf.mxu0 }
 0x1de   :  { %v284_v53 = vpop.f32.mrf.mxu0 }
 0x23d   :  { %v309_v21 = vpop.trf.xlu1 }
 0x23e   :  { %3511 = vmatmul.msk.f32.vlgmr.msra.gmra.mxu1 %vm325_vm8, %v309_v21 }
 0x245   :  { %v310_v22 = vpop.trf.xlu1  ;;  %v457_v23 = vpop.trf.xlu0 }
 0x246   :  { %3512 = vmatmul.msk.f32.vlgmr.msra.gmra.mxu3 %vm325_vm8, %v310_v22 }
 0x24d   :  { %v458_v24 = vpop.trf.xlu0 }
 0x24e   :  { %3516 = vmatmul.msk.f32.vlgmr.msrb.gmra.mxu3 %vm325_vm8, %v457_v23 }
 0x256   :  { %3517 = vmatmul.msk.f32.gmra.mxu3 %vm325_vm8, %v458_v24 }
 0x2bb   :  { %v349_v1 = vpop.f32.mrf.mxu1 }
 0x2bc   :  { %v355_v2 = vmul.f32 0.35355338, %v349_v1 }
 0x2be   :  { %v357_v3 = vadd.f32 %v355_v2, %v3998_v28 }
 0x2c0   :  { %v360_v4 = vsel %vm359_vm9, %v357_v3, -inf }
 0x2c9   :  { %v3993_v25 = vpop.f32.mrf.mxu3 }
 0x2d1   :  { %v496_v26 = vpop.f32.mrf.mxu3 }
 0x2d2   :  { %v502_v27 = vmul.f32 0.35355338, %v496_v26  ;;  %v356_v26 = vmul.f32 0.35355338, %v3993_v25  ;;  %v104_v25 = vld [vmem:[%s4795_s3 + $0x50] sm:$0xff] }
 0x2d4   :  { %v504_v29 = vadd.f32 %v502_v27, %v3998_v28 }
 0x2d6   :  { %v506_v30 = vsel %vm359_vm9, %v504_v29, -inf }
 0x2d7   :  { %507 = vmax.xlane.f32.xlu0 %v506_v30 }
 0x2d9   :  { %v499_v31 = vpop.f32.mrf.mxu3 }
 0x2da   :  { %v503_v32 = vmul.f32 0.35355338, %v499_v31 }
 0x2dc   :  { %v505_v34 = vadd.f32 %v503_v32, %v4005_v33 }
 0x2de   :  { %v509_v35 = vsel %vm359_vm9, %v505_v34, -inf }
 0x2df   :  { %510 = vmax.xlane.f32.xlu1 %v509_v35 }
 0x2eb   :  { %153 = vperm.xlu0 %3706, %v103_v36  }
 0x2f3   :  { %138 = vperm.xlu0 %3706, %v100_v37  }
 0x2f8   :  { %118 = vperm.xlu1 %3707, %v96_v38  }
 0x2fb   :  { %123 = vperm.xlu0 %3706, %v97_v39  }
 0x34a   :  { %v508_v42 = vpop.xlane.xlu0 %507 }
 0x34b   :  { %v512_v43 = vsub.f32 %v504_v29, %v508_v42 }
 0x34d   :  { %v514_v44 = vmul.f32 1.442695, %v512_v43 }
 0x34f   :  { %3739 = vpow2.f32 %v514_v44 }
 0x352   :  { %v511_v45 = vpop.xlane.xlu1 %510 }
 0x353   :  { %v513_v47 = vsub.f32 %v505_v34, %v511_v45  ;;  %v358_v34 = vadd.f32 %v356_v26, %v4005_v33 }
 0x355   :  { %v3740_v48 = vpop.eup %3739  ;;  %v516_v49 = vmul.f32 1.442695, %v513_v47  ;;  %v363_v35 = vsel %vm359_vm9, %v358_v34, -inf }
 0x356   :  { %v518_v51 = vsel %vm359_vm9, %v3740_v48, 0.0 }
 0x357   :  { %3741 = vpow2.f32 %v516_v49  ;;  %519 = vadd.xlane.f32.xlu2 %v518_v51 }
 0x35d   :  { %v3742_v52 = vpop.eup %3741  ;;  %v154_v54 = vpop.permute.xlu0 %153 }
 0x35e   :  { %v285_v55 = vadd.f32 %v284_v53, %v154_v54  ;;  %v521_v56 = vsel %vm359_vm9, %v3742_v52, 0.0 }
 0x35f   :  { %522 = vadd.xlane.f32.xlu1 %v521_v56 }
 0x360   :  { %3518 = vmatpush.xpose.msk.msrb.mxu1 %vm359_vm9, %v285_v55 }
 0x365   :  { %v139_v58 = vpop.permute.xlu0 %138 }
 0x366   :  { %v276_v59 = vadd.f32 %v275_v40, %v139_v58  ;;  %v287_v58 = vpop.f32.mrf.mxu0 }
 0x368   :  { %698 = vmatpush.msra.mxu1 %v276_v59 }
 0x36a   :  { %v119_v63 = vpop.permute.xlu1 %118 }
 0x36b   :  { %v264_v0 = vadd.f32 %v3985_v12, %v119_v63 }
 0x36d   :  { %v124_v60 = vpop.permute.xlu0 %123 }
 0x36e   :  { %v267_v61 = vadd.f32 %v3987_v14, %v124_v60 }
 0x370   :  { %822 = vxpose.xlu0.b32.start.end [1/1] (short) (narrow) %v267_v61, 16  ;;  %v102_v61 = vld [vmem:[%s4795_s3 + $0x40] sm:$0xff] }
 0x378   :  { %143 = vperm.xlu1 %3707, %v101_v62  }
 0x380   :  { %645 = vxpose.xlu2.b32.start.end [1/1] (short) (narrow) %v264_v0, 16 }
 0x3a2   :  { %361 = vmax.xlane.f32.xlu1 %v360_v4 }
 0x3ca   :  { %v520_v5 = vpop.xlane.xlu2 %519 }
 0x3cb   :  { %3743 = vrcp.f32 %v520_v5  ;;  %v535_v10 = vand.u32 2147483648, %v520_v5  ;;  %v533_v14 = vand.u32 2147483647, %v520_v5  ;;  %vm529_vm11 = vweird.f32 %v520_v5 }
 0x3cd   :  { %v536_v16 = vor.u32 1.1754944e-38, %v535_v10  ;;  %vm534_vm13 = vcmp.eq.f32.partialorder %v533_v14, 8.507059e+37 }
 0x3d1   :  { %v3744_v6 = vpop.eup %3743 }
 0x3d2   :  { %v525_v7 = vmul.f32 %v3744_v6, %v520_v5  ;;  %v523_v8 = vpop.xlane.xlu1 %522  ;;  %vm530_vm10 = vweird.f32 %v3744_v6 }
 0x3d3   :  { %3745 = vrcp.f32 %v523_v8  ;;  %vm531_vm12 = vmor %vm529_vm11, %vm530_vm10  ;;  %v550_v22 = vand.u32 2147483648, %v523_v8  ;;  %v548_v24 = vand.u32 2147483647, %v523_v8  ;;  %vm544_vm15 = vweird.f32 %v523_v8 }
 0x3d4   :  { %v526_v9 = vsub.f32 1.0, %v525_v7 }
 0x3d5   :  { %v551_v29 = vor.u32 1.1754944e-38, %v550_v22  ;;  %vm549_vm2 = vcmp.eq.f32.partialorder %v548_v24, 8.507059e+37 }
 0x3d6   :  { %v527_v11 = vmul.f32 %v3744_v6, %v526_v9 }
 0x3d8   :  { %v528_v12 = vadd.f32 %v3744_v6, %v527_v11 }
 0x3d9   :  { %v3746_v15 = vpop.eup %3745 }
 0x3da   :  { %v540_v17 = vmul.f32 %v3746_v15, %v523_v8  ;;  %v532_v18 = vsel %vm531_vm12, %v3744_v6, %v528_v12  ;;  %vm545_vm14 = vweird.f32 %v3746_v15 }
 0x3db   :  { %v537_v19 = vsel %vm534_vm13, %v536_v16, %v532_v18  ;;  %vm546_vm1 = vmor %vm544_vm15, %vm545_vm14 }
 0x3dc   :  { %v541_v20 = vsub.f32 1.0, %v540_v17  ;;  %v538_v21 = vmul.f32 %v3740_v48, %v537_v19  ;;  %v586_v48 = vld [vmem:[%s4797_s4 + $0x8] sm:$0xff] }
 0x3dd   :  { %608 = vmatpush.msra.mxu3 %v586_v48 }
 0x3de   :  { %3519 = vmatmul.msk.f32.vlgmr.msrb.gmra.mxu1 %vm359_vm9, %v538_v21  ;;  %v542_v23 = vmul.f32 %v3746_v15, %v541_v20 }
 0x3e0   :  { %v543_v27 = vadd.f32 %v3746_v15, %v542_v23 }
 0x3e2   :  { %v547_v30 = vsel %vm546_vm1, %v3746_v15, %v543_v27 }
 0x3e3   :  { %v552_v31 = vsel %vm549_vm2, %v551_v29, %v547_v30 }
 0x3e4   :  { %v553_v32 = vmul.f32 %v3742_v52, %v552_v31 }
 0x3e6   :  { %3520 = vmatmul.msk.f32.gmra.mxu1 %vm359_vm9, %v553_v32 }
 0x3e9   :  { %364 = vmax.xlane.f32.xlu0 %v363_v35 }
 0x3ea   :  { %v144_v36 = vpop.permute.xlu1 %143 }
 0x3eb   :  { %v279_v37 = vadd.f32 %v4021_v41, %v144_v36 }
 0x3ed   :  { %875 = vmatpush.msrb.mxu1 %v279_v37 }
 0x3fd   :  { %158 = vperm.xlu0 %3706, %v104_v25  }
 0x414   :  { %v838_v41 = vpop.trf.xlu0 }
 0x415   :  { %v362_v38 = vpop.xlane.xlu1 %361 }
 0x416   :  { %v366_v39 = vsub.f32 %v357_v3, %v362_v38 }
 0x418   :  { %v368_v40 = vmul.f32 1.442695, %v366_v39 }
 0x419   :  { %v661_v42 = vpop.trf.xlu2 }
 0x41a   :  { %3747 = vpow2.f32 %v368_v40  ;;  %3525 = vmatmul.msk.f32.vlgmr.msra.gmra.mxu1 %vm325_vm8, %v661_v42 }
 0x41c   :  { %v839_v47 = vpop.trf.xlu0 }
 0x420   :  { %v4045_v43 = vpop.eup %3747 }
 0x421   :  { %v372_v44 = vsel %vm359_vm9, %v4045_v43, 0.0  ;;  %v662_v45 = vpop.trf.xlu2 }
 0x422   :  { %373 = vadd.xlane.f32.xlu1 %v372_v44  ;;  %3526 = vmatmul.msk.f32.gmra.mxu1 %vm325_vm8, %v662_v45 }
 0x42a   :  { %3532 = vmatmul.msk.f32.vlgmr.msrb.gmra.mxu1 %vm325_vm8, %v838_v41 }
 0x432   :  { %3533 = vmatmul.msk.f32.gmra.mxu1 %vm325_vm8, %v839_v47 }
 0x45b   :  { %v580_v49 = vpop.f32.mrf.mxu1 }
 0x45c   :  { %3521 = vmatmul.msk.f32.vlgmr.msra.gmra.mxu3 %vm325_vm8, %v580_v49  ;;  %v365_v51 = vpop.xlane.xlu0 %364 }
 0x45d   :  { %v367_v52 = vsub.f32 %v358_v34, %v365_v51 }
 0x45f   :  { %v370_v53 = vmul.f32 1.442695, %v367_v52 }
 0x461   :  { %3749 = vpow2.f32 %v370_v53 }
 0x463   :  { %v583_v54 = vpop.f32.mrf.mxu1 }
 0x464   :  { %3522 = vmatmul.msk.f32.gmra.mxu3 %vm325_vm8, %v583_v54 }
 0x467   :  { %v4057_v55 = vpop.eup %3749 }
 0x468   :  { %v375_v56 = vsel %vm359_vm9, %v4057_v55, 0.0 }
 0x469   :  { %376 = vadd.xlane.f32.xlu1 %v375_v56 }
 0x46f   :  { %v159_v59 = vpop.permute.xlu0 %158 }
 0x470   :  { %v288_v60 = vadd.f32 %v287_v58, %v159_v59 }
 0x472   :  { %3527 = vmatpush.xpose.msk.msrb.mxu3 %vm359_vm9, %v288_v60 }
 0x482   :  { %148 = vperm.xlu1 %3707, %v102_v61  }
 0x495   :  { %v374_v15 = vpop.xlane.xlu1 %373 }
 0x496   :  { %3751 = vrcp.f32 %v374_v15  ;;  %v389_v24 = vand.u32 2147483648, %v374_v15  ;;  %vm383_vm4 = vweird.f32 %v374_v15 }
 0x497   :  { %v700_v62 = vpop.f32.mrf.mxu1 }
 0x498   :  { %v706_v63 = vmul.f32 0.35355338, %v700_v62  ;;  %v390_v29 = vor.u32 1.1754944e-38, %v389_v24 }
 0x49a   :  { %v708_v0 = vadd.f32 %v706_v63, %v3998_v28  ;;  %v105_v63 = vld [vmem:[%s4795_s3 + $0x58] sm:$0xff] }
 0x49c   :  { %v710_v1 = vsel %vm359_vm9, %v708_v0, -inf  ;;  %v3752_v17 = vpop.eup %3751 }
 0x49d   :  { %711 = vmax.xlane.f32.xlu2 %v710_v1  ;;  %v379_v18 = vmul.f32 %v3752_v17, %v374_v15  ;;  %vm384_vm3 = vweird.f32 %v3752_v17 }
 0x49e   :  { %vm385_vm5 = vmor %vm383_vm4, %vm384_vm3 }
 0x49f   :  { %v703_v2 = vpop.f32.mrf.mxu1  ;;  %v380_v19 = vsub.f32 1.0, %v379_v18 }
 0x4a0   :  { %v707_v3 = vmul.f32 0.35355338, %v703_v2 }
 0x4a1   :  { %v381_v20 = vmul.f32 %v3752_v17, %v380_v19 }
 0x4a2   :  { %v709_v4 = vadd.f32 %v707_v3, %v4005_v33 }
 0x4a3   :  { %v382_v23 = vadd.f32 %v3752_v17, %v381_v20 }
 0x4a4   :  { %v713_v6 = vsel %vm359_vm9, %v709_v4, -inf }
 0x4a5   :  { %v386_v27 = vsel %vm385_vm5, %v3752_v17, %v382_v23 }
 0x4a7   :  { %v877_v5 = vpop.f32.mrf.mxu1 }
 0x4a8   :  { %v883_v7 = vmul.f32 0.35355338, %v877_v5 }
 0x4aa   :  { %v885_v8 = vadd.f32 %v883_v7, %v3998_v28 }
 0x4ac   :  { %714 = vmax.xlane.f32.xlu1 %v713_v6  ;;  %v887_v10 = vsel %vm359_vm9, %v885_v8, -inf }
 0x4af   :  { %v880_v9 = vpop.f32.mrf.mxu1 }
 0x4b0   :  { %v884_v11 = vmul.f32 0.35355338, %v880_v9 }
 0x4b2   :  { %v4072_v14 = vadd.f32 %v884_v11, %v4005_v33  ;;  %v387_v33 = vand.u32 2147483647, %v374_v15 }
 0x4b4   :  { %888 = vmax.xlane.f32.xlu1 %v887_v10  ;;  %v890_v12 = vsel %vm359_vm9, %v4072_v14, -inf  ;;  %vm388_vm6 = vcmp.eq.f32.partialorder %v387_v33, 8.507059e+37 }
 0x4b5   :  { %v391_v32 = vsel %vm388_vm6, %v390_v29, %v386_v27 }
 0x4b6   :  { %v392_v36 = vmul.f32 %v4045_v43, %v391_v32 }
 0x4bc   :  { %891 = vmax.xlane.f32.xlu1 %v890_v12 }
 0x4dc   :  { %v377_v16 = vpop.xlane.xlu1 %376 }
 0x4dd   :  { %3753 = vrcp.f32 %v377_v16  ;;  %v404_v35 = vand.u32 2147483648, %v377_v16  ;;  %vm398_vm10 = vweird.f32 %v377_v16  ;;  %v402_v37 = vand.u32 2147483647, %v377_v16 }
 0x4df   :  { %v405_v38 = vor.u32 1.1754944e-38, %v404_v35  ;;  %vm403_vm12 = vcmp.eq.f32.partialorder %v402_v37, 8.507059e+37 }
 0x4e3   :  { %v3754_v28 = vpop.eup %3753 }
 0x4e4   :  { %v394_v21 = vmul.f32 %v3754_v28, %v377_v16  ;;  %vm399_vm7 = vweird.f32 %v3754_v28 }
 0x4e5   :  { %vm400_vm11 = vmor %vm398_vm10, %vm399_vm7 }
 0x4e6   :  { %v395_v22 = vsub.f32 1.0, %v394_v21 }
 0x4e8   :  { %v396_v26 = vmul.f32 %v3754_v28, %v395_v22 }
 0x4ea   :  { %v397_v34 = vadd.f32 %v3754_v28, %v396_v26 }
 0x4ec   :  { %v401_v25 = vsel %vm400_vm11, %v3754_v28, %v397_v34 }
 0x4ed   :  { %v406_v39 = vsel %vm403_vm12, %v405_v38, %v401_v25 }
 0x4ee   :  { %v407_v40 = vmul.f32 %v4057_v55, %v406_v39 }
 0x4f4   :  { %v149_v30 = vpop.permute.xlu1 %148 }
 0x4f5   :  { %v282_v31 = vadd.f32 %v4023_v46, %v149_v30 }
 0x4f7   :  { %3513 = vmatpush.xpose.msk.msra.mxu2 %vm359_vm9, %v282_v31 }
 0x4fa   :  { %3514 = vmatmul.msk.f32.vlgmr.msra.gmra.mxu2 %vm359_vm9, %v392_v36 }
 0x502   :  { %3515 = vmatmul.msk.f32.gmra.mxu2 %vm359_vm9, %v407_v40 }
 0x510   :  { %v712_v46 = vpop.xlane.xlu2 %711 }
 0x511   :  { %v716_v42 = vsub.f32 %v708_v0, %v712_v46  ;;  %v440_v0 = vld [vmem:[%s4797_s4] sm:$0xff] }
 0x512   :  { %637 = vmatpush.msrb.mxu2 %v440_v0 }
 0x513   :  { %v718_v44 = vmul.f32 1.442695, %v716_v42 }
 0x515   :  { %3755 = vpow2.f32 %v718_v44  ;;  %v290_v44 = vpop.f32.mrf.mxu0 }
 0x51b   :  { %v3756_v45 = vpop.eup %3755 }
 0x51c   :  { %v722_v41 = vsel %vm359_vm9, %v3756_v45, 0.0 }
 0x51d   :  { %723 = vadd.xlane.f32.xlu1 %v722_v41 }
 0x51f   :  { %v715_v43 = vpop.xlane.xlu1 %714 }
 0x520   :  { %v717_v47 = vsub.f32 %v709_v4, %v715_v43 }
 0x522   :  { %v720_v48 = vmul.f32 1.442695, %v717_v47 }
 0x524   :  { %3757 = vpow2.f32 %v720_v48 }
 0x527   :  { %v889_v49 = vpop.xlane.xlu1 %888 }
 0x528   :  { %v893_v51 = vsub.f32 %v885_v8, %v889_v49 }
 0x52a   :  { %v4083_v52 = vpop.eup %3757  ;;  %v895_v53 = vmul.f32 1.442695, %v893_v51 }
 0x52b   :  { %v725_v54 = vsel %vm359_vm9, %v4083_v52, 0.0 }
 0x52c   :  { %3759 = vpow2.f32 %v895_v53  ;;  %726 = vadd.xlane.f32.xlu1 %v725_v54 }
 0x52f   :  { %v892_v55 = vpop.xlane.xlu1 %891 }
 0x530   :  { %v894_v56 = vsub.f32 %v4072_v14, %v892_v55 }
 0x532   :  { %v4088_v58 = vpop.eup %3759  ;;  %v897_v59 = vmul.f32 1.442695, %v894_v56  ;;  %v790_v56 = vld [vmem:[%s4797_s4 + $0x10] sm:$0xff] }
 0x533   :  { %v899_v60 = vsel %vm359_vm9, %v4088_v58, 0.0  ;;  %812 = vmatpush.msra.mxu2 %v790_v56 }
 0x534   :  { %3761 = vpow2.f32 %v897_v59  ;;  %900 = vadd.xlane.f32.xlu1 %v899_v60  ;;  %v610_v59 = vpop.f32.mrf.mxu3 }
 0x53a   :  { %v4092_v61 = vpop.eup %3761 }
 0x53b   :  { %v902_v62 = vsel %vm359_vm9, %v4092_v61, 0.0 }
 0x53c   :  { %903 = vadd.xlane.f32.xlu2 %v902_v62  ;;  %v613_v60 = vpop.f32.mrf.mxu3 }
 0x54d   :  { %163 = vperm.xlu1 %3707, %v105_v63  }
 0x57d   :  { %v434_v1 = vpop.f32.mrf.mxu2 }
 0x57e   :  { %3523 = vmatmul.msk.f32.vlgmr.msrb.gmra.mxu2 %vm325_vm8, %v434_v1 }
 0x585   :  { %v437_v2 = vpop.f32.mrf.mxu2 }
 0x586   :  { %3524 = vmatmul.msk.f32.gmra.mxu2 %vm325_vm8, %v437_v2 }
 0x590   :  { %v724_v3 = vpop.xlane.xlu1 %723 }
 0x591   :  { %3763 = vrcp.f32 %v724_v3  ;;  %v739_v7 = vand.u32 2147483648, %v724_v3  ;;  %v737_v9 = vand.u32 2147483647, %v724_v3  ;;  %vm733_vm14 = vweird.f32 %v724_v3 }
 0x593   :  { %v740_v11 = vor.u32 1.1754944e-38, %v739_v7  ;;  %vm738_vm1 = vcmp.eq.f32.partialorder %v737_v9, 8.507059e+37  ;;  %v3711_v7 = vld [vmem:[%s4794_s5 + $0x3] ss:$0 sm:$0xff] }
 0x597   :  { %v3764_v4 = vpop.eup %3763 }
 0x598   :  { %v729_v5 = vmul.f32 %v3764_v4, %v724_v3  ;;  %vm734_vm13 = vweird.f32 %v3764_v4 }
 0x599   :  { %vm735_vm15 = vmor %vm733_vm14, %vm734_vm13 }
 0x59a   :  { %v730_v6 = vsub.f32 1.0, %v729_v5 }
 0x59c   :  { %v731_v8 = vmul.f32 %v3764_v4, %v730_v6 }
 0x59e   :  { %v732_v10 = vadd.f32 %v3764_v4, %v731_v8 }
 0x59f   :  { %v727_v14 = vpop.xlane.xlu1 %726 }
 0x5a0   :  { %v736_v12 = vsel %vm735_vm15, %v3764_v4, %v732_v10  ;;  %3765 = vrcp.f32 %v727_v14  ;;  %v754_v20 = vand.u32 2147483648, %v727_v14  ;;  %v752_v22 = vand.u32 2147483647, %v727_v14 }
 0x5a1   :  { %v741_v15 = vsel %vm738_vm1, %v740_v11, %v736_v12  ;;  %vm748_vm3 = vweird.f32 %v727_v14 }
 0x5a2   :  { %v742_v16 = vmul.f32 %v3756_v45, %v741_v15  ;;  %v755_v33 = vor.u32 1.1754944e-38, %v754_v20  ;;  %vm753_vm5 = vcmp.eq.f32.partialorder %v752_v22, 8.507059e+37 }
 0x5a4   :  { %3528 = vmatmul.msk.f32.vlgmr.msrb.gmra.mxu3 %vm359_vm9, %v742_v16 }
 0x5a6   :  { %v3766_v17 = vpop.eup %3765 }
 0x5a7   :  { %v744_v18 = vmul.f32 %v3766_v17, %v727_v14  ;;  %v901_v19 = vpop.xlane.xlu1 %900  ;;  %vm749_vm2 = vweird.f32 %v3766_v17 }
 0x5a8   :  { %3767 = vrcp.f32 %v901_v19  ;;  %vm750_vm4 = vmor %vm748_vm3, %vm749_vm2  ;;  %v916_v38 = vand.u32 2147483648, %v901_v19  ;;  %vm910_vm7 = vweird.f32 %v901_v19  ;;  %v914_v39 = vand.u32 2147483647, %v901_v19 }
 0x5a9   :  { %v745_v28 = vsub.f32 1.0, %v744_v18 }
 0x5aa   :  { %v917_v42 = vor.u32 1.1754944e-38, %v916_v38  ;;  %vm915_vm11 = vcmp.eq.f32.partialorder %v914_v39, 8.507059e+37 }
 0x5ab   :  { %v746_v21 = vmul.f32 %v3766_v17, %v745_v28 }
 0x5ad   :  { %v747_v23 = vadd.f32 %v3766_v17, %v746_v21 }
 0x5ae   :  { %v3768_v24 = vpop.eup %3767 }
 0x5af   :  { %v906_v26 = vmul.f32 %v3768_v24, %v901_v19  ;;  %v904_v27 = vpop.xlane.xlu2 %903  ;;  %v751_v29 = vsel %vm750_vm4, %v3766_v17, %v747_v23  ;;  %vm911_vm6 = vweird.f32 %v3768_v24 }
 0x5b0   :  { %3769 = vrcp.f32 %v904_v27  ;;  %v756_v30 = vsel %vm753_vm5, %v755_v33, %v751_v29  ;;  %vm912_vm10 = vmor %vm910_vm7, %vm911_vm6  ;;  %v931_v48 = vand.u32 2147483648, %v904_v27  ;;  %vm925_vm13 = vweird.f32 %v904_v27 }
 0x5b1   :  { %v907_v31 = vsub.f32 1.0, %v906_v26  ;;  %v757_v32 = vmul.f32 %v4083_v52, %v756_v30  ;;  %v929_v51 = vand.u32 2147483647, %v904_v27  ;;  %v3548_v30 = vld [vmem:[%s4795_s3 + $0x68] sm:$0xff]  ;;  %vm1120_vm7 = vcmask 523264  }
 0x5b2   :  { %v932_v53 = vor.u32 1.1754944e-38, %v931_v48 }
 0x5b3   :  { %3529 = vmatmul.msk.f32.gmra.mxu3 %vm359_vm9, %v757_v32  ;;  %v908_v34 = vmul.f32 %v3768_v24, %v907_v31  ;;  %vm930_vm15 = vcmp.eq.f32.partialorder %v929_v51, 8.507059e+37  ;;  %v3552_v31 = vld [vmem:[%s4795_s3 + $0x88] sm:$0xff]  ;;  %v1060_v32 = vld [vmem:[%s4797_s4 + $0x38] sm:$0xff]  ;;  %v3712_v51 = vld [vmem:[%s4794_s5 + $0x4] ss:$0 sm:$0xff] }
 0x5b4   :  { %1081 = vmatpush.msra.mxu1 %v1060_v32  ;;  %v3715_v32 = vld [vmem:[%s4794_s5 + $0x7] ss:$0 sm:$0xff] }
 0x5b5   :  { %v909_v37 = vadd.f32 %v3768_v24, %v908_v34  ;;  %v1059_v34 = vld [vmem:[%s4797_s4 + $0x30] sm:$0xff] }
 0x5b6   :  { %v3770_v35 = vpop.eup %3769  ;;  %1082 = vmatpush.msra.mxu1 %v1059_v34 }
 0x5b7   :  { %v921_v36 = vmul.f32 %v3770_v35, %v904_v27  ;;  %v913_v40 = vsel %vm912_vm10, %v3768_v24, %v909_v37  ;;  %vm926_vm12 = vweird.f32 %v3770_v35 }
 0x5b8   :  { %v918_v41 = vsel %vm915_vm11, %v917_v42, %v913_v40  ;;  %vm927_vm14 = vmor %vm925_vm13, %vm926_vm12 }
 0x5b9   :  { %v922_v25 = vsub.f32 1.0, %v921_v36  ;;  %v919_v49 = vmul.f32 %v4088_v58, %v918_v41  ;;  %v967_v58 = vld [vmem:[%s4797_s4 + $0x18] sm:$0xff]  ;;  %v1057_v36 = vld [vmem:[%s4797_s4 + $0x20] sm:$0xff] }
 0x5ba   :  { %989 = vmatpush.msrb.mxu2 %v967_v58 }
 0x5bb   :  { %v923_v46 = vmul.f32 %v3770_v35, %v922_v25 }
 0x5bd   :  { %v924_v47 = vadd.f32 %v3770_v35, %v923_v46 }
 0x5bf   :  { %v164_v45 = vpop.permute.xlu1 %163  ;;  %v928_v52 = vsel %vm927_vm14, %v3770_v35, %v924_v47  ;;  %v1058_v35 = vld [vmem:[%s4797_s4 + $0x28] sm:$0xff] }
 0x5c0   :  { %v291_v43 = vadd.f32 %v290_v44, %v164_v45  ;;  %v933_v54 = vsel %vm930_vm15, %v932_v53, %v928_v52  ;;  %1083 = vmatpush.msra.mxu1 %v1058_v35 }
 0x5c1   :  { %v934_v55 = vmul.f32 %v4092_v61, %v933_v54 }
 0x5c2   :  { %3534 = vmatpush.xpose.msk.msra.mxu3 %vm359_vm9, %v291_v43  ;;  %1084 = vmatpush.msra.mxu1 %v1057_v36 }
 0x5c5   :  { %3535 = vmatmul.msk.f32.vlgmr.msra.gmra.mxu3 %vm359_vm9, %v919_v49 }
 0x5cd   :  { %3536 = vmatmul.msk.f32.gmra.mxu3 %vm359_vm9, %v934_v55  ;;  %v3713_v55 = vld [vmem:[%s4794_s5 + $0x5] ss:$0 sm:$0xff] }
 0x601   :  { %v639_v1 = vpop.f32.mrf.mxu2 }
 0x602   :  { %v640_v5 = vadd.f32 %v639_v1, %v610_v59 }
 0x609   :  { %v642_v2 = vpop.f32.mrf.mxu2 }
 0x60a   :  { %v643_v11 = vadd.f32 %v642_v2, %v613_v60  ;;  %v1117_v2 = vld [vmem:[%s4797_s4 + $0x78] sm:$0xff] }
 0x60b   :  { %1135 = vmatpush.msrb.mxu3 %v1117_v2 }
 0x627   :  { %v784_v62 = vpop.f32.mrf.mxu3 }
 0x628   :  { %3530 = vmatmul.msk.f32.vlgmr.msra.gmra.mxu2 %vm325_vm8, %v784_v62 }
 0x636   :  { %v787_v63 = vpop.f32.mrf.mxu3 }
 0x637   :  { %3531 = vmatmul.msk.f32.gmra.mxu2 %vm325_vm8, %v787_v63 }
 0x648   :  { %v961_v61 = vpop.f32.mrf.mxu3 }
 0x649   :  { %3537 = vmatmul.msk.f32.vlgmr.msrb.gmra.mxu2 %vm325_vm8, %v961_v61 }
 0x650   :  { %v964_v0 = vpop.f32.mrf.mxu3 }
 0x651   :  { %3538 = vmatmul.msk.f32.gmra.mxu2 %vm325_vm8, %v964_v0 }
 0x6ab   :  { %v814_v3 = vpop.f32.mrf.mxu2 }
 0x6ac   :  { %v820_v6 = vadd.f32 %v814_v3, %v640_v5  ;;  %v1116_v3 = vld [vmem:[%s4797_s4 + $0x70] sm:$0xff]  ;;  %v1114_v5 = vld [vmem:[%s4797_s4 + $0x60] sm:$0xff] }
 0x6ad   :  { %1136 = vmatpush.msrb.mxu3 %v1116_v3 }
 0x6ba   :  { %v817_v4 = vpop.f32.mrf.mxu2 }
 0x6bb   :  { %v821_v12 = vadd.f32 %v817_v4, %v643_v11  ;;  %v1115_v4 = vld [vmem:[%s4797_s4 + $0x68] sm:$0xff] }
 0x6bc   :  { %1137 = vmatpush.msrb.mxu3 %v1115_v4 }
 0x6be   :  { %1138 = vmatpush.msrb.mxu3 %v1114_v5 }
 0x6cc   :  { %v991_v8 = vpop.f32.mrf.mxu2 }
 0x6cd   :  { %v997_v9 = vadd.f32 %v991_v8, %v820_v6  ;;  %v1113_v6 = vld [vmem:[%s4797_s4 + $0x58] sm:$0xff]  ;;  %v1111_v8 = vld [vmem:[%s4797_s4 + $0x48] sm:$0xff] }
 0x6ce   :  { %1139 = vmatpush.msrb.mxu3 %v1113_v6 }
 0x6cf   :  { %v1001_v10 = vadd.f32 %v3711_v7, %v997_v9  ;;  %v1110_v9 = vld [vmem:[%s4797_s4 + $0x40] sm:$0xff] }
 0x6d1   :  { %v1003_v14 = vadd.f32 %v1001_v10, %v3966_v57  ;;  %v3714_v10 = vld [vmem:[%s4794_s5 + $0x6] ss:$0 sm:$0xff] }
 0x6d3   :  { %v1007_v15 = vsel %vm32_vm0, %v1003_v14, 0.0 }
 0x6d4   :  { %1008 = vadd.xlane.f32.xlu2 %v1007_v15  ;;  %v994_v16 = vpop.f32.mrf.mxu2 }
 0x6d5   :  { %v998_v17 = vadd.f32 %v994_v16, %v821_v12 }
 0x6d7   :  { %v1002_v18 = vadd.f32 %v3711_v7, %v998_v17  ;;  %v1112_v7 = vld [vmem:[%s4797_s4 + $0x50] sm:$0xff] }
 0x6d8   :  { %1140 = vmatpush.msrb.mxu3 %v1112_v7 }
 0x6d9   :  { %v1004_v19 = vadd.f32 %v1002_v18, %v3959_v50  ;;  %v3547_v50 = vld [vmem:[%s4795_s3 + $0x60] sm:$0xff] }
 0x6da   :  { %1141 = vmatpush.msrb.mxu3 %v1111_v8 }
 0x6db   :  { %v1010_v28 = vsel %vm32_vm0, %v1004_v19, 0.0 }
 0x6dc   :  { %1011 = vadd.xlane.f32.xlu2 %v1010_v28  ;;  %1142 = vmatpush.msrb.mxu3 %v1110_v9 }
 0x747   :  { %v1009_v20 = vpop.xlane.xlu2 %1008 }
 0x748   :  { %v1013_v21 = vmul.f32 %v1009_v20, %v3936_v13 }
 0x74a   :  { %v1015_v22 = vsub.f32 %v1003_v14, %v1013_v21 }
 0x74c   :  { %v1017_v23 = vmul.f32 %v1015_v22, %v1015_v22 }
 0x74e   :  { %v1019_v24 = vsel %vm32_vm0, %v1017_v23, 0.0 }
 0x74f   :  { %1020 = vadd.xlane.f32.xlu0 %v1019_v24  ;;  %v1012_v57 = vpop.xlane.xlu2 %1011 }
 0x750   :  { %v1014_v33 = vmul.f32 %v1012_v57, %v3936_v13 }
 0x752   :  { %v1016_v26 = vsub.f32 %v1004_v19, %v1014_v33 }
 0x754   :  { %v1018_v27 = vmul.f32 %v1016_v26, %v1016_v26 }
 0x756   :  { %v1022_v29 = vsel %vm32_vm0, %v1018_v27, 0.0 }
 0x757   :  { %1023 = vadd.xlane.f32.xlu2 %v1022_v29 }
 0x763   :  { %1229 = vperm.xlu0 %3706, %v3547_v50  }
 0x76b   :  { %1234 = vperm.xlu0 %3706, %v3548_v30  }
 0x773   :  { %1254 = vperm.xlu0 %3706, %v3552_v31  }
 0x7c2   :  { %v1021_v37 = vpop.xlane.xlu0 %1020 }
 0x7c3   :  { %v1025_v25 = vmul.f32 %v1021_v37, %v3936_v13 }
 0x7c5   :  { %v1027_v38 = vadd.f32 1e-12, %v1025_v25 }
 0x7c7   :  { %3771 = vrsqrt.f32 %v1027_v38  ;;  %vm1035_vm2 = vweird.f32 %v1027_v38 }
 0x7ca   :  { %v1024_v39 = vpop.xlane.xlu2 %1023 }
 0x7cb   :  { %v1026_v40 = vmul.f32 %v1024_v39, %v3936_v13 }
 0x7cd   :  { %v3772_v46 = vpop.eup %3771  ;;  %v1028_v42 = vadd.f32 1e-12, %v1026_v40 }
 0x7ce   :  { %v1030_v44 = vmul.f32 %v3772_v46, %v1027_v38  ;;  %vm1036_vm1 = vweird.f32 %v3772_v46 }
 0x7cf   :  { %3773 = vrsqrt.f32 %v1028_v42  ;;  %vm1037_vm3 = vmor %vm1035_vm2, %vm1036_vm1  ;;  %vm1045_vm5 = vweird.f32 %v1028_v42 }
 0x7d0   :  { %v1031_v45 = vmul.f32 %v3772_v46, %v1030_v44 }
 0x7d2   :  { %v1032_v41 = vmul.f32 0.5, %v1031_v45 }
 0x7d4   :  { %v1033_v43 = vsub.f32 1.5, %v1032_v41 }
 0x7d5   :  { %v3774_v47 = vpop.eup %3773 }
 0x7d6   :  { %v1034_v48 = vmul.f32 %v3772_v46, %v1033_v43  ;;  %v1040_v49 = vmul.f32 %v3774_v47, %v1028_v42  ;;  %vm1046_vm4 = vweird.f32 %v3774_v47 }
 0x7d7   :  { %vm1047_vm6 = vmor %vm1045_vm5, %vm1046_vm4 }
 0x7d8   :  { %v1038_v52 = vsel %vm1037_vm3, %v3772_v46, %v1034_v48  ;;  %v1041_v53 = vmul.f32 %v3774_v47, %v1040_v49  ;;  %v3551_v46 = vld [vmem:[%s4795_s3 + $0x80] sm:$0xff] }
 0x7d9   :  { %v1049_v54 = vmul.f32 %v1038_v52, %v1015_v22 }
 0x7da   :  { %v1042_v56 = vmul.f32 0.5, %v1041_v53  ;;  %v3543_v53 = vld [vmem:[%s4793_s2 + $0x20] sm:$0xff] }
 0x7db   :  { %v1052_v59 = vmul.f32 %v3712_v51, %v1049_v54  ;;  %v3544_v54 = vld [vmem:[%s4793_s2 + $0x28] sm:$0xff] }
 0x7dc   :  { %v1043_v58 = vsub.f32 1.5, %v1042_v56  ;;  %v3546_v56 = vld [vmem:[%s4793_s2 + $0x38] sm:$0xff] }
 0x7dd   :  { %v1055_v60 = vadd.f32 %v3713_v55, %v1052_v59 }
 0x7de   :  { %v1044_v62 = vmul.f32 %v3774_v47, %v1043_v58 }
 0x7df   :  { %3539 = vmatmul.msk.f32.vlgmr.msra.gmra.mxu1 %vm32_vm0, %v1055_v60 }
 0x7e0   :  { %v1048_v63 = vsel %vm1047_vm6, %v3774_v47, %v1044_v62 }
 0x7e1   :  { %v1050_v61 = vmul.f32 %v1048_v63, %v1016_v26 }
 0x7e3   :  { %v1053_v0 = vmul.f32 %v3712_v51, %v1050_v61 }
 0x7e5   :  { %v1056_v1 = vadd.f32 %v3713_v55, %v1053_v0  ;;  %v3545_v55 = vld [vmem:[%s4793_s2 + $0x30] sm:$0xff] }
 0x7e7   :  { %3540 = vmatmul.msk.f32.gmra.mxu1 %vm32_vm0, %v1056_v1 }
 0x85c   :  { %v1086_v11 = vpop.f32.mrf.mxu1 }
 0x85d   :  { %v1087_v14 = vadd.f32 %v3714_v10, %v1086_v11 }
 0x85f   :  { %v1092_v12 = vmul.f32 %v1087_v14, %v1087_v14 }
 0x861   :  { %v1094_v15 = vmul.f32 %v1092_v12, %v1087_v14 }
 0x863   :  { %v1096_v16 = vmul.f32 0.044715, %v1094_v15 }
 0x864   :  { %v1089_v17 = vpop.f32.mrf.mxu1 }
 0x865   :  { %v1098_v18 = vadd.f32 %v1096_v16, %v1087_v14  ;;  %v1090_v19 = vadd.f32 %v3714_v10, %v1089_v17  ;;  %v3716_v16 = vld [vmem:[%s4794_s5 + $0x8] ss:$0 sm:$0xff] }
 0x867   :  { %v1100_v28 = vmul.f32 0.7978846, %v1098_v18  ;;  %v1093_v20 = vmul.f32 %v1090_v19, %v1090_v19 }
 0x869   :  { %3775 = vtanh.f32 %v1100_v28  ;;  %v1095_v21 = vmul.f32 %v1093_v20, %v1090_v19 }
 0x86b   :  { %v1097_v22 = vmul.f32 0.044715, %v1095_v21 }
 0x86d   :  { %v1099_v23 = vadd.f32 %v1097_v22, %v1090_v19 }
 0x86f   :  { %v3776_v24 = vpop.eup %3775  ;;  %v1101_v57 = vmul.f32 0.7978846, %v1099_v23 }
 0x870   :  { %v1104_v33 = vadd.f32 1.0, %v3776_v24 }
 0x871   :  { %3777 = vtanh.f32 %v1101_v57 }
 0x872   :  { %v1106_v26 = vmul.f32 0.5, %v1104_v33 }
 0x874   :  { %v1108_v27 = vmul.f32 %v1106_v26, %v1087_v14 }
 0x876   :  { %3541 = vmatmul.msk.f32.vlgmr.msrb.gmra.mxu3 %vm1120_vm7, %v1108_v27  ;;  %v1230_v27 = vpop.permute.xlu0 %1229 }
 0x877   :  { %v3778_v29 = vpop.eup %3777 }
 0x878   :  { %v1105_v50 = vadd.f32 1.0, %v3778_v29 }
 0x87a   :  { %v1107_v30 = vmul.f32 0.5, %v1105_v50 }
 0x87c   :  { %v1109_v31 = vmul.f32 %v1107_v30, %v1090_v19  ;;  %v3717_v19 = vld [vmem:[%s4794_s5 + $0x9] ss:$0 sm:$0xff] }
 0x87e   :  { %3542 = vmatmul.msk.f32.gmra.mxu3 %vm1120_vm7, %v1109_v31  ;;  %v1235_v30 = vpop.permute.xlu0 %1234 }
 0x8f9   :  { %v1144_v34 = vpop.f32.mrf.mxu3 }
 0x8fa   :  { %v1145_v35 = vadd.f32 %v3715_v32, %v1144_v34 }
 0x8fc   :  { %v1150_v36 = vadd.f32 %v1145_v35, %v1055_v60 }
 0x8fe   :  { %v1154_v37 = vsel %vm32_vm0, %v1150_v36, 0.0 }
 0x8ff   :  { %1155 = vadd.xlane.f32.xlu1 %v1154_v37 }
 0x901   :  { %v1147_v25 = vpop.f32.mrf.mxu3 }
 0x902   :  { %v1148_v38 = vadd.f32 %v3715_v32, %v1147_v25 }
 0x904   :  { %v1151_v39 = vadd.f32 %v1148_v38, %v1056_v1 }
 0x906   :  { %v1157_v40 = vsel %vm32_vm0, %v1151_v39, 0.0 }
 0x907   :  { %1158 = vadd.xlane.f32.xlu2 %v1157_v40 }
 0x918   :  { %1249 = vperm.xlu1 %3707, %v3551_v46   ;;  %v1255_v46 = vpop.permute.xlu0 %1254 }
 0x972   :  { %v1156_v42 = vpop.xlane.xlu1 %1155 }
 0x973   :  { %v1160_v44 = vmul.f32 %v1156_v42, %v3936_v13 }
 0x975   :  { %v1162_v45 = vsub.f32 %v1150_v36, %v1160_v44 }
 0x977   :  { %v1164_v41 = vmul.f32 %v1162_v45, %v1162_v45 }
 0x979   :  { %v1166_v43 = vsel %vm32_vm0, %v1164_v41, 0.0 }
 0x97a   :  { %1167 = vadd.xlane.f32.xlu2 %v1166_v43  ;;  %v1159_v47 = vpop.xlane.xlu2 %1158 }
 0x97b   :  { %v1161_v48 = vmul.f32 %v1159_v47, %v3936_v13 }
 0x97d   :  { %v1163_v49 = vsub.f32 %v1151_v39, %v1161_v48 }
 0x97f   :  { %v1165_v51 = vmul.f32 %v1163_v49, %v1163_v49 }
 0x981   :  { %v1169_v52 = vsel %vm32_vm0, %v1165_v51, 0.0 }
 0x982   :  { %1170 = vadd.xlane.f32.xlu2 %v1169_v52 }
 0x98a   :  { %v1250_v38 = vpop.permute.xlu1 %1249 }
 0x9ab   :  { %1287 = vxpose.xlu2.b32.start [1/4] (short) (narrow) %v3543_v53, 96 }
 0x9b3   :  { %1288 = vxpose.xlu2.b32.cont [2/4] (short) (narrow) %v3544_v54, 96 }
 0x9bb   :  { %1289 = vxpose.xlu2.b32.cont [3/4] (short) (narrow) %v3545_v55, 96 }
 0x9c3   :  { %1290 = vxpose.xlu2.b32.end [4/4] (short) (narrow) %v3546_v56, 96 }
 0x9ed   :  { %v1168_v59 = vpop.xlane.xlu2 %1167 }
 0x9ee   :  { %v1172_v58 = vmul.f32 %v1168_v59, %v3936_v13 }
 0x9f0   :  { %v1174_v60 = vadd.f32 1e-12, %v1172_v58  ;;  %v4262_v58 = vld [vmem:[%s4796_s1] sm:$0xff] }
 0x9f2   :  { %3779 = vrsqrt.f32 %v1174_v60  ;;  %vm1182_vm11 = vweird.f32 %v1174_v60 }
 0x9f5   :  { %v1171_v62 = vpop.xlane.xlu2 %1170 }
 0x9f6   :  { %v1173_v63 = vmul.f32 %v1171_v62, %v3936_v13 }
 0x9f8   :  { %v3780_v61 = vpop.eup %3779  ;;  %v1175_v0 = vadd.f32 1e-12, %v1173_v63 }
 0x9f9   :  { %v1177_v1 = vmul.f32 %v3780_v61, %v1174_v60  ;;  %vm1183_vm10 = vweird.f32 %v3780_v61 }
 0x9fa   :  { %3781 = vrsqrt.f32 %v1175_v0  ;;  %vm1184_vm13 = vmor %vm1182_vm11, %vm1183_vm10  ;;  %vm1192_vm14 = vweird.f32 %v1175_v0 }
 0x9fb   :  { %v1178_v2 = vmul.f32 %v3780_v61, %v1177_v1 }
 0x9fd   :  { %v1179_v3 = vmul.f32 0.5, %v1178_v2 }
 0x9ff   :  { %v1180_v5 = vsub.f32 1.5, %v1179_v3 }
 0xa00   :  { %v3782_v4 = vpop.eup %3781 }
 0xa01   :  { %v1187_v6 = vmul.f32 %v3782_v4, %v1175_v0  ;;  %v1181_v8 = vmul.f32 %v3780_v61, %v1180_v5  ;;  %vm1193_vm12 = vweird.f32 %v3782_v4  ;;  %v4269_v0 = vld [vmem:[%s4796_s1 + $0x8] sm:$0xff] }
 0xa02   :  { %vm1194_vm15 = vmor %vm1192_vm14, %vm1193_vm12 }
 0xa03   :  { %v1188_v7 = vmul.f32 %v3782_v4, %v1187_v6  ;;  %v1185_v11 = vsel %vm1184_vm13, %v3780_v61, %v1181_v8 }
 0xa04   :  { %v1196_v15 = vmul.f32 %v1185_v11, %v1162_v45  ;;  %v3555_v45 = vld [vmem:[%s4795_s3 + $0xa0] sm:$0xff]  ;;  %v3550_v11 = vld [vmem:[%s4795_s3 + $0x78] sm:$0xff] }
 0xa05   :  { %v1189_v9 = vmul.f32 0.5, %v1188_v7 }
 0xa06   :  { %v1199_v20 = vmul.f32 %v3716_v16, %v1196_v15  ;;  %v3549_v15 = vld [vmem:[%s4795_s3 + $0x70] sm:$0xff] }
 0xa07   :  { %v1190_v10 = vsub.f32 1.5, %v1189_v9 }
 0xa08   :  { %v4229_v21 = vadd.f32 %v3717_v19, %v1199_v20 }
 0xa09   :  { %v1191_v14 = vmul.f32 %v3782_v4, %v1190_v10 }
 0xa0b   :  { %v1195_v12 = vsel %vm1194_vm15, %v3782_v4, %v1191_v14 }
 0xa0c   :  { %v1197_v17 = vmul.f32 %v1195_v12, %v1163_v49 }
 0xa0e   :  { %v1200_v18 = vmul.f32 %v3716_v16, %v1197_v17  ;;  %v3556_v16 = vld [vmem:[%s4795_s3 + $0xa8] sm:$0xff] }
 0xa10   :  { %v4225_v28 = vadd.f32 %v3717_v19, %v1200_v18 }
 0xa12   :  { %3559 = vmatpush.xpose.msk.msra.mxu2 %vm32_vm0, %v4225_v28 }
 0xa16   :  { %3560 = vmatpush.xpose.msk.msra.mxu2 %vm32_vm0, %v4229_v21 }
 0xa44   :  { %v1303_v22 = vpop.trf.xlu2 }
 0xa45   :  { %3561 = vmatmul.msk.f32.vlgmr.msra.gmra.mxu2 %vm32_vm0, %v1303_v22 }
 0xa4c   :  { %v1304_v23 = vpop.trf.xlu2 }
 0xa4d   :  { %3562 = vmatmul.msk.f32.gmra.mxu2 %vm32_vm0, %v1304_v23 }
 0xa54   :  { %v1305_v24 = vpop.trf.xlu2 }
 0xa55   :  { %3563 = vmatmul.msk.f32.gmra.mxu2 %vm32_vm0, %v1305_v24 }
 0xa5c   :  { %v1306_v57 = vpop.trf.xlu2 }
 0xa5d   :  { %3564 = vmatmul.msk.f32.gmra.mxu2 %vm32_vm0, %v1306_v57 }
 0xa64   :  { %v1307_v33 = vpop.trf.xlu2 }
 0xa65   :  { %3565 = vmatmul.msk.f32.gmra.mxu2 %vm32_vm0, %v1307_v33 }
 0xa6c   :  { %v1308_v26 = vpop.trf.xlu2 }
 0xa6d   :  { %3566 = vmatmul.msk.f32.gmra.mxu2 %vm32_vm0, %v1308_v26 }
 0xa74   :  { %v1309_v34 = vpop.trf.xlu2 }
 0xa75   :  { %3567 = vmatmul.msk.f32.gmra.mxu2 %vm32_vm0, %v1309_v34 }
 0xa7c   :  { %v1310_v36 = vpop.trf.xlu2 }
 0xa7d   :  { %3568 = vmatmul.msk.f32.gmra.mxu2 %vm32_vm0, %v1310_v36 }
 0xa84   :  { %v1311_v25 = vpop.trf.xlu2 }
 0xa85   :  { %3569 = vmatmul.msk.f32.gmra.mxu2 %vm32_vm0, %v1311_v25 }
 0xa8c   :  { %v1312_v55 = vpop.trf.xlu2 }
 0xa8d   :  { %3570 = vmatmul.msk.f32.gmra.mxu2 %vm32_vm0, %v1312_v55 }
 0xa94   :  { %v1313_v5 = vpop.trf.xlu2 }
 0xa95   :  { %3571 = vmatmul.msk.f32.gmra.mxu2 %vm32_vm0, %v1313_v5 }
 0xa9c   :  { %v1314_v10 = vpop.trf.xlu2 }
 0xa9d   :  { %3572 = vmatmul.msk.f32.gmra.mxu2 %vm32_vm0, %v1314_v10 }
 0xac8   :  { %v1377_v29 = vpop.f32.mrf.mxu2 }
 0xac9   :  { %v1378_v50 = vadd.f32 %v1377_v29, %v1230_v27 }
 0xacb   :  { %1413 = vxpose.xlu0.b32.start.end [1/1] (short) (narrow) %v1378_v50, 16 }
 0xad0   :  { %v1380_v31 = vpop.f32.mrf.mxu2 }
 0xad1   :  { %v1381_v32 = vadd.f32 %v1380_v31, %v1235_v30 }
 0xad3   :  { %1560 = vxpose.xlu1.b32.start.end [1/1] (short) (narrow) %v1381_v32, 16 }
 0xad8   :  { %v4240_v35 = vpop.f32.mrf.mxu2 }
 0xae0   :  { %v4243_v37 = vpop.f32.mrf.mxu2 }
 0xae8   :  { %v1389_v39 = vpop.f32.mrf.mxu2 }
 0xae9   :  { %v1390_v40 = vadd.f32 %v1389_v39, %v1250_v38  ;;  %v3553_v38 = vld [vmem:[%s4795_s3 + $0x90] sm:$0xff] }
 0xaeb   :  { %1466 = vmatpush.msrb.mxu1 %v1390_v40 }
 0xaf0   :  { %v1392_v42 = vpop.f32.mrf.mxu2 }
 0xaf1   :  { %v1393_v44 = vadd.f32 %v1392_v42, %v1255_v46 }
 0xaf3   :  { %1613 = vmatpush.msra.mxu1 %v1393_v44  ;;  %v3554_v44 = vld [vmem:[%s4795_s3 + $0x98] sm:$0xff] }
 0xaf8   :  { %v4253_v49 = vpop.f32.mrf.mxu2 }
 0xb00   :  { %v4255_v51 = vpop.f32.mrf.mxu2 }
 0xb08   :  { %v1401_v52 = vpop.f32.mrf.mxu2 }
 0xb10   :  { %v1404_v40 = vpop.f32.mrf.mxu2 }
 0xb35   :  { %1269 = vperm.xlu1 %3707, %v3555_v45  }
 0xb6f   :  { %v1429_v41 = vpop.trf.xlu0 }
 0xb70   :  { %3573 = vmatmul.msk.f32.vlgmr.msrb.gmra.mxu1 %vm325_vm8, %v1429_v41 }
 0xb77   :  { %v1430_v43 = vpop.trf.xlu0  ;;  %v1576_v47 = vpop.trf.xlu1 }
 0xb78   :  { %3574 = vmatmul.msk.f32.gmra.mxu1 %vm325_vm8, %v1430_v43 }
 0xb7f   :  { %v1577_v48 = vpop.trf.xlu1 }
 0xb80   :  { %3579 = vmatmul.msk.f32.vlgmr.msra.gmra.mxu1 %vm325_vm8, %v1576_v47 }
 0xb88   :  { %3580 = vmatmul.msk.f32.gmra.mxu1 %vm325_vm8, %v1577_v48 }
 0xba7   :  { %v1270_v53 = vpop.permute.xlu1 %1269 }
 0xba8   :  { %v1402_v54 = vadd.f32 %v1401_v52, %v1270_v53 }
 0xbaa   :  { %3575 = vmatpush.xpose.msk.msra.mxu3 %vm359_vm9, %v1402_v54 }
 0xbed   :  { %v1468_v56 = vpop.f32.mrf.mxu1 }
 0xbee   :  { %v1474_v59 = vmul.f32 0.35355338, %v1468_v56 }
 0xbf0   :  { %v1476_v60 = vadd.f32 %v4262_v58, %v1474_v59 }
 0xbf2   :  { %v1478_v62 = vsel %vm359_vm9, %v1476_v60, -inf }
 0xbf3   :  { %1479 = vmax.xlane.f32.xlu2 %v1478_v62 }
 0xbf5   :  { %v1471_v63 = vpop.f32.mrf.mxu1 }
 0xbf6   :  { %v1475_v61 = vmul.f32 0.35355338, %v1471_v63 }
 0xbf8   :  { %v1477_v1 = vadd.f32 %v4269_v0, %v1475_v61 }
 0xbfa   :  { %v1481_v2 = vsel %vm359_vm9, %v1477_v1, -inf }
 0xbfb   :  { %1482 = vmax.xlane.f32.xlu0 %v1481_v2 }
 0xbfd   :  { %v1615_v3 = vpop.f32.mrf.mxu1 }
 0xbfe   :  { %v1621_v4 = vmul.f32 0.35355338, %v1615_v3 }
 0xc00   :  { %v1623_v6 = vadd.f32 %v4262_v58, %v1621_v4 }
 0xc02   :  { %v1625_v7 = vsel %vm359_vm9, %v1623_v6, -inf }
 0xc03   :  { %1626 = vmax.xlane.f32.xlu1 %v1625_v7 }
 0xc05   :  { %v1618_v8 = vpop.f32.mrf.mxu1 }
 0xc06   :  { %v1622_v9 = vmul.f32 0.35355338, %v1618_v8 }
 0xc08   :  { %v1624_v14 = vadd.f32 %v4269_v0, %v1622_v9 }
 0xc0a   :  { %v1628_v12 = vsel %vm359_vm9, %v1624_v14, -inf }
 0xc0b   :  { %1244 = vperm.xlu2 %3708, %v3550_v11   ;;  %1629 = vmax.xlane.f32.xlu0 %v1628_v12 }
 0xc1c   :  { %1239 = vperm.xlu1 %3707, %v3549_v15  }
 0xc1f   :  { %1274 = vperm.xlu0 %3706, %v3556_v16  }
 0xc66   :  { %v1480_v17 = vpop.xlane.xlu2 %1479 }
 0xc67   :  { %v1484_v18 = vsub.f32 %v1476_v60, %v1480_v17 }
 0xc69   :  { %v1486_v19 = vmul.f32 1.442695, %v1484_v18 }
 0xc6b   :  { %3783 = vpow2.f32 %v1486_v19 }
 0xc6e   :  { %v1483_v20 = vpop.xlane.xlu0 %1482  ;;  %v1245_v45 = vpop.permute.xlu2 %1244 }
 0xc6f   :  { %v1485_v22 = vsub.f32 %v1477_v1, %v1483_v20  ;;  %v1387_v43 = vadd.f32 %v4243_v37, %v1245_v45 }
 0xc71   :  { %v3784_v23 = vpop.eup %3783  ;;  %v1488_v24 = vmul.f32 1.442695, %v1485_v22 }
 0xc72   :  { %v1490_v57 = vsel %vm359_vm9, %v3784_v23, 0.0 }
 0xc73   :  { %3785 = vpow2.f32 %v1488_v24  ;;  %1491 = vadd.xlane.f32.xlu1 %v1490_v57 }
 0xc76   :  { %v1627_v33 = vpop.xlane.xlu1 %1626 }
 0xc77   :  { %v1631_v26 = vsub.f32 %v1623_v6, %v1627_v33 }
 0xc79   :  { %v4289_v27 = vpop.eup %3785  ;;  %v1633_v29 = vmul.f32 1.442695, %v1631_v26 }
 0xc7a   :  { %v1493_v50 = vsel %vm359_vm9, %v4289_v27, 0.0 }
 0xc7b   :  { %3787 = vpow2.f32 %v1633_v29  ;;  %1494 = vadd.xlane.f32.xlu0 %v1493_v50 }
 0xc7e   :  { %v1630_v30 = vpop.xlane.xlu0 %1629 }
 0xc7f   :  { %v1632_v31 = vsub.f32 %v1624_v14, %v1630_v30 }
 0xc81   :  { %v4293_v32 = vpop.eup %3787  ;;  %v1635_v34 = vmul.f32 1.442695, %v1632_v31 }
 0xc82   :  { %v1637_v36 = vsel %vm359_vm9, %v4293_v32, 0.0 }
 0xc83   :  { %3789 = vpow2.f32 %v1635_v34  ;;  %1638 = vadd.xlane.f32.xlu0 %v1637_v36 }
 0xc89   :  { %v4297_v25 = vpop.eup %3789 }
 0xc8a   :  { %v1640_v39 = vsel %vm359_vm9, %v4297_v25, 0.0 }
 0xc8b   :  { %1641 = vadd.xlane.f32.xlu0 %v1640_v39 }
 0xc8c   :  { %1259 = vperm.xlu1 %3707, %v3553_v38  }
 0xc8e   :  { %v1240_v41 = vpop.permute.xlu1 %1239 }
 0xc8f   :  { %v1384_v47 = vadd.f32 %v4240_v35, %v1240_v41 }
 0xc91   :  { %v1275_v46 = vpop.permute.xlu0 %1274 }
 0xc92   :  { %v1405_v42 = vadd.f32 %v1404_v40, %v1275_v46 }
 0xc94   :  { %3581 = vmatpush.xpose.msk.msrb.mxu3 %vm359_vm9, %v1405_v42 }
 0xc9f   :  { %1264 = vperm.xlu0 %3706, %v3554_v44  }
 0xcc1   :  { %1764 = vxpose.xlu1.b32.start.end [1/1] (short) (narrow) %v1384_v47, 16  ;;  %1941 = vxpose.xlu0.b32.start.end [1/1] (short) (narrow) %v1387_v43, 16  ;;  %v3584_v43 = vld [vmem:[%s4797_s4 + $0x88] sm:$0xff] }
 0xcc2   :  { %1727 = vmatpush.msrb.mxu0 %v3584_v43 }
 0xce6   :  { %v1492_v48 = vpop.xlane.xlu1 %1491 }
 0xce7   :  { %3791 = vrcp.f32 %v1492_v48  ;;  %v1507_v56 = vand.u32 2147483648, %v1492_v48  ;;  %v1505_v60 = vand.u32 2147483647, %v1492_v48  ;;  %vm1501_vm2 = vweird.f32 %v1492_v48 }
 0xce9   :  { %v1508_v37 = vor.u32 1.1754944e-38, %v1507_v56  ;;  %vm1506_vm4 = vcmp.eq.f32.partialorder %v1505_v60, 8.507059e+37 }
 0xced   :  { %v3792_v52 = vpop.eup %3791 }
 0xcee   :  { %v1497_v53 = vmul.f32 %v3792_v52, %v1492_v48  ;;  %v1495_v54 = vpop.xlane.xlu0 %1494  ;;  %vm1502_vm1 = vweird.f32 %v3792_v52 }
 0xcef   :  { %3793 = vrcp.f32 %v1495_v54  ;;  %vm1503_vm3 = vmor %vm1501_vm2, %vm1502_vm1  ;;  %v1522_v6 = vand.u32 2147483648, %v1495_v54  ;;  %v1520_v7 = vand.u32 2147483647, %v1495_v54  ;;  %vm1516_vm6 = vweird.f32 %v1495_v54 }
 0xcf0   :  { %v1498_v55 = vsub.f32 1.0, %v1497_v53 }
 0xcf1   :  { %v1523_v10 = vor.u32 1.1754944e-38, %v1522_v6  ;;  %vm1521_vm11 = vcmp.eq.f32.partialorder %v1520_v7, 8.507059e+37 }
 0xcf2   :  { %v1499_v59 = vmul.f32 %v3792_v52, %v1498_v55 }
 0xcf4   :  { %v1500_v62 = vadd.f32 %v3792_v52, %v1499_v59 }
 0xcf5   :  { %v3794_v63 = vpop.eup %3793 }
 0xcf6   :  { %v1504_v61 = vsel %vm1503_vm3, %v3792_v52, %v1500_v62  ;;  %v1512_v35 = vmul.f32 %v3794_v63, %v1495_v54  ;;  %v1639_v1 = vpop.xlane.xlu0 %1638  ;;  %vm1517_vm5 = vweird.f32 %v3794_v63 }
 0xcf7   :  { %v1509_v2 = vsel %vm1506_vm4, %v1508_v37, %v1504_v61  ;;  %3795 = vrcp.f32 %v1639_v1  ;;  %vm1518_vm10 = vmor %vm1516_vm6, %vm1517_vm5  ;;  %v1654_v19 = vand.u32 2147483648, %v1639_v1  ;;  %vm1648_vm13 = vweird.f32 %v1639_v1 }
 0xcf8   :  { %v1513_v3 = vsub.f32 1.0, %v1512_v35  ;;  %v1510_v4 = vmul.f32 %v3784_v23, %v1509_v2  ;;  %v1652_v23 = vand.u32 2147483647, %v1639_v1 }
 0xcf9   :  { %v1655_v33 = vor.u32 1.1754944e-38, %v1654_v19 }
 0xcfa   :  { %v1514_v5 = vmul.f32 %v3794_v63, %v1513_v3  ;;  %3576 = vmatmul.msk.f32.vlgmr.msra.gmra.mxu3 %vm359_vm9, %v1510_v4  ;;  %vm1653_vm15 = vcmp.eq.f32.partialorder %v1652_v23, 8.507059e+37  ;;  %v3557_v3 = vld [vmem:[%s4795_s3 + $0xb0] sm:$0xff] }
 0xcfc   :  { %v1515_v8 = vadd.f32 %v3794_v63, %v1514_v5 }
 0xcfd   :  { %v3796_v9 = vpop.eup %3795 }
 0xcfe   :  { %v1644_v11 = vmul.f32 %v3796_v9, %v1639_v1  ;;  %v1642_v14 = vpop.xlane.xlu0 %1641  ;;  %v1260_v12 = vpop.permute.xlu1 %1259  ;;  %v1519_v15 = vsel %vm1518_vm10, %v3794_v63, %v1515_v8  ;;  %vm1649_vm12 = vweird.f32 %v3796_v9 }
 0xcff   :  { %3797 = vrcp.f32 %v1642_v14  ;;  %v1396_v16 = vadd.f32 %v4253_v49, %v1260_v12  ;;  %v1524_v18 = vsel %vm1521_vm11, %v1523_v10, %v1519_v15  ;;  %vm1650_vm14 = vmor %vm1648_vm13, %vm1649_vm12  ;;  %v1669_v31 = vand.u32 2147483648, %v1642_v14 }
 0xd00   :  { %v1645_v17 = vsub.f32 1.0, %v1644_v11  ;;  %v1525_v20 = vmul.f32 %v4289_v27, %v1524_v18  ;;  %v1667_v27 = vand.u32 2147483647, %v1642_v14  ;;  %vm1663_vm2 = vweird.f32 %v1642_v14 }
 0xd01   :  { %1817 = vmatpush.msra.mxu3 %v1396_v16  ;;  %v1670_v38 = vor.u32 1.1754944e-38, %v1669_v31 }
 0xd02   :  { %v1646_v22 = vmul.f32 %v3796_v9, %v1645_v17  ;;  %3577 = vmatmul.msk.f32.gmra.mxu3 %vm359_vm9, %v1525_v20  ;;  %vm1668_vm4 = vcmp.eq.f32.partialorder %v1667_v27, 8.507059e+37 }
 0xd04   :  { %v1647_v24 = vadd.f32 %v3796_v9, %v1646_v22 }
 0xd05   :  { %v3798_v57 = vpop.eup %3797 }
 0xd06   :  { %v1651_v26 = vsel %vm1650_vm14, %v3796_v9, %v1647_v24  ;;  %v1659_v49 = vmul.f32 %v3798_v57, %v1642_v14  ;;  %vm1664_vm1 = vweird.f32 %v3798_v57 }
 0xd07   :  { %v1656_v29 = vsel %vm1653_vm15, %v1655_v33, %v1651_v26  ;;  %vm1665_vm3 = vmor %vm1663_vm2, %vm1664_vm1 }
 0xd08   :  { %v1660_v50 = vsub.f32 1.0, %v1659_v49  ;;  %v1657_v30 = vmul.f32 %v4293_v32, %v1656_v29  ;;  %v3578_v32 = vld [vmem:[%s4797_s4 + $0x80] sm:$0xff] }
 0xd09   :  { %1756 = vmatpush.msrb.mxu1 %v3578_v32 }
 0xd0a   :  { %v1661_v34 = vmul.f32 %v3798_v57, %v1660_v50  ;;  %3582 = vmatmul.msk.f32.vlgmr.msrb.gmra.mxu3 %vm359_vm9, %v1657_v30  ;;  %v3558_v30 = vld [vmem:[%s4795_s3 + $0xb8] sm:$0xff] }
 0xd0c   :  { %v1662_v36 = vadd.f32 %v3798_v57, %v1661_v34 }
 0xd0e   :  { %v1666_v39 = vsel %vm1665_vm3, %v3798_v57, %v1662_v36 }
 0xd0f   :  { %v1671_v40 = vsel %vm1668_vm4, %v1670_v38, %v1666_v39 }
 0xd10   :  { %v1672_v46 = vmul.f32 %v4297_v25, %v1671_v40 }
 0xd11   :  { %v1265_v42 = vpop.permute.xlu0 %1264 }
 0xd12   :  { %v1399_v44 = vadd.f32 %v4255_v51, %v1265_v42  ;;  %3583 = vmatmul.msk.f32.gmra.mxu3 %vm359_vm9, %v1672_v46 }
 0xd14   :  { %1994 = vmatpush.msrb.mxu3 %v1399_v44 }
 0xd65   :  { %v1780_v45 = vpop.trf.xlu1  ;;  %v1957_v51 = vpop.trf.xlu0 }
 0xd66   :  { %3589 = vmatmul.msk.f32.vlgmr.msra.gmra.mxu3 %vm325_vm8, %v1780_v45 }
 0xd6d   :  { %v1781_v41 = vpop.trf.xlu1  ;;  %v1958_v25 = vpop.trf.xlu0 }
 0xd6e   :  { %3590 = vmatmul.msk.f32.gmra.mxu3 %vm325_vm8, %v1781_v41 }
 0xd76   :  { %3597 = vmatmul.msk.f32.vlgmr.msrb.gmra.mxu3 %vm325_vm8, %v1957_v51 }
 0xd7d   :  { %v1552_v47 = vpop.f32.mrf.mxu3 }
 0xd7e   :  { %3587 = vmatmul.msk.f32.vlgmr.msrb.gmra.mxu1 %vm325_vm8, %v1552_v47  ;;  %3598 = vmatmul.msk.f32.gmra.mxu3 %vm325_vm8, %v1958_v25 }
 0xd85   :  { %v1555_v48 = vpop.f32.mrf.mxu3 }
 0xd86   :  { %3588 = vmatmul.msk.f32.gmra.mxu1 %vm325_vm8, %v1555_v48 }
 0xd8d   :  { %v1699_v52 = vpop.f32.mrf.mxu3 }
 0xd8e   :  { %3585 = vmatmul.msk.f32.vlgmr.msrb.gmra.mxu0 %vm325_vm8, %v1699_v52 }
 0xd95   :  { %v1702_v53 = vpop.f32.mrf.mxu3 }
 0xd96   :  { %3586 = vmatmul.msk.f32.gmra.mxu0 %vm325_vm8, %v1702_v53 }
 0xde9   :  { %v1819_v54 = vpop.f32.mrf.mxu3 }
 0xdea   :  { %v1825_v55 = vmul.f32 0.35355338, %v1819_v54 }
 0xdec   :  { %v1827_v56 = vadd.f32 %v4262_v58, %v1825_v55 }
 0xdee   :  { %v1829_v59 = vsel %vm359_vm9, %v1827_v56, -inf }
 0xdef   :  { %1830 = vmax.xlane.f32.xlu2 %v1829_v59 }
 0xdf1   :  { %v1822_v60 = vpop.f32.mrf.mxu3 }
 0xdf2   :  { %v1826_v62 = vmul.f32 0.35355338, %v1822_v60 }
 0xdf4   :  { %v1828_v63 = vadd.f32 %v4269_v0, %v1826_v62 }
 0xdf6   :  { %v1832_v37 = vsel %vm359_vm9, %v1828_v63, -inf }
 0xdf7   :  { %1833 = vmax.xlane.f32.xlu0 %v1832_v37 }
 0xdf9   :  { %v1996_v61 = vpop.f32.mrf.mxu3 }
 0xdfa   :  { %v2002_v35 = vmul.f32 0.35355338, %v1996_v61 }
 0xdfc   :  { %v2004_v1 = vadd.f32 %v4262_v58, %v2002_v35  ;;  %v1407_v58 = vpop.f32.mrf.mxu2 }
 0xdfe   :  { %v2006_v2 = vsel %vm359_vm9, %v2004_v1, -inf }
 0xdff   :  { %2007 = vmax.xlane.f32.xlu1 %v2006_v2 }
 0xe01   :  { %v1999_v4 = vpop.f32.mrf.mxu3 }
 0xe02   :  { %v2003_v5 = vmul.f32 0.35355338, %v1999_v4 }
 0xe04   :  { %v2005_v6 = vadd.f32 %v4269_v0, %v2003_v5 }
 0xe06   :  { %v2009_v7 = vsel %vm359_vm9, %v2005_v6, -inf }
 0xe07   :  { %1279 = vperm.xlu2 %3708, %v3557_v3  }
 0xe30   :  { %2010 = vmax.xlane.f32.xlu2 %v2009_v7  ;;  %v1410_v7 = vpop.f32.mrf.mxu2 }
 0xe62   :  { %v1831_v8 = vpop.xlane.xlu2 %1830 }
 0xe63   :  { %v1835_v9 = vsub.f32 %v1827_v56, %v1831_v8 }
 0xe65   :  { %v1837_v10 = vmul.f32 1.442695, %v1835_v9 }
 0xe67   :  { %3799 = vpow2.f32 %v1837_v10 }
 0xe6a   :  { %v1834_v11 = vpop.xlane.xlu0 %1833  ;;  %v1280_v14 = vpop.permute.xlu2 %1279 }
 0xe6b   :  { %v1836_v12 = vsub.f32 %v1828_v63, %v1834_v11  ;;  %v1408_v15 = vadd.f32 %v1407_v58, %v1280_v14 }
 0xe6d   :  { %v3800_v16 = vpop.eup %3799  ;;  %v1839_v17 = vmul.f32 1.442695, %v1836_v12  ;;  %3591 = vmatpush.xpose.msk.msra.mxu0 %vm359_vm9, %v1408_v15 }
 0xe6e   :  { %v1841_v18 = vsel %vm359_vm9, %v3800_v16, 0.0 }
 0xe6f   :  { %3801 = vpow2.f32 %v1839_v17  ;;  %1842 = vadd.xlane.f32.xlu2 %v1841_v18 }
 0xe72   :  { %v2008_v0 = vpop.xlane.xlu1 %2007 }
 0xe73   :  { %v2012_v19 = vsub.f32 %v2004_v1, %v2008_v0 }
 0xe75   :  { %v3802_v20 = vpop.eup %3801  ;;  %v2014_v22 = vmul.f32 1.442695, %v2012_v19 }
 0xe76   :  { %v1844_v23 = vsel %vm359_vm9, %v3802_v20, 0.0 }
 0xe77   :  { %3803 = vpow2.f32 %v2014_v22  ;;  %1845 = vadd.xlane.f32.xlu2 %v1844_v23  ;;  %v3594_v22 = vld [vmem:[%s4797_s4 + $0x90] sm:$0xff]  ;;  %v3602_v23 = vld [vmem:[%s4797_s4 + $0x98] sm:$0xff] }
 0xe78   :  { %1931 = vmatpush.msra.mxu1 %v3594_v22 }
 0xe7a   :  { %2108 = vmatpush.msrb.mxu1 %v3602_v23 }
 0xe7d   :  { %v4347_v24 = vpop.eup %3803 }
 0xe7e   :  { %v2018_v57 = vsel %vm359_vm9, %v4347_v24, 0.0 }
 0xe7f   :  { %2019 = vadd.xlane.f32.xlu2 %v2018_v57 }
 0xea3   :  { %v2011_v33 = vpop.xlane.xlu2 %2010 }
 0xea4   :  { %v2013_v26 = vsub.f32 %v2005_v6, %v2011_v33 }
 0xea6   :  { %v2016_v49 = vmul.f32 1.442695, %v2013_v26 }
 0xea8   :  { %3805 = vpow2.f32 %v2016_v49 }
 0xeae   :  { %v4351_v29 = vpop.eup %3805 }
 0xeaf   :  { %v2021_v50 = vsel %vm359_vm9, %v4351_v29, 0.0 }
 0xeb0   :  { %2022 = vadd.xlane.f32.xlu2 %v2021_v50  ;;  %v1758_v50 = vpop.f32.mrf.mxu1 }
 0xec8   :  { %1284 = vperm.xlu2 %3708, %v3558_v30   ;;  %v1761_v30 = vpop.f32.mrf.mxu1 }
 0xee2   :  { %v1843_v31 = vpop.xlane.xlu2 %1842 }
 0xee3   :  { %3807 = vrcp.f32 %v1843_v31  ;;  %v1858_v39 = vand.u32 2147483648, %v1843_v31  ;;  %v1856_v46 = vand.u32 2147483647, %v1843_v31  ;;  %vm1852_vm6 = vweird.f32 %v1843_v31 }
 0xee5   :  { %v1859_v32 = vor.u32 1.1754944e-38, %v1858_v39  ;;  %vm1857_vm11 = vcmp.eq.f32.partialorder %v1856_v46, 8.507059e+37 }
 0xee9   :  { %v3808_v34 = vpop.eup %3807 }
 0xeea   :  { %v1848_v27 = vmul.f32 %v3808_v34, %v1843_v31  ;;  %v1846_v36 = vpop.xlane.xlu2 %1845  ;;  %vm1853_vm5 = vweird.f32 %v3808_v34 }
 0xeeb   :  { %3809 = vrcp.f32 %v1846_v36  ;;  %vm1854_vm10 = vmor %vm1852_vm6, %vm1853_vm5  ;;  %v1873_v47 = vand.u32 2147483648, %v1846_v36  ;;  %v1871_v52 = vand.u32 2147483647, %v1846_v36  ;;  %vm1867_vm13 = vweird.f32 %v1846_v36 }
 0xeec   :  { %v1849_v38 = vsub.f32 1.0, %v1848_v27 }
 0xeed   :  { %v1874_v54 = vor.u32 1.1754944e-38, %v1873_v47  ;;  %vm1872_vm15 = vcmp.eq.f32.partialorder %v1871_v52, 8.507059e+37 }
 0xeee   :  { %v1850_v40 = vmul.f32 %v3808_v34, %v1849_v38  ;;  %v3718_v38 = vld [vmem:[%s4794_s5 + $0xa] ss:$0 sm:$0xff] }
 0xef0   :  { %v1851_v42 = vadd.f32 %v3808_v34, %v1850_v40 }
 0xef1   :  { %v3810_v44 = vpop.eup %3809 }
 0xef2   :  { %v1855_v45 = vsel %vm1854_vm10, %v3808_v34, %v1851_v42  ;;  %v1863_v41 = vmul.f32 %v3810_v44, %v1846_v36  ;;  %vm1868_vm12 = vweird.f32 %v3810_v44  ;;  %v2020_v60 = vpop.xlane.xlu2 %2019 }
 0xef3   :  { %v1860_v43 = vsel %vm1857_vm11, %v1859_v32, %v1855_v45  ;;  %vm1869_vm14 = vmor %vm1867_vm13, %vm1868_vm12  ;;  %3811 = vrcp.f32 %v2020_v60  ;;  %v2035_v2 = vand.u32 2147483648, %v2020_v60  ;;  %vm2029_vm2 = vweird.f32 %v2020_v60 }
 0xef4   :  { %v1864_v51 = vsub.f32 1.0, %v1863_v41  ;;  %v1861_v25 = vmul.f32 %v3800_v16, %v1860_v43  ;;  %v2033_v3 = vand.u32 2147483647, %v2020_v60 }
 0xef5   :  { %v2036_v6 = vor.u32 1.1754944e-38, %v2035_v2 }
 0xef6   :  { %v1865_v48 = vmul.f32 %v3810_v44, %v1864_v51  ;;  %3592 = vmatmul.msk.f32.vlgmr.msra.gmra.mxu0 %vm359_vm9, %v1861_v25  ;;  %vm2034_vm4 = vcmp.eq.f32.partialorder %v2033_v3, 8.507059e+37 }
 0xef8   :  { %v1866_v53 = vadd.f32 %v3810_v44, %v1865_v48 }
 0xef9   :  { %v3812_v62 = vpop.eup %3811 }
 0xefa   :  { %v1870_v55 = vsel %vm1869_vm14, %v3810_v44, %v1866_v53  ;;  %v2025_v63 = vmul.f32 %v3812_v62, %v2020_v60  ;;  %vm2030_vm1 = vweird.f32 %v3812_v62 }
 0xefb   :  { %v1875_v56 = vsel %vm1872_vm15, %v1874_v54, %v1870_v55  ;;  %vm2031_vm3 = vmor %vm2029_vm2, %vm2030_vm1 }
 0xefc   :  { %v1876_v59 = vmul.f32 %v3802_v20, %v1875_v56  ;;  %v2026_v37 = vsub.f32 1.0, %v2025_v63 }
 0xefe   :  { %3593 = vmatmul.msk.f32.gmra.mxu0 %vm359_vm9, %v1876_v59  ;;  %v2027_v61 = vmul.f32 %v3812_v62, %v2026_v37  ;;  %v3608_v37 = vld [vmem:[%s4797_s4 + $0xb8] sm:$0xff] }
 0xeff   :  { %2200 = vmatpush.msra.mxu3 %v3608_v37 }
 0xf00   :  { %v2028_v1 = vadd.f32 %v3812_v62, %v2027_v61  ;;  %v3607_v61 = vld [vmem:[%s4797_s4 + $0xb0] sm:$0xff] }
 0xf01   :  { %2201 = vmatpush.msra.mxu3 %v3607_v61 }
 0xf02   :  { %v2032_v4 = vsel %vm2031_vm3, %v3812_v62, %v2028_v1  ;;  %v3605_v1 = vld [vmem:[%s4797_s4 + $0xa0] sm:$0xff] }
 0xf03   :  { %v2037_v10 = vsel %vm2034_vm4, %v2036_v6, %v2032_v4 }
 0xf04   :  { %v2038_v15 = vmul.f32 %v4347_v24, %v2037_v10  ;;  %v1729_v24 = vpop.f32.mrf.mxu0 }
 0xf05   :  { %v1759_v27 = vadd.f32 %v1758_v50, %v1729_v24  ;;  %v3618_v50 = vld [vmem:[%s4797_s4 + $0xf8] sm:$0xff] }
 0xf0c   :  { %v1732_v57 = vpop.f32.mrf.mxu0 }
 0xf0d   :  { %v1762_v42 = vadd.f32 %v1761_v30, %v1732_v57  ;;  %v3617_v30 = vld [vmem:[%s4797_s4 + $0xf0] sm:$0xff] }
 0xf23   :  { %v2023_v35 = vpop.xlane.xlu2 %2022 }
 0xf24   :  { %3813 = vrcp.f32 %v2023_v35  ;;  %v2050_v14 = vand.u32 2147483648, %v2023_v35  ;;  %v2048_v16 = vand.u32 2147483647, %v2023_v35  ;;  %vm2044_vm6 = vweird.f32 %v2023_v35 }
 0xf26   :  { %v2051_v18 = vor.u32 1.1754944e-38, %v2050_v14  ;;  %vm2049_vm11 = vcmp.eq.f32.partialorder %v2048_v16, 8.507059e+37  ;;  %v3719_v16 = vld [vmem:[%s4794_s5 + $0xb] ss:$0 sm:$0xff] }
 0xf2a   :  { %v3814_v5 = vpop.eup %3813 }
 0xf2b   :  { %v2040_v8 = vmul.f32 %v3814_v5, %v2023_v35  ;;  %v1285_v9 = vpop.permute.xlu2 %1284  ;;  %vm2045_vm5 = vweird.f32 %v3814_v5  ;;  %v3606_v35 = vld [vmem:[%s4797_s4 + $0xa8] sm:$0xff] }
 0xf2c   :  { %v1411_v58 = vadd.f32 %v1410_v7, %v1285_v9  ;;  %vm2046_vm10 = vmor %vm2044_vm6, %vm2045_vm5  ;;  %2202 = vmatpush.msra.mxu3 %v3606_v35  ;;  %v3722_v35 = vld [vmem:[%s4794_s5 + $0xe] ss:$0 sm:$0xff] }
 0xf2d   :  { %v2041_v11 = vsub.f32 1.0, %v2040_v8 }
 0xf2e   :  { %3599 = vmatpush.xpose.msk.msrb.mxu0 %vm359_vm9, %v1411_v58  ;;  %2203 = vmatpush.msra.mxu3 %v3605_v1 }
 0xf2f   :  { %v2042_v12 = vmul.f32 %v3814_v5, %v2041_v11 }
 0xf31   :  { %3600 = vmatmul.msk.f32.vlgmr.msrb.gmra.mxu0 %vm359_vm9, %v2038_v15  ;;  %v2043_v17 = vadd.f32 %v3814_v5, %v2042_v12 }
 0xf32   :  { %2253 = vmatpush.msra.mxu0 %v3618_v50 }
 0xf33   :  { %v2047_v0 = vsel %vm2046_vm10, %v3814_v5, %v2043_v17 }
 0xf34   :  { %v2052_v19 = vsel %vm2049_vm11, %v2051_v18, %v2047_v0  ;;  %2254 = vmatpush.msra.mxu0 %v3617_v30 }
 0xf35   :  { %v2053_v20 = vmul.f32 %v4351_v29, %v2052_v19  ;;  %v3720_v19 = vld [vmem:[%s4794_s5 + $0xc] ss:$0 sm:$0xff] }
 0xf39   :  { %3601 = vmatmul.msk.f32.gmra.mxu0 %vm359_vm9, %v2053_v20 }
 0xf73   :  { %v1903_v33 = vpop.f32.mrf.mxu0 }
 0xf74   :  { %3595 = vmatmul.msk.f32.vlgmr.msra.gmra.mxu1 %vm325_vm8, %v1903_v33 }
 0xf7b   :  { %v1906_v26 = vpop.f32.mrf.mxu0 }
 0xf7c   :  { %3596 = vmatmul.msk.f32.gmra.mxu1 %vm325_vm8, %v1906_v26 }
 0xfae   :  { %v2080_v49 = vpop.f32.mrf.mxu0 }
 0xfaf   :  { %3603 = vmatmul.msk.f32.vlgmr.msrb.gmra.mxu1 %vm325_vm8, %v2080_v49 }
 0xfb6   :  { %v2083_v29 = vpop.f32.mrf.mxu0 }
 0xfb7   :  { %3604 = vmatmul.msk.f32.gmra.mxu1 %vm325_vm8, %v2083_v29 }
 0xff1   :  { %v1933_v31 = vpop.f32.mrf.mxu1 }
 0xff2   :  { %v1939_v36 = vadd.f32 %v1933_v31, %v1759_v27  ;;  %v3616_v31 = vld [vmem:[%s4797_s4 + $0xe8] sm:$0xff]  ;;  %v3614_v27 = vld [vmem:[%s4797_s4 + $0xd8] sm:$0xff] }
 0xff3   :  { %2255 = vmatpush.msra.mxu0 %v3616_v31 }
 0xff9   :  { %v1936_v34 = vpop.f32.mrf.mxu1 }
 0xffa   :  { %v1940_v32 = vadd.f32 %v1936_v34, %v1762_v42  ;;  %v3615_v34 = vld [vmem:[%s4797_s4 + $0xe0] sm:$0xff] }
 0xffb   :  { %2256 = vmatpush.msra.mxu0 %v3615_v34 }
 0xffd   :  { %2257 = vmatpush.msra.mxu0 %v3614_v27 }
0x102c   :  { %v2110_v39 = vpop.f32.mrf.mxu1 }
0x102d   :  { %v2116_v40 = vadd.f32 %v2110_v39, %v1939_v36  ;;  %v3613_v36 = vld [vmem:[%s4797_s4 + $0xd0] sm:$0xff]  ;;  %v3611_v39 = vld [vmem:[%s4797_s4 + $0xc0] sm:$0xff] }
0x102e   :  { %2258 = vmatpush.msra.mxu0 %v3613_v36 }
0x102f   :  { %v2120_v46 = vadd.f32 %v3718_v38, %v2116_v40  ;;  %v3721_v40 = vld [vmem:[%s4794_s5 + $0xd] ss:$0 sm:$0xff] }
0x1031   :  { %v2122_v44 = vadd.f32 %v2120_v46, %v4229_v21 }
0x1033   :  { %v2126_v45 = vsel %vm32_vm0, %v2122_v44, 0.0 }
0x1034   :  { %2127 = vadd.xlane.f32.xlu1 %v2126_v45  ;;  %v2113_v41 = vpop.f32.mrf.mxu1 }
0x1035   :  { %v2117_v43 = vadd.f32 %v2113_v41, %v1940_v32 }
0x1037   :  { %v2121_v51 = vadd.f32 %v3718_v38, %v2117_v43  ;;  %v3612_v38 = vld [vmem:[%s4797_s4 + $0xc8] sm:$0xff] }
0x1038   :  { %2259 = vmatpush.msra.mxu0 %v3612_v38 }
0x1039   :  { %v2123_v25 = vadd.f32 %v2121_v51, %v4225_v28 }
0x103a   :  { %2260 = vmatpush.msra.mxu0 %v3611_v39 }
0x103b   :  { %v2129_v47 = vsel %vm32_vm0, %v2123_v25, 0.0 }
0x103c   :  { %2130 = vadd.xlane.f32.xlu0 %v2129_v47 }
0x10a7   :  { %v2128_v48 = vpop.xlane.xlu1 %2127 }
0x10a8   :  { %v2132_v52 = vmul.f32 %v2128_v48, %v3936_v13 }
0x10aa   :  { %v2134_v53 = vsub.f32 %v2122_v44, %v2132_v52 }
0x10ac   :  { %v2136_v54 = vmul.f32 %v2134_v53, %v2134_v53 }
0x10ae   :  { %v2138_v55 = vsel %vm32_vm0, %v2136_v54, 0.0 }
0x10af   :  { %2139 = vadd.xlane.f32.xlu1 %v2138_v55  ;;  %v2131_v56 = vpop.xlane.xlu0 %2130 }
0x10b0   :  { %v2133_v59 = vmul.f32 %v2131_v56, %v3936_v13 }
0x10b2   :  { %v2135_v60 = vsub.f32 %v2123_v25, %v2133_v59 }
0x10b4   :  { %v2137_v62 = vmul.f32 %v2135_v60, %v2135_v60 }
0x10b6   :  { %v2141_v63 = vsel %vm32_vm0, %v2137_v62, 0.0 }
0x10b7   :  { %2142 = vadd.xlane.f32.xlu0 %v2141_v63 }
0x1122   :  { %v2140_v2 = vpop.xlane.xlu1 %2139 }
0x1123   :  { %v2144_v3 = vmul.f32 %v2140_v2, %v3936_v13 }
0x1125   :  { %v2146_v4 = vadd.f32 1e-12, %v2144_v3 }
0x1127   :  { %3815 = vrsqrt.f32 %v2146_v4  ;;  %vm2154_vm13 = vweird.f32 %v2146_v4 }
0x112a   :  { %v2143_v5 = vpop.xlane.xlu0 %2142 }
0x112b   :  { %v2145_v6 = vmul.f32 %v2143_v5, %v3936_v13 }
0x112d   :  { %v3816_v7 = vpop.eup %3815  ;;  %v2147_v8 = vadd.f32 1e-12, %v2145_v6 }
0x112e   :  { %v2149_v9 = vmul.f32 %v3816_v7, %v2146_v4  ;;  %vm2155_vm12 = vweird.f32 %v3816_v7 }
0x112f   :  { %3817 = vrsqrt.f32 %v2147_v8  ;;  %vm2156_vm14 = vmor %vm2154_vm13, %vm2155_vm12  ;;  %vm2164_vm1 = vweird.f32 %v2147_v8 }
0x1130   :  { %v2150_v10 = vmul.f32 %v3816_v7, %v2149_v9  ;;  %v3621_v9 = vld [vmem:[%s4793_s2 + $0x40] sm:$0xff] }
0x1132   :  { %v2151_v58 = vmul.f32 0.5, %v2150_v10  ;;  %v3622_v10 = vld [vmem:[%s4793_s2 + $0x48] sm:$0xff] }
0x1134   :  { %v2152_v11 = vsub.f32 1.5, %v2151_v58  ;;  %v3623_v58 = vld [vmem:[%s4793_s2 + $0x50] sm:$0xff] }
0x1135   :  { %v3818_v14 = vpop.eup %3817 }
0x1136   :  { %v2153_v12 = vmul.f32 %v3816_v7, %v2152_v11  ;;  %v2159_v15 = vmul.f32 %v3818_v14, %v2147_v8  ;;  %vm2165_vm15 = vweird.f32 %v3818_v14  ;;  %v3624_v11 = vld [vmem:[%s4793_s2 + $0x58] sm:$0xff] }
0x1137   :  { %vm2166_vm2 = vmor %vm2164_vm1, %vm2165_vm15 }
0x1138   :  { %v2157_v17 = vsel %vm2156_vm14, %v3816_v7, %v2153_v12  ;;  %v2160_v18 = vmul.f32 %v3818_v14, %v2159_v15 }
0x1139   :  { %v2168_v0 = vmul.f32 %v2157_v17, %v2134_v53 }
0x113a   :  { %v2161_v20 = vmul.f32 0.5, %v2160_v18 }
0x113b   :  { %v2171_v22 = vmul.f32 %v3719_v16, %v2168_v0 }
0x113c   :  { %v2162_v23 = vsub.f32 1.5, %v2161_v20 }
0x113d   :  { %v2174_v24 = vadd.f32 %v3720_v19, %v2171_v22 }
0x113e   :  { %v2163_v57 = vmul.f32 %v3818_v14, %v2162_v23  ;;  %v3626_v23 = vld [vmem:[%s4795_s3 + $0xc8] sm:$0xff] }
0x113f   :  { %3609 = vmatmul.msk.f32.vlgmr.msra.gmra.mxu3 %vm32_vm0, %v2174_v24 }
0x1140   :  { %v2167_v33 = vsel %vm2166_vm2, %v3818_v14, %v2163_v57 }
0x1141   :  { %v2169_v26 = vmul.f32 %v2167_v33, %v2135_v60 }
0x1143   :  { %v2172_v49 = vmul.f32 %v3719_v16, %v2169_v26 }
0x1145   :  { %v2175_v29 = vadd.f32 %v3720_v19, %v2172_v49 }
0x1147   :  { %3610 = vmatmul.msk.f32.gmra.mxu3 %vm32_vm0, %v2175_v29 }
0x11c2   :  { %v2205_v46 = vpop.f32.mrf.mxu3 }
0x11c3   :  { %v2206_v42 = vadd.f32 %v3721_v40, %v2205_v46 }
0x11c5   :  { %v2211_v44 = vmul.f32 %v2206_v42, %v2206_v42 }
0x11c7   :  { %v2213_v32 = vmul.f32 %v2211_v44, %v2206_v42 }
0x11c9   :  { %v2215_v45 = vmul.f32 0.044715, %v2213_v32 }
0x11ca   :  { %v2208_v41 = vpop.f32.mrf.mxu3 }
0x11cb   :  { %v2217_v43 = vadd.f32 %v2215_v45, %v2206_v42  ;;  %v2209_v51 = vadd.f32 %v3721_v40, %v2208_v41 }
0x11cd   :  { %v2219_v25 = vmul.f32 0.7978846, %v2217_v43  ;;  %v2212_v47 = vmul.f32 %v2209_v51, %v2209_v51 }
0x11cf   :  { %3819 = vtanh.f32 %v2219_v25  ;;  %v2214_v48 = vmul.f32 %v2212_v47, %v2209_v51 }
0x11d1   :  { %v2216_v52 = vmul.f32 0.044715, %v2214_v48 }
0x11d3   :  { %v2218_v53 = vadd.f32 %v2216_v52, %v2209_v51  ;;  %v3724_v52 = vld [vmem:[%s4794_s5 + $0x10] ss:$0 sm:$0xff] }
0x11d5   :  { %v3820_v54 = vpop.eup %3819  ;;  %v2220_v55 = vmul.f32 0.7978846, %v2218_v53 }
0x11d6   :  { %v2223_v56 = vadd.f32 1.0, %v3820_v54 }
0x11d7   :  { %3821 = vtanh.f32 %v2220_v55 }
0x11d8   :  { %v2225_v59 = vmul.f32 0.5, %v2223_v56 }
0x11da   :  { %v2227_v60 = vmul.f32 %v2225_v59, %v2206_v42 }
0x11dc   :  { %3619 = vmatmul.msk.f32.vlgmr.msra.gmra.mxu0 %vm1120_vm7, %v2227_v60 }
0x11dd   :  { %v3822_v62 = vpop.eup %3821 }
0x11de   :  { %v2224_v63 = vadd.f32 1.0, %v3822_v62 }
0x11e0   :  { %v2226_v37 = vmul.f32 0.5, %v2224_v63 }
0x11e2   :  { %v2228_v61 = vmul.f32 %v2226_v37, %v2209_v51  ;;  %v3723_v51 = vld [vmem:[%s4794_s5 + $0xf] ss:$0 sm:$0xff] }
0x11e4   :  { %3620 = vmatmul.msk.f32.gmra.mxu0 %vm1120_vm7, %v2228_v61 }
0x1259   :  { %v2262_v1 = vpop.f32.mrf.mxu0 }
0x125a   :  { %v2263_v2 = vadd.f32 %v3722_v35, %v2262_v1 }
0x125c   :  { %v2268_v3 = vadd.f32 %v2263_v2, %v2174_v24  ;;  %v3630_v24 = vld [vmem:[%s4795_s3 + $0xe8] sm:$0xff] }
0x125e   :  { %v2272_v4 = vsel %vm32_vm0, %v2268_v3, 0.0 }
0x125f   :  { %2273 = vadd.xlane.f32.xlu0 %v2272_v4 }
0x1261   :  { %v2265_v5 = vpop.f32.mrf.mxu0 }
0x1262   :  { %v2266_v6 = vadd.f32 %v3722_v35, %v2265_v5 }
0x1264   :  { %v2269_v7 = vadd.f32 %v2266_v6, %v2175_v29 }
0x1266   :  { %v2275_v8 = vsel %vm32_vm0, %v2269_v7, 0.0 }
0x1267   :  { %2276 = vadd.xlane.f32.xlu1 %v2275_v8 }
0x1288   :  { %2404 = vxpose.xlu0.b32.start [1/4] (short) (narrow) %v3621_v9, 96 }
0x1290   :  { %2405 = vxpose.xlu0.b32.cont [2/4] (short) (narrow) %v3622_v10, 96  ;;  %v3625_v10 = vld [vmem:[%s4795_s3 + $0xc0] sm:$0xff] }
0x1298   :  { %2406 = vxpose.xlu0.b32.cont [3/4] (short) (narrow) %v3623_v58, 96  ;;  %v3631_v58 = vld [vmem:[%s4795_s3 + $0xf0] sm:$0xff] }
0x12a0   :  { %2407 = vxpose.xlu0.b32.end [4/4] (short) (narrow) %v3624_v11, 96  ;;  %v3628_v11 = vld [vmem:[%s4795_s3 + $0xd8] sm:$0xff] }
0x12d2   :  { %v2274_v14 = vpop.xlane.xlu0 %2273 }
0x12d3   :  { %v2278_v12 = vmul.f32 %v2274_v14, %v3936_v13  ;;  %v3632_v14 = vld [vmem:[%s4795_s3 + $0xf8] sm:$0xff] }
0x12d5   :  { %v2280_v15 = vsub.f32 %v2268_v3, %v2278_v12 }
0x12d7   :  { %v2282_v16 = vmul.f32 %v2280_v15, %v2280_v15 }
0x12d9   :  { %v2284_v17 = vsel %vm32_vm0, %v2282_v16, 0.0 }
0x12da   :  { %v2277_v18 = vpop.xlane.xlu1 %2276  ;;  %2285 = vadd.xlane.f32.xlu1 %v2284_v17 }
0x12db   :  { %v2279_v0 = vmul.f32 %v2277_v18, %v3936_v13 }
0x12dd   :  { %v2281_v19 = vsub.f32 %v2269_v7, %v2279_v0 }
0x12df   :  { %v2283_v20 = vmul.f32 %v2281_v19, %v2281_v19 }
0x12e1   :  { %v2287_v22 = vsel %vm32_vm0, %v2283_v20, 0.0 }
0x12e2   :  { %2288 = vadd.xlane.f32.xlu2 %v2287_v22 }
0x12f3   :  { %2351 = vperm.xlu1 %3707, %v3626_v23  }
0x12fb   :  { %2371 = vperm.xlu1 %3707, %v3630_v24   ;;  %v4517_v24 = vld [vmem:[%s4796_s1] sm:$0xff] }
0x132c   :  { %v2420_v47 = vpop.trf.xlu0 }
0x1334   :  { %v2421_v56 = vpop.trf.xlu0 }
0x133c   :  { %v2422_v59 = vpop.trf.xlu0 }
0x1344   :  { %v2423_v60 = vpop.trf.xlu0 }
0x134c   :  { %v2424_v62 = vpop.trf.xlu0 }
0x134d   :  { %v2286_v57 = vpop.xlane.xlu1 %2285 }
0x134e   :  { %v2290_v33 = vmul.f32 %v2286_v57, %v3936_v13 }
0x1350   :  { %v2292_v26 = vadd.f32 1e-12, %v2290_v33 }
0x1352   :  { %3823 = vrsqrt.f32 %v2292_v26  ;;  %vm2300_vm4 = vweird.f32 %v2292_v26 }
0x1354   :  { %v2425_v63 = vpop.trf.xlu0 }
0x1355   :  { %v2289_v49 = vpop.xlane.xlu2 %2288 }
0x1356   :  { %v2291_v29 = vmul.f32 %v2289_v49, %v3936_v13 }
0x1358   :  { %v3824_v50 = vpop.eup %3823  ;;  %v2293_v30 = vadd.f32 1e-12, %v2291_v29  ;;  %v4524_v29 = vld [vmem:[%s4796_s1 + $0x8] sm:$0xff] }
0x1359   :  { %v2295_v31 = vmul.f32 %v3824_v50, %v2292_v26  ;;  %vm2301_vm3 = vweird.f32 %v3824_v50 }
0x135a   :  { %3825 = vrsqrt.f32 %v2293_v30  ;;  %vm2302_vm6 = vmor %vm2300_vm4, %vm2301_vm3  ;;  %vm2310_vm10 = vweird.f32 %v2293_v30 }
0x135b   :  { %v2296_v34 = vmul.f32 %v3824_v50, %v2295_v31 }
0x135c   :  { %v2426_v2 = vpop.trf.xlu0 }
0x135d   :  { %v2297_v27 = vmul.f32 0.5, %v2296_v34  ;;  %v3629_v34 = vld [vmem:[%s4795_s3 + $0xe0] sm:$0xff] }
0x135f   :  { %v2298_v38 = vsub.f32 1.5, %v2297_v27  ;;  %v3634_v27 = vld [vmem:[%s4795_s3 + $0x108] sm:$0xff] }
0x1360   :  { %v3826_v36 = vpop.eup %3825 }
0x1361   :  { %v2305_v39 = vmul.f32 %v3826_v36, %v2293_v30  ;;  %v2299_v46 = vmul.f32 %v3824_v50, %v2298_v38  ;;  %vm2311_vm5 = vweird.f32 %v3826_v36 }
0x1362   :  { %vm2312_vm11 = vmor %vm2310_vm10, %vm2311_vm5 }
0x1363   :  { %v2306_v40 = vmul.f32 %v3826_v36, %v2305_v39  ;;  %v2303_v32 = vsel %vm2302_vm6, %v3824_v50, %v2299_v46 }
0x1364   :  { %v2314_v43 = vmul.f32 %v2303_v32, %v2280_v15  ;;  %v2427_v4 = vpop.trf.xlu0 }
0x1365   :  { %v2307_v42 = vmul.f32 0.5, %v2306_v40  ;;  %v2352_v61 = vpop.permute.xlu1 %2351 }
0x1366   :  { %v2317_v54 = vmul.f32 %v3723_v51, %v2314_v43 }
0x1367   :  { %v2308_v44 = vsub.f32 1.5, %v2307_v42 }
0x1368   :  { %v4476_v55 = vadd.f32 %v3724_v52, %v2317_v54 }
0x1369   :  { %v2309_v45 = vmul.f32 %v3826_v36, %v2308_v44 }
0x136b   :  { %v2313_v41 = vsel %vm2312_vm11, %v3826_v36, %v2309_v45  ;;  %v3627_v36 = vld [vmem:[%s4795_s3 + $0xd0] sm:$0xff] }
0x136c   :  { %v2315_v25 = vmul.f32 %v2313_v41, %v2281_v19  ;;  %v2428_v19 = vpop.trf.xlu0 }
0x136d   :  { %v2372_v7 = vpop.permute.xlu1 %2371 }
0x136e   :  { %v2318_v48 = vmul.f32 %v3723_v51, %v2315_v25 }
0x1370   :  { %v4472_v53 = vadd.f32 %v3724_v52, %v2318_v48 }
0x1372   :  { %3637 = vmatpush.xpose.msk.msra.mxu1 %vm32_vm0, %v4472_v53 }
0x1374   :  { %v2429_v20 = vpop.trf.xlu0 }
0x1376   :  { %3638 = vmatpush.xpose.msk.msra.mxu1 %vm32_vm0, %v4476_v55 }
0x1379   :  { %3639 = vmatmul.msk.f32.vlgmr.msra.gmra.mxu1 %vm32_vm0, %v2420_v47 }
0x137c   :  { %v2430_v31 = vpop.trf.xlu0 }
0x1381   :  { %3640 = vmatmul.msk.f32.gmra.mxu1 %vm32_vm0, %v2421_v56 }
0x1384   :  { %v2431_v38 = vpop.trf.xlu0 }
0x1389   :  { %3641 = vmatmul.msk.f32.gmra.mxu1 %vm32_vm0, %v2422_v59 }
0x1391   :  { %3642 = vmatmul.msk.f32.gmra.mxu1 %vm32_vm0, %v2423_v60 }
0x1399   :  { %3643 = vmatmul.msk.f32.gmra.mxu1 %vm32_vm0, %v2424_v62 }
0x13a1   :  { %3644 = vmatmul.msk.f32.gmra.mxu1 %vm32_vm0, %v2425_v63 }
0x13a9   :  { %3645 = vmatmul.msk.f32.gmra.mxu1 %vm32_vm0, %v2426_v2 }
0x13b1   :  { %3646 = vmatmul.msk.f32.gmra.mxu1 %vm32_vm0, %v2427_v4 }
0x13b9   :  { %3647 = vmatmul.msk.f32.gmra.mxu1 %vm32_vm0, %v2428_v19 }
0x13c1   :  { %3648 = vmatmul.msk.f32.gmra.mxu1 %vm32_vm0, %v2429_v20 }
0x13c9   :  { %3649 = vmatmul.msk.f32.gmra.mxu1 %vm32_vm0, %v2430_v31 }
0x13d1   :  { %3650 = vmatmul.msk.f32.gmra.mxu1 %vm32_vm0, %v2431_v38 }
0x13f6   :  { %v4486_v37 = vpop.f32.mrf.mxu1 }
0x13fe   :  { %v2497_v35 = vpop.f32.mrf.mxu1 }
0x13ff   :  { %v2498_v1 = vadd.f32 %v2497_v35, %v2352_v61 }
0x1401   :  { %2677 = vxpose.xlu2.b32.start.end [1/1] (short) (narrow) %v2498_v1, 16 }
0x1406   :  { %v4489_v3 = vpop.f32.mrf.mxu1 }
0x140e   :  { %v4492_v5 = vpop.f32.mrf.mxu1 }
0x1416   :  { %v4494_v6 = vpop.f32.mrf.mxu1 }
0x141e   :  { %v2509_v8 = vpop.f32.mrf.mxu1 }
0x141f   :  { %v2510_v9 = vadd.f32 %v2509_v8, %v2372_v7 }
0x1421   :  { %2730 = vmatpush.msrb.mxu0 %v2510_v9 }
0x1426   :  { %v2512_v17 = vpop.f32.mrf.mxu1 }
0x142e   :  { %v2515_v41 = vpop.f32.mrf.mxu1 }
0x1436   :  { %v4541_v47 = vpop.f32.mrf.mxu1 }
0x143e   :  { %v2521_v54 = vpop.f32.mrf.mxu1 }
0x1472   :  { %2346 = vperm.xlu2 %3708, %v3625_v10  }
0x147a   :  { %2376 = vperm.xlu2 %3708, %v3631_v58  }
0x1482   :  { %2361 = vperm.xlu2 %3708, %v3628_v11  }
0x148a   :  { %2381 = vperm.xlu2 %3708, %v3632_v14  }
0x149a   :  { %v2693_v12 = vpop.trf.xlu2 }
0x149b   :  { %3657 = vmatmul.msk.f32.vlgmr.msrb.gmra.mxu0 %vm325_vm8, %v2693_v12 }
0x14a2   :  { %v2694_v15 = vpop.trf.xlu2 }
0x14a3   :  { %3658 = vmatmul.msk.f32.gmra.mxu0 %vm325_vm8, %v2694_v15 }
0x14cc   :  { %v2347_v16 = vpop.permute.xlu2 %2346 }
0x14cd   :  { %v2495_v63 = vadd.f32 %v4486_v37, %v2347_v16 }
0x14d4   :  { %v2377_v18 = vpop.permute.xlu2 %2376 }
0x14d5   :  { %v4510_v0 = vadd.f32 %v2512_v17, %v2377_v18 }
0x14dc   :  { %v2362_v61 = vpop.permute.xlu2 %2361 }
0x14dd   :  { %v2504_v35 = vadd.f32 %v4492_v5, %v2362_v61 }
0x14e4   :  { %v2382_v18 = vpop.permute.xlu2 %2381 }
0x1518   :  { %v2732_v22 = vpop.f32.mrf.mxu0 }
0x1519   :  { %v2738_v23 = vmul.f32 0.35355338, %v2732_v22 }
0x151b   :  { %v2740_v57 = vadd.f32 %v4517_v24, %v2738_v23  ;;  %v2516_v23 = vadd.f32 %v2515_v41, %v2382_v18 }
0x151d   :  { %v2742_v33 = vsel %vm359_vm9, %v2740_v57, -inf }
0x151e   :  { %2743 = vmax.xlane.f32.xlu1 %v2742_v33 }
0x1520   :  { %v2735_v26 = vpop.f32.mrf.mxu0 }
0x1521   :  { %v2739_v49 = vmul.f32 0.35355338, %v2735_v26 }
0x1523   :  { %v2741_v50 = vadd.f32 %v4524_v29, %v2739_v49 }
0x1525   :  { %v2745_v30 = vsel %vm359_vm9, %v2741_v50, -inf }
0x1526   :  { %2746 = vmax.xlane.f32.xlu0 %v2745_v30 }
0x1537   :  { %2366 = vperm.xlu1 %3707, %v3629_v34  }
0x153f   :  { %2391 = vperm.xlu1 %3707, %v3634_v27  }
0x1547   :  { %2356 = vperm.xlu1 %3707, %v3627_v36  }
0x1591   :  { %v2744_v39 = vpop.xlane.xlu1 %2743 }
0x1592   :  { %v2748_v40 = vsub.f32 %v2740_v57, %v2744_v39 }
0x1594   :  { %v2750_v46 = vmul.f32 1.442695, %v2748_v40 }
0x1596   :  { %3827 = vpow2.f32 %v2750_v46 }
0x1599   :  { %v2747_v42 = vpop.xlane.xlu0 %2746 }
0x159a   :  { %v2749_v44 = vsub.f32 %v2741_v50, %v2747_v42 }
0x159c   :  { %v3828_v32 = vpop.eup %3827  ;;  %v2752_v45 = vmul.f32 1.442695, %v2749_v44 }
0x159d   :  { %v2754_v43 = vsel %vm359_vm9, %v3828_v32, 0.0 }
0x159e   :  { %3829 = vpow2.f32 %v2752_v45  ;;  %2755 = vadd.xlane.f32.xlu1 %v2754_v43 }
0x15a4   :  { %v3830_v51 = vpop.eup %3829 }
0x15a5   :  { %v2757_v25 = vsel %vm359_vm9, %v3830_v51, 0.0 }
0x15a6   :  { %2758 = vadd.xlane.f32.xlu1 %v2757_v25 }
0x15a9   :  { %v2367_v48 = vpop.permute.xlu1 %2366 }
0x15aa   :  { %v2507_v52 = vadd.f32 %v4494_v6, %v2367_v48 }
0x15ac   :  { %2583 = vmatpush.msrb.mxu3 %v2507_v52 }
0x15b1   :  { %v2392_v56 = vpop.permute.xlu1 %2391 }
0x15b2   :  { %v2522_v59 = vadd.f32 %v2521_v54, %v2392_v56 }
0x15b4   :  { %3659 = vmatpush.xpose.msk.msra.mxu3 %vm359_vm9, %v2522_v59  ;;  %v3636_v59 = vld [vmem:[%s4795_s3 + $0x118] sm:$0xff] }
0x15b9   :  { %v2357_v60 = vpop.permute.xlu1 %2356 }
0x15ba   :  { %v2501_v62 = vadd.f32 %v4489_v3, %v2357_v60 }
0x15bc   :  { %2881 = vxpose.xlu2.b32.start.end [1/1] (short) (narrow) %v2501_v62, 16 }
0x15e0   :  { %2530 = vxpose.xlu1.b32.start.end [1/1] (short) (narrow) %v2495_v63, 16 }
0x15f0   :  { %3058 = vxpose.xlu1.b32.start.end [1/1] (short) (narrow) %v2504_v35, 16 }
0x1611   :  { %v2756_v1 = vpop.xlane.xlu1 %2755 }
0x1612   :  { %3831 = vrcp.f32 %v2756_v1  ;;  %v2771_v5 = vand.u32 2147483648, %v2756_v1  ;;  %vm2765_vm13 = vweird.f32 %v2756_v1  ;;  %v2769_v11 = vand.u32 2147483647, %v2756_v1 }
0x1614   :  { %v2772_v16 = vor.u32 1.1754944e-38, %v2771_v5  ;;  %vm2770_vm15 = vcmp.eq.f32.partialorder %v2769_v11, 8.507059e+37 }
0x1618   :  { %v3832_v4 = vpop.eup %3831 }
0x1619   :  { %v2759_v2 = vpop.xlane.xlu1 %2758  ;;  %v2761_v6 = vmul.f32 %v3832_v4, %v2756_v1  ;;  %vm2766_vm12 = vweird.f32 %v3832_v4 }
0x161a   :  { %3833 = vrcp.f32 %v2759_v2  ;;  %vm2767_vm14 = vmor %vm2765_vm13, %vm2766_vm12  ;;  %v2786_v20 = vand.u32 2147483648, %v2759_v2  ;;  %vm2780_vm2 = vweird.f32 %v2759_v2 }
0x161b   :  { %v2762_v7 = vsub.f32 1.0, %v2761_v6 }
0x161c   :  { %v2787_v33 = vor.u32 1.1754944e-38, %v2786_v20 }
0x161d   :  { %v2763_v10 = vmul.f32 %v3832_v4, %v2762_v7 }
0x161f   :  { %v2764_v37 = vadd.f32 %v3832_v4, %v2763_v10 }
0x1620   :  { %v3834_v8 = vpop.eup %3833 }
0x1621   :  { %v2776_v58 = vmul.f32 %v3834_v8, %v2759_v2  ;;  %v2768_v12 = vsel %vm2767_vm14, %v3832_v4, %v2764_v37  ;;  %vm2781_vm1 = vweird.f32 %v3834_v8 }
0x1622   :  { %v2773_v17 = vsel %vm2770_vm15, %v2772_v16, %v2768_v12  ;;  %vm2782_vm3 = vmor %vm2780_vm2, %vm2781_vm1 }
0x1623   :  { %v2777_v3 = vsub.f32 1.0, %v2776_v58  ;;  %v2774_v22 = vmul.f32 %v3828_v32, %v2773_v17 }
0x1625   :  { %v2778_v15 = vmul.f32 %v3834_v8, %v2777_v3 }
0x1627   :  { %v2779_v19 = vadd.f32 %v3834_v8, %v2778_v15 }
0x1629   :  { %v2783_v57 = vsel %vm2782_vm3, %v3834_v8, %v2779_v19  ;;  %v3633_v8 = vld [vmem:[%s4795_s3 + $0x100] sm:$0xff] }
0x1655   :  { %v2897_v50 = vpop.trf.xlu2 }
0x165d   :  { %v2898_v30 = vpop.trf.xlu2 }
0x1684   :  { %v2546_v9 = vpop.trf.xlu1 }
0x1685   :  { %3651 = vmatmul.msk.f32.vlgmr.msrb.gmra.mxu3 %vm325_vm8, %v2546_v9 }
0x1686   :  { %2934 = vmatpush.msrb.mxu3 %v4510_v0  ;;  %v2784_v0 = vand.u32 2147483647, %v2759_v2 }
0x1688   :  { %vm2785_vm4 = vcmp.eq.f32.partialorder %v2784_v0, 8.507059e+37 }
0x1689   :  { %v2788_v26 = vsel %vm2785_vm4, %v2787_v33, %v2783_v57 }
0x168a   :  { %v2789_v49 = vmul.f32 %v3830_v51, %v2788_v26 }
0x168c   :  { %v2547_v14 = vpop.trf.xlu1 }
0x168d   :  { %3652 = vmatmul.msk.f32.gmra.mxu3 %vm325_vm8, %v2547_v14 }
0x1694   :  { %v3074_v32 = vpop.trf.xlu1 }
0x1695   :  { %3660 = vmatmul.msk.f32.vlgmr.msra.gmra.mxu3 %vm359_vm9, %v2774_v22  ;;  %v3635_v22 = vld [vmem:[%s4795_s3 + $0x110] sm:$0xff] }
0x1696   :  { %3111 = vmatpush.msra.mxu3 %v2516_v23 }
0x169c   :  { %v3075_v25 = vpop.trf.xlu1 }
0x169d   :  { %3661 = vmatmul.msk.f32.gmra.mxu3 %vm359_vm9, %v2789_v49 }
0x16a5   :  { %3667 = vmatmul.msk.f32.vlgmr.msrb.gmra.mxu3 %vm325_vm8, %v2897_v50 }
0x16ad   :  { %3668 = vmatmul.msk.f32.gmra.mxu3 %vm325_vm8, %v2898_v30 }
0x16b5   :  { %3675 = vmatmul.msk.f32.vlgmr.msra.gmra.mxu3 %vm325_vm8, %v3074_v32 }
0x16bd   :  { %3676 = vmatmul.msk.f32.gmra.mxu3 %vm325_vm8, %v3075_v25 }
0x1708   :  { %v2585_v31 = vpop.f32.mrf.mxu3 }
0x1709   :  { %v2591_v34 = vmul.f32 0.35355338, %v2585_v31 }
0x170b   :  { %v2593_v27 = vadd.f32 %v4517_v24, %v2591_v34 }
0x170d   :  { %v2595_v36 = vsel %vm359_vm9, %v2593_v27, -inf }
0x170e   :  { %2596 = vmax.xlane.f32.xlu0 %v2595_v36 }
0x1710   :  { %v2588_v38 = vpop.f32.mrf.mxu3 }
0x1711   :  { %v2592_v39 = vmul.f32 0.35355338, %v2588_v38 }
0x1713   :  { %v2594_v40 = vadd.f32 %v4524_v29, %v2592_v39 }
0x1715   :  { %v2598_v46 = vsel %vm359_vm9, %v2594_v40, -inf }
0x1716   :  { %2599 = vmax.xlane.f32.xlu0 %v2598_v46 }
0x1718   :  { %v4559_v42 = vpop.f32.mrf.mxu3 }
0x1720   :  { %v4561_v44 = vpop.f32.mrf.mxu3 }
0x1728   :  { %v2936_v45 = vpop.f32.mrf.mxu3 }
0x1729   :  { %v2942_v41 = vmul.f32 0.35355338, %v2936_v45 }
0x172b   :  { %v2944_v43 = vadd.f32 %v4517_v24, %v2942_v41 }
0x172d   :  { %v2946_v51 = vsel %vm359_vm9, %v2944_v43, -inf }
0x172e   :  { %2947 = vmax.xlane.f32.xlu2 %v2946_v51 }
0x1730   :  { %v2939_v48 = vpop.f32.mrf.mxu3 }
0x1731   :  { %v2943_v52 = vmul.f32 0.35355338, %v2939_v48 }
0x1733   :  { %v2945_v54 = vadd.f32 %v4524_v29, %v2943_v52 }
0x1735   :  { %v2949_v56 = vsel %vm359_vm9, %v2945_v54, -inf }
0x1736   :  { %2950 = vmax.xlane.f32.xlu1 %v2949_v56 }
0x1738   :  { %v3113_v9 = vpop.f32.mrf.mxu3 }
0x1739   :  { %v3119_v10 = vmul.f32 0.35355338, %v3113_v9 }
0x173b   :  { %v4584_v58 = vadd.f32 %v4517_v24, %v3119_v10 }
0x173d   :  { %v3123_v5 = vsel %vm359_vm9, %v4584_v58, -inf }
0x1740   :  { %v3116_v37 = vpop.f32.mrf.mxu3 }
0x1741   :  { %v3120_v11 = vmul.f32 0.35355338, %v3116_v37 }
0x1743   :  { %v4589_v12 = vadd.f32 %v4524_v29, %v3120_v11 }
0x1745   :  { %v3126_v17 = vsel %vm359_vm9, %v4589_v12, -inf }
0x1746   :  { %2401 = vperm.xlu2 %3708, %v3636_v59  }
0x1781   :  { %v2597_v60 = vpop.xlane.xlu0 %2596 }
0x1782   :  { %v2601_v62 = vsub.f32 %v2593_v27, %v2597_v60 }
0x1784   :  { %v2603_v63 = vmul.f32 1.442695, %v2601_v62 }
0x1786   :  { %3835 = vpow2.f32 %v2603_v63 }
0x1789   :  { %v2600_v61 = vpop.xlane.xlu0 %2599 }
0x178a   :  { %v2602_v35 = vsub.f32 %v2594_v40, %v2600_v61 }
0x178c   :  { %v4572_v1 = vpop.eup %3835  ;;  %v2605_v2 = vmul.f32 1.442695, %v2602_v35 }
0x178d   :  { %v2607_v4 = vsel %vm359_vm9, %v4572_v1, 0.0 }
0x178e   :  { %3837 = vpow2.f32 %v2605_v2  ;;  %2608 = vadd.xlane.f32.xlu0 %v2607_v4 }
0x1794   :  { %v4576_v6 = vpop.eup %3837 }
0x1795   :  { %v2610_v7 = vsel %vm359_vm9, %v4576_v6, 0.0 }
0x1796   :  { %2611 = vadd.xlane.f32.xlu0 %v2610_v7 }
0x17a1   :  { %v2948_v3 = vpop.xlane.xlu2 %2947 }
0x17a2   :  { %v2952_v14 = vsub.f32 %v2944_v43, %v2948_v3  ;;  %v3662_v43 = vld [vmem:[%s4797_s4 + $0x108] sm:$0xff] }
0x17a4   :  { %v2954_v15 = vmul.f32 1.442695, %v2952_v14 }
0x17a6   :  { %3839 = vpow2.f32 %v2954_v15 }
0x17a9   :  { %v2951_v16 = vpop.xlane.xlu1 %2950 }
0x17aa   :  { %2386 = vperm.xlu0 %3706, %v3633_v8   ;;  %v2953_v18 = vsub.f32 %v2945_v54, %v2951_v16 }
0x17ac   :  { %v2956_v24 = vmul.f32 1.442695, %v2953_v18  ;;  %v4593_v19 = vpop.eup %3839  ;;  %v2402_v18 = vpop.permute.xlu2 %2401 }
0x17ad   :  { %v2958_v20 = vsel %vm359_vm9, %v4593_v19, 0.0 }
0x17ae   :  { %3841 = vpow2.f32 %v2956_v24 }
0x17b4   :  { %v4597_v0 = vpop.eup %3841 }
0x17b5   :  { %v2961_v29 = vsel %vm359_vm9, %v4597_v0, 0.0 }
0x17d4   :  { %3124 = vmax.xlane.f32.xlu0 %v3123_v5  ;;  %v2524_v5 = vpop.f32.mrf.mxu1 }
0x17dc   :  { %3127 = vmax.xlane.f32.xlu0 %v3126_v17 }
0x17e4   :  { %2959 = vadd.xlane.f32.xlu0 %v2958_v20 }
0x17ec   :  { %2962 = vadd.xlane.f32.xlu0 %v2961_v29  ;;  %v2527_v29 = vpop.f32.mrf.mxu1 }
0x1800   :  { %2396 = vperm.xlu0 %3706, %v3635_v22  }
0x1801   :  { %v2609_v23 = vpop.xlane.xlu0 %2608 }
0x1802   :  { %3843 = vrcp.f32 %v2609_v23  ;;  %v2624_v36 = vand.u32 2147483648, %v2609_v23  ;;  %vm2618_vm6 = vweird.f32 %v2609_v23  ;;  %v2622_v38 = vand.u32 2147483647, %v2609_v23 }
0x1804   :  { %v2625_v46 = vor.u32 1.1754944e-38, %v2624_v36  ;;  %vm2623_vm11 = vcmp.eq.f32.partialorder %v2622_v38, 8.507059e+37  ;;  %v3656_v36 = vld [vmem:[%s4797_s4 + $0x100] sm:$0xff] }
0x1805   :  { %2873 = vmatpush.msra.mxu0 %v3656_v36 }
0x1808   :  { %v3844_v57 = vpop.eup %3843 }
0x1809   :  { %v2612_v33 = vpop.xlane.xlu0 %2611  ;;  %v2614_v26 = vmul.f32 %v3844_v57, %v2609_v23  ;;  %vm2619_vm5 = vweird.f32 %v3844_v57 }
0x180a   :  { %3845 = vrcp.f32 %v2612_v33  ;;  %vm2620_vm10 = vmor %vm2618_vm6, %vm2619_vm5  ;;  %v2639_v25 = vand.u32 2147483648, %v2612_v33  ;;  %vm2633_vm13 = vweird.f32 %v2612_v33  ;;  %v2637_v52 = vand.u32 2147483647, %v2612_v33 }
0x180b   :  { %v2615_v49 = vsub.f32 1.0, %v2614_v26 }
0x180c   :  { %v2640_v56 = vor.u32 1.1754944e-38, %v2639_v25  ;;  %vm2638_vm15 = vcmp.eq.f32.partialorder %v2637_v52, 8.507059e+37 }
0x180d   :  { %v2616_v30 = vmul.f32 %v3844_v57, %v2615_v49 }
0x180f   :  { %v2617_v34 = vadd.f32 %v3844_v57, %v2616_v30 }
0x1810   :  { %v3846_v50 = vpop.eup %3845 }
0x1811   :  { %v2629_v31 = vmul.f32 %v3846_v50, %v2612_v33  ;;  %v2621_v39 = vsel %vm2620_vm10, %v3844_v57, %v2617_v34  ;;  %vm2634_vm12 = vweird.f32 %v3846_v50  ;;  %v2528_v57 = vadd.f32 %v2527_v29, %v2402_v18 }
0x1812   :  { %v2626_v45 = vsel %vm2623_vm11, %v2625_v46, %v2621_v39  ;;  %vm2635_vm14 = vmor %vm2633_vm13, %vm2634_vm12 }
0x1813   :  { %v2630_v27 = vsub.f32 1.0, %v2629_v31  ;;  %v2627_v48 = vmul.f32 %v4572_v1, %v2626_v45 }
0x1815   :  { %v2631_v40 = vmul.f32 %v3846_v50, %v2630_v27 }
0x1817   :  { %v2632_v51 = vadd.f32 %v3846_v50, %v2631_v40 }
0x1819   :  { %v2636_v54 = vsel %vm2635_vm14, %v3846_v50, %v2632_v51 }
0x181c   :  { %v2387_v32 = vpop.permute.xlu0 %2386 }
0x181d   :  { %v2519_v41 = vadd.f32 %v4541_v47, %v2387_v32  ;;  %v2641_v47 = vsel %vm2638_vm15, %v2640_v56, %v2636_v54 }
0x181e   :  { %v2642_v59 = vmul.f32 %v4576_v6, %v2641_v47 }
0x181f   :  { %3653 = vmatpush.xpose.msk.msrb.mxu2 %vm359_vm9, %v2519_v41 }
0x1822   :  { %3654 = vmatmul.msk.f32.vlgmr.msrb.gmra.mxu2 %vm359_vm9, %v2627_v48 }
0x1823   :  { %2844 = vmatpush.msra.mxu2 %v3662_v43 }
0x182a   :  { %3655 = vmatmul.msk.f32.gmra.mxu2 %vm359_vm9, %v2642_v59 }
0x1832   :  { %3663 = vmatmul.msk.f32.vlgmr.msra.gmra.mxu2 %vm325_vm8, %v4559_v42 }
0x183a   :  { %3664 = vmatmul.msk.f32.gmra.mxu2 %vm325_vm8, %v4561_v44 }
0x1847   :  { %v3125_v60 = vpop.xlane.xlu0 %3124 }
0x1848   :  { %v3129_v62 = vsub.f32 %v4584_v58, %v3125_v60 }
0x184a   :  { %v3131_v63 = vmul.f32 1.442695, %v3129_v62 }
0x184c   :  { %3847 = vpow2.f32 %v3131_v63 }
0x184f   :  { %v3128_v61 = vpop.xlane.xlu0 %3127 }
0x1850   :  { %v3130_v35 = vsub.f32 %v4589_v12, %v3128_v61  ;;  %v3672_v61 = vld [vmem:[%s4797_s4 + $0x110] sm:$0xff] }
0x1851   :  { %3048 = vmatpush.msrb.mxu0 %v3672_v61 }
0x1852   :  { %v4619_v1 = vpop.eup %3847  ;;  %v3133_v2 = vmul.f32 1.442695, %v3130_v35 }
0x1853   :  { %v3135_v4 = vsel %vm359_vm9, %v4619_v1, 0.0 }
0x1854   :  { %3849 = vpow2.f32 %v3133_v2  ;;  %3136 = vadd.xlane.f32.xlu1 %v3135_v4 }
0x1857   :  { %v2960_v42 = vpop.xlane.xlu0 %2959 }
0x1858   :  { %3851 = vrcp.f32 %v2960_v42  ;;  %v2975_v12 = vand.u32 2147483648, %v2960_v42  ;;  %vm2969_vm2 = vweird.f32 %v2960_v42  ;;  %v2973_v15 = vand.u32 2147483647, %v2960_v42 }
0x185a   :  { %v4623_v6 = vpop.eup %3849  ;;  %v2976_v24 = vor.u32 1.1754944e-38, %v2975_v12  ;;  %vm2974_vm4 = vcmp.eq.f32.partialorder %v2973_v15, 8.507059e+37  ;;  %v3725_v15 = vld [vmem:[%s4794_s5 + $0x11] ss:$0 sm:$0xff] }
0x185b   :  { %v3138_v44 = vsel %vm359_vm9, %v4623_v6, 0.0 }
0x185c   :  { %3139 = vadd.xlane.f32.xlu1 %v3138_v44 }
0x185e   :  { %v3852_v7 = vpop.eup %3851 }
0x185f   :  { %v2963_v8 = vpop.xlane.xlu0 %2962  ;;  %v2965_v9 = vmul.f32 %v3852_v7, %v2960_v42  ;;  %vm2970_vm1 = vweird.f32 %v3852_v7 }
0x1860   :  { %3853 = vrcp.f32 %v2963_v8  ;;  %vm2971_vm3 = vmor %vm2969_vm2, %vm2970_vm1  ;;  %v2990_v26 = vand.u32 2147483648, %v2963_v8  ;;  %vm2984_vm6 = vweird.f32 %v2963_v8  ;;  %v2988_v50 = vand.u32 2147483647, %v2963_v8 }
0x1861   :  { %v2966_v10 = vsub.f32 1.0, %v2965_v9 }
0x1862   :  { %v2991_v31 = vor.u32 1.1754944e-38, %v2990_v26  ;;  %vm2989_vm11 = vcmp.eq.f32.partialorder %v2988_v50, 8.507059e+37  ;;  %v2323_v50 = vrot.slane %v4472_v53, 7 }
0x1863   :  { %v2967_v37 = vmul.f32 %v3852_v7, %v2966_v10  ;;  %v3680_v10 = vld [vmem:[%s4797_s4 + $0x118] sm:$0xff] }
0x1865   :  { %v2968_v11 = vadd.f32 %v3852_v7, %v2967_v37 }
0x1866   :  { %v3854_v58 = vpop.eup %3853 }
0x1867   :  { %v2980_v3 = vmul.f32 %v3854_v58, %v2963_v8  ;;  %v2972_v16 = vsel %vm2971_vm3, %v3852_v7, %v2968_v11  ;;  %vm2985_vm5 = vweird.f32 %v3854_v58 }
0x1868   :  { %v2977_v22 = vsel %vm2974_vm4, %v2976_v24, %v2972_v16  ;;  %vm2986_vm10 = vmor %vm2984_vm6, %vm2985_vm5 }
0x1869   :  { %v2981_v14 = vsub.f32 1.0, %v2980_v3  ;;  %v2978_v49 = vmul.f32 %v4593_v19, %v2977_v22 }
0x186b   :  { %v2982_v17 = vmul.f32 %v3854_v58, %v2981_v14 }
0x186d   :  { %v2983_v33 = vadd.f32 %v3854_v58, %v2982_v17 }
0x186f   :  { %v2987_v30 = vsel %vm2986_vm10, %v3854_v58, %v2983_v33 }
0x1870   :  { %v2992_v34 = vsel %vm2989_vm11, %v2991_v31, %v2987_v30 }
0x1871   :  { %v2993_v27 = vmul.f32 %v4597_v0, %v2992_v34 }
0x1872   :  { %v2397_v20 = vpop.permute.xlu0 %2396 }
0x1873   :  { %v2525_v23 = vadd.f32 %v2524_v5, %v2397_v20 }
0x1875   :  { %3669 = vmatpush.xpose.msk.msrb.mxu2 %vm359_vm9, %v2525_v23 }
0x1878   :  { %3670 = vmatmul.msk.f32.vlgmr.msrb.gmra.mxu2 %vm359_vm9, %v2978_v49 }
0x1879   :  { %3677 = vmatpush.xpose.msk.msra.mxu2 %vm359_vm9, %v2528_v57 }
0x1880   :  { %3671 = vmatmul.msk.f32.gmra.mxu2 %vm359_vm9, %v2993_v27 }
0x18a5   :  { %v2669_v19 = vpop.f32.mrf.mxu2 }
0x18a6   :  { %3665 = vmatmul.msk.f32.vlgmr.msra.gmra.mxu0 %vm325_vm8, %v2669_v19 }
0x18a7   :  { %3225 = vmatpush.msra.mxu0 %v3680_v10 }
0x18ad   :  { %v2672_v38 = vpop.f32.mrf.mxu2 }
0x18ae   :  { %3666 = vmatmul.msk.f32.gmra.mxu0 %vm325_vm8, %v2672_v38 }
0x18b5   :  { %v2846_v44 = vpop.f32.mrf.mxu2 }
0x18bd   :  { %v2849_v7 = vpop.f32.mrf.mxu2 }
0x18c7   :  { %v3137_v39 = vpop.xlane.xlu1 %3136 }
0x18c8   :  { %3855 = vrcp.f32 %v3137_v39  ;;  %v3152_v45 = vand.u32 2147483648, %v3137_v39  ;;  %v3150_v43 = vand.u32 2147483647, %v3137_v39  ;;  %vm3146_vm13 = vweird.f32 %v3137_v39 }
0x18ca   :  { %v3153_v48 = vor.u32 1.1754944e-38, %v3152_v45  ;;  %vm3151_vm15 = vcmp.eq.f32.partialorder %v3150_v43, 8.507059e+37  ;;  %v3683_v45 = vld [vmem:[%s4797_s4 + $0x120] sm:$0xff] }
0x18ce   :  { %v3856_v40 = vpop.eup %3855 }
0x18cf   :  { %v3142_v46 = vmul.f32 %v3856_v40, %v3137_v39  ;;  %v3140_v32 = vpop.xlane.xlu1 %3139  ;;  %vm3147_vm12 = vweird.f32 %v3856_v40 }
0x18d0   :  { %3857 = vrcp.f32 %v3140_v32  ;;  %vm3148_vm14 = vmor %vm3146_vm13, %vm3147_vm12  ;;  %v3167_v60 = vand.u32 2147483648, %v3140_v32  ;;  %v3165_v63 = vand.u32 2147483647, %v3140_v32  ;;  %vm3161_vm2 = vweird.f32 %v3140_v32 }
0x18d1   :  { %v3143_v0 = vsub.f32 1.0, %v3142_v46 }
0x18d2   :  { %v3168_v2 = vor.u32 1.1754944e-38, %v3167_v60  ;;  %vm3166_vm4 = vcmp.eq.f32.partialorder %v3165_v63, 8.507059e+37 }
0x18d3   :  { %v3144_v41 = vmul.f32 %v3856_v40, %v3143_v0  ;;  %v3684_v0 = vld [vmem:[%s4797_s4 + $0x128] sm:$0xff] }
0x18d5   :  { %v3145_v51 = vadd.f32 %v3856_v40, %v3144_v41 }
0x18d6   :  { %v3858_v25 = vpop.eup %3857 }
0x18d7   :  { %v3149_v52 = vsel %vm3148_vm14, %v3856_v40, %v3145_v51  ;;  %v3157_v54 = vmul.f32 %v3858_v25, %v3140_v32  ;;  %vm3162_vm1 = vweird.f32 %v3858_v25  ;;  %v3685_v32 = vld [vmem:[%s4797_s4 + $0x130] sm:$0xff] }
0x18d8   :  { %v3154_v56 = vsel %vm3151_vm15, %v3153_v48, %v3149_v52  ;;  %vm3163_vm3 = vmor %vm3161_vm2, %vm3162_vm1 }
0x18d9   :  { %v3155_v47 = vmul.f32 %v4619_v1, %v3154_v56  ;;  %v3158_v59 = vsub.f32 1.0, %v3157_v54 }
0x18db   :  { %v3159_v62 = vmul.f32 %v3858_v25, %v3158_v59  ;;  %3678 = vmatmul.msk.f32.vlgmr.msra.gmra.mxu2 %vm359_vm9, %v3155_v47 }
0x18dd   :  { %v3160_v35 = vadd.f32 %v3858_v25, %v3159_v62 }
0x18df   :  { %v3164_v4 = vsel %vm3163_vm3, %v3858_v25, %v3160_v35  ;;  %v3726_v35 = vld [vmem:[%s4794_s5 + $0x12] ss:$0 sm:$0xff] }
0x18e0   :  { %v3169_v42 = vsel %vm3166_vm4, %v3168_v2, %v3164_v4  ;;  %vm3467_vm4 = vcmask 785408  }
0x18e1   :  { %v3170_v1 = vmul.f32 %v4623_v6, %v3169_v42  ;;  %v3727_v42 = vld [vmem:[%s4794_s5 + $0x13] ss:$0 sm:$0xff] }
0x18e3   :  { %3679 = vmatmul.msk.f32.gmra.mxu2 %vm359_vm9, %v3170_v1 }
0x18fb   :  { %v3020_v8 = vpop.f32.mrf.mxu2 }
0x18fc   :  { %3673 = vmatmul.msk.f32.vlgmr.msrb.gmra.mxu0 %vm325_vm8, %v3020_v8 }
0x1903   :  { %v3023_v9 = vpop.f32.mrf.mxu2 }
0x1904   :  { %3674 = vmatmul.msk.f32.gmra.mxu0 %vm325_vm8, %v3023_v9 }
0x1923   :  { %v2875_v6 = vpop.f32.mrf.mxu0 }
0x1924   :  { %v2876_v14 = vadd.f32 %v2875_v6, %v2846_v44 }
0x192b   :  { %v2878_v3 = vpop.f32.mrf.mxu0 }
0x192c   :  { %v2879_v24 = vadd.f32 %v2878_v3, %v2849_v7 }
0x195e   :  { %v3197_v58 = vpop.f32.mrf.mxu2 }
0x195f   :  { %3681 = vmatmul.msk.f32.vlgmr.msra.gmra.mxu0 %vm325_vm8, %v3197_v58 }
0x1966   :  { %v3200_v37 = vpop.f32.mrf.mxu2 }
0x1967   :  { %3682 = vmatmul.msk.f32.gmra.mxu0 %vm325_vm8, %v3200_v37  ;;  %vm1207_vm8 = vcmask 1040384  }
0x1968   :  { %v2325_v30 = vsel %vm1207_vm8, %v4476_v55, %v2323_v50 }
0x1979   :  { %v3050_v5 = vpop.f32.mrf.mxu0 }
0x197a   :  { %v3056_v12 = vadd.f32 %v3050_v5, %v2876_v14  ;;  %v3696_v5 = vld [vmem:[%s4797_s4 + $0x178] sm:$0xff]  ;;  %v3694_v14 = vld [vmem:[%s4797_s4 + $0x168] sm:$0xff] }
0x197b   :  { %3370 = vmatpush.msrb.mxu2 %v3696_v5  ;;  %v3456_v5 = vld [vmem:[%s4798_s6 + $0x18] sm:$0xff] }
0x1981   :  { %v3053_v11 = vpop.f32.mrf.mxu0 }
0x1982   :  { %v3057_v29 = vadd.f32 %v3053_v11, %v2879_v24  ;;  %v3695_v11 = vld [vmem:[%s4797_s4 + $0x170] sm:$0xff] }
0x1983   :  { %3371 = vmatpush.msrb.mxu2 %v3695_v11  ;;  %v3728_v24 = vld [vmem:[%s4794_s5 + $0x14] ss:$0 sm:$0xff] }
0x1984   :  { %v3455_v11 = vld [vmem:[%s4798_s6 + $0x10] sm:$0xff] }
0x1985   :  { %3372 = vmatpush.msrb.mxu2 %v3694_v14  ;;  %v3454_v14 = vld [vmem:[%s4798_s6 + $0x8] sm:$0xff] }
0x19dc   :  { %v3227_v16 = vpop.f32.mrf.mxu0 }
0x19dd   :  { %v3233_v17 = vadd.f32 %v3227_v16, %v3056_v12  ;;  %v3693_v12 = vld [vmem:[%s4797_s4 + $0x160] sm:$0xff]  ;;  %v3691_v16 = vld [vmem:[%s4797_s4 + $0x150] sm:$0xff] }
0x19de   :  { %3373 = vmatpush.msrb.mxu2 %v3693_v12 }
0x19df   :  { %v3237_v18 = vadd.f32 %v3725_v15, %v3233_v17  ;;  %v3690_v17 = vld [vmem:[%s4797_s4 + $0x148] sm:$0xff] }
0x19e1   :  { %v3239_v20 = vadd.f32 %v3237_v18, %v4476_v55  ;;  %v3686_v55 = vld [vmem:[%s4797_s4 + $0x138] sm:$0xff]  ;;  %v3689_v18 = vld [vmem:[%s4797_s4 + $0x140] sm:$0xff] }
0x19e2   :  { %3317 = vmatpush.msrb.mxu3 %v3686_v55 }
0x19e3   :  { %v3243_v22 = vsel %vm32_vm0, %v3239_v20, 0.0 }
0x19e4   :  { %3244 = vadd.xlane.f32.xlu1 %v3243_v22  ;;  %v3230_v23 = vpop.f32.mrf.mxu0  ;;  %3318 = vmatpush.msrb.mxu3 %v3685_v32 }
0x19e5   :  { %v3234_v57 = vadd.f32 %v3230_v23, %v3057_v29 }
0x19e6   :  { %3319 = vmatpush.msrb.mxu3 %v3684_v0  ;;  %v3729_v0 = vld [vmem:[%s4794_s5 + $0x15] ss:$0 sm:$0xff] }
0x19e7   :  { %v3238_v33 = vadd.f32 %v3725_v15, %v3234_v57  ;;  %v3692_v15 = vld [vmem:[%s4797_s4 + $0x158] sm:$0xff] }
0x19e8   :  { %3320 = vmatpush.msrb.mxu3 %v3683_v45  ;;  %3374 = vmatpush.msrb.mxu2 %v3692_v15 }
0x19e9   :  { %v3240_v26 = vadd.f32 %v3238_v33, %v4472_v53 }
0x19ea   :  { %3375 = vmatpush.msrb.mxu2 %v3691_v16  ;;  %v3453_v16 = vld [vmem:[%s4798_s6] sm:$0xff] }
0x19eb   :  { %v3246_v49 = vsel %vm32_vm0, %v3240_v26, 0.0 }
0x19ec   :  { %3247 = vadd.xlane.f32.xlu0 %v3246_v49  ;;  %3376 = vmatpush.msrb.mxu2 %v3690_v17 }
0x19ee   :  { %3377 = vmatpush.msrb.mxu2 %v3689_v18 }
0x1a00   :  { %3444 = vrot.lane.b32.xlu0 %v2325_v30, %s3877_s22 }
0x1a57   :  { %v3245_v31 = vpop.xlane.xlu1 %3244 }
0x1a58   :  { %v3249_v34 = vmul.f32 %v3245_v31, %v3936_v13 }
0x1a5a   :  { %v3251_v27 = vsub.f32 %v3239_v20, %v3249_v34 }
0x1a5c   :  { %v3253_v36 = vmul.f32 %v3251_v27, %v3251_v27 }
0x1a5e   :  { %v3255_v19 = vsel %vm32_vm0, %v3253_v36, 0.0 }
0x1a5f   :  { %v3248_v38 = vpop.xlane.xlu0 %3247  ;;  %3256 = vadd.xlane.f32.xlu1 %v3255_v19 }
0x1a60   :  { %v3250_v39 = vmul.f32 %v3248_v38, %v3936_v13 }
0x1a62   :  { %v3252_v40 = vsub.f32 %v3240_v26, %v3250_v39 }
0x1a64   :  { %v3254_v46 = vmul.f32 %v3252_v40, %v3252_v40 }
0x1a66   :  { %v3258_v53 = vsel %vm32_vm0, %v3254_v46, 0.0 }
0x1a67   :  { %3259 = vadd.xlane.f32.xlu1 %v3258_v53 }
0x1ad2   :  { %v3257_v41 = vpop.xlane.xlu1 %3256 }
0x1ad3   :  { %v3261_v43 = vmul.f32 %v3257_v41, %v3936_v13 }
0x1ad5   :  { %v3263_v51 = vadd.f32 1e-12, %v3261_v43 }
0x1ad7   :  { %3859 = vrsqrt.f32 %v3263_v51  ;;  %vm3271_vm5 = vweird.f32 %v3263_v51 }
0x1ada   :  { %v3260_v25 = vpop.xlane.xlu1 %3259 }
0x1adb   :  { %v3262_v48 = vmul.f32 %v3260_v25, %v3936_v13 }
0x1add   :  { %v3860_v52 = vpop.eup %3859  ;;  %v3264_v54 = vadd.f32 1e-12, %v3262_v48 }
0x1ade   :  { %v3266_v56 = vmul.f32 %v3860_v52, %v3263_v51  ;;  %vm3272_vm9 = vweird.f32 %v3860_v52 }
0x1adf   :  { %3861 = vrsqrt.f32 %v3264_v54  ;;  %vm3273_vm6 = vmor %vm3271_vm5, %vm3272_vm9  ;;  %vm3281_vm11 = vweird.f32 %v3264_v54  ;;  %vm3491_vm9 = vcmask 1024  }
0x1ae0   :  { %v3267_v47 = vmul.f32 %v3860_v52, %v3266_v56 }
0x1ae2   :  { %v3268_v59 = vmul.f32 0.5, %v3267_v47 }
0x1ae4   :  { %v3269_v60 = vsub.f32 1.5, %v3268_v59 }
0x1ae5   :  { %v3862_v62 = vpop.eup %3861 }
0x1ae6   :  { %v3270_v63 = vmul.f32 %v3860_v52, %v3269_v60  ;;  %v3276_v61 = vmul.f32 %v3862_v62, %v3264_v54  ;;  %vm3282_vm10 = vweird.f32 %v3862_v62 }
0x1ae7   :  { %vm3283_vm12 = vmor %vm3281_vm11, %vm3282_vm10 }
0x1ae8   :  { %v3274_v2 = vsel %vm3273_vm6, %v3860_v52, %v3270_v63  ;;  %v3277_v4 = vmul.f32 %v3862_v62, %v3276_v61 }
0x1ae9   :  { %v3285_v1 = vmul.f32 %v3274_v2, %v3251_v27 }
0x1aea   :  { %v3278_v44 = vmul.f32 0.5, %v3277_v4 }
0x1aeb   :  { %v3288_v7 = vmul.f32 %v3726_v35, %v3285_v1 }
0x1aec   :  { %v3279_v8 = vsub.f32 1.5, %v3278_v44  ;;  %v3464_v44 = vld [vmem:[%s4798_s6 + $0x58] sm:$0xff] }
0x1aed   :  { %v3291_v9 = vadd.f32 %v3727_v42, %v3288_v7  ;;  %3475 = vmatpush.msrb.mxu0 %v3464_v44  ;;  %v3463_v7 = vld [vmem:[%s4798_s6 + $0x50] sm:$0xff] }
0x1aee   :  { %v3280_v10 = vmul.f32 %v3862_v62, %v3279_v8  ;;  %v3462_v8 = vld [vmem:[%s4798_s6 + $0x48] sm:$0xff] }
0x1aef   :  { %3687 = vmatmul.msk.f32.vlgmr.msrb.gmra.mxu3 %vm32_vm0, %v3291_v9  ;;  %3476 = vmatpush.msrb.mxu0 %v3463_v7 }
0x1af0   :  { %v3284_v58 = vsel %vm3283_vm12, %v3862_v62, %v3280_v10  ;;  %v3458_v10 = vld [vmem:[%s4798_s6 + $0x28] sm:$0xff] }
0x1af1   :  { %v3286_v37 = vmul.f32 %v3284_v58, %v3252_v40  ;;  %3477 = vmatpush.msrb.mxu0 %v3462_v8 }
0x1af3   :  { %v3289_v6 = vmul.f32 %v3726_v35, %v3286_v37 }
0x1af5   :  { %v3292_v3 = vadd.f32 %v3727_v42, %v3289_v6  ;;  %v1205_v42 = vrot.slane %v4225_v28, 7  ;;  %v3461_v28 = vld [vmem:[%s4798_s6 + $0x40] sm:$0xff] }
0x1af6   :  { %3478 = vmatpush.msrb.mxu0 %v3461_v28  ;;  %v3457_v6 = vld [vmem:[%s4798_s6 + $0x20] sm:$0xff] }
0x1af7   :  { %3688 = vmatmul.msk.f32.gmra.mxu3 %vm32_vm0, %v3292_v3  ;;  %v1208_v1 = vsel %vm1207_vm8, %v4229_v21, %v1205_v42  ;;  %v3460_v21 = vld [vmem:[%s4798_s6 + $0x38] sm:$0xff] }
0x1af8   :  { %3479 = vmatpush.msrb.mxu0 %v3460_v21 }
0x1b72   :  { %v3322_v20 = vpop.f32.mrf.mxu3 }
0x1b73   :  { %v3323_v29 = vadd.f32 %v3728_v24, %v3322_v20 }
0x1b75   :  { %v3328_v22 = vmul.f32 %v3323_v29, %v3323_v29 }
0x1b77   :  { %v3330_v23 = vmul.f32 %v3328_v22, %v3323_v29 }
0x1b79   :  { %v3332_v57 = vmul.f32 0.044715, %v3330_v23 }
0x1b7a   :  { %v3325_v33 = vpop.f32.mrf.mxu3 }
0x1b7b   :  { %v3334_v26 = vadd.f32 %v3332_v57, %v3323_v29  ;;  %v3326_v49 = vadd.f32 %v3728_v24, %v3325_v33 }
0x1b7d   :  { %v3336_v50 = vmul.f32 0.7978846, %v3334_v26  ;;  %v3329_v30 = vmul.f32 %v3326_v49, %v3326_v49 }
0x1b7f   :  { %3863 = vtanh.f32 %v3336_v50  ;;  %v3331_v31 = vmul.f32 %v3329_v30, %v3326_v49 }
0x1b81   :  { %v3333_v34 = vmul.f32 0.044715, %v3331_v31  ;;  %v3730_v31 = vld [vmem:[%s4794_s5 + $0x16] ss:$0 sm:$0xff] }
0x1b83   :  { %v3335_v27 = vadd.f32 %v3333_v34, %v3326_v49 }
0x1b85   :  { %v3864_v36 = vpop.eup %3863  ;;  %v3337_v19 = vmul.f32 0.7978846, %v3335_v27 }
0x1b86   :  { %v3340_v38 = vadd.f32 1.0, %v3864_v36 }
0x1b87   :  { %3865 = vtanh.f32 %v3337_v19 }
0x1b88   :  { %v3342_v39 = vmul.f32 0.5, %v3340_v38 }
0x1b8a   :  { %v3344_v40 = vmul.f32 %v3342_v39, %v3323_v29  ;;  %v3731_v39 = vld [vmem:[%s4794_s5 + $0x17] ss:$0 sm:$0xff] }
0x1b8c   :  { %3697 = vmatmul.msk.f32.vlgmr.msrb.gmra.mxu2 %vm1120_vm7, %v3344_v40 }
0x1b8d   :  { %v3866_v46 = vpop.eup %3865 }
0x1b8e   :  { %v3341_v53 = vadd.f32 1.0, %v3866_v46 }
0x1b90   :  { %v3343_v55 = vmul.f32 0.5, %v3341_v53 }
0x1b92   :  { %v3345_v32 = vmul.f32 %v3343_v55, %v3326_v49  ;;  %v3445_v55 = vpop.permute.xlu0 %3444 }
0x1b94   :  { %3698 = vmatmul.msk.f32.gmra.mxu2 %vm1120_vm7, %v3345_v32 }
0x1c0f   :  { %v3379_v45 = vpop.f32.mrf.mxu2 }
0x1c10   :  { %v3380_v41 = vadd.f32 %v3729_v0, %v3379_v45 }
0x1c12   :  { %v3385_v43 = vadd.f32 %v3380_v41, %v3291_v9  ;;  %v3459_v9 = vld [vmem:[%s4798_s6 + $0x30] sm:$0xff] }
0x1c13   :  { %3480 = vmatpush.msrb.mxu0 %v3459_v9 }
0x1c14   :  { %v3389_v51 = vsel %vm32_vm0, %v3385_v43, 0.0 }
0x1c15   :  { %3390 = vadd.xlane.f32.xlu1 %v3389_v51  ;;  %3481 = vmatpush.msrb.mxu0 %v3458_v10 }
0x1c17   :  { %v3382_v25 = vpop.f32.mrf.mxu2  ;;  %3482 = vmatpush.msrb.mxu0 %v3457_v6 }
0x1c18   :  { %v3383_v48 = vadd.f32 %v3729_v0, %v3382_v25 }
0x1c19   :  { %3483 = vmatpush.msrb.mxu0 %v3456_v5 }
0x1c1a   :  { %v3386_v52 = vadd.f32 %v3383_v48, %v3292_v3 }
0x1c1b   :  { %3484 = vmatpush.msrb.mxu0 %v3455_v11 }
0x1c1c   :  { %v3392_v54 = vsel %vm32_vm0, %v3386_v52, 0.0 }
0x1c1d   :  { %3393 = vadd.xlane.f32.xlu2 %v3392_v54  ;;  %3485 = vmatpush.msrb.mxu0 %v3454_v14 }
0x1c1f   :  { %3486 = vmatpush.msrb.mxu0 %v3453_v16 }
0x1c88   :  { %v3391_v56 = vpop.xlane.xlu1 %3390 }
0x1c89   :  { %v3395_v47 = vmul.f32 %v3391_v56, %v3936_v13 }
0x1c8b   :  { %v4723_v59 = vsub.f32 %v3385_v43, %v3395_v47  ;;  %v3732_v43 = vld [vmem:[%s4794_s5 + $0x2] ss:$0 sm:$0xff] }
0x1c8d   :  { %v3399_v60 = vmul.f32 %v4723_v59, %v4723_v59 }
0x1c8f   :  { %v3401_v62 = vsel %vm32_vm0, %v3399_v60, 0.0 }
0x1c90   :  { %v3394_v63 = vpop.xlane.xlu2 %3393  ;;  %3402 = vadd.xlane.f32.xlu1 %v3401_v62 }
0x1c91   :  { %v3396_v61 = vmul.f32 %v3394_v63, %v3936_v13 }
0x1c93   :  { %v4729_v35 = vsub.f32 %v3386_v52, %v3396_v61 }
0x1c95   :  { %v3400_v2 = vmul.f32 %v4729_v35, %v4729_v35 }
0x1c97   :  { %v3404_v4 = vsel %vm32_vm0, %v3400_v2, 0.0 }
0x1c98   :  { %3405 = vadd.xlane.f32.xlu1 %v3404_v4 }
0x1cb1   :  { %3448 = vrot.lane.b32.xlu1 %v1208_v1, %s3878_s27 }
0x1d03   :  { %v3403_v58 = vpop.xlane.xlu1 %3402 }
0x1d04   :  { %v3407_v37 = vmul.f32 %v3403_v58, %v3936_v13 }
0x1d06   :  { %v3409_v3 = vadd.f32 1e-12, %v3407_v37 }
0x1d08   :  { %3867 = vrsqrt.f32 %v3409_v3  ;;  %vm3417_vm14 = vweird.f32 %v3409_v3 }
0x1d0b   :  { %v3406_v12 = vpop.xlane.xlu1 %3405 }
0x1d0c   :  { %v3408_v15 = vmul.f32 %v3406_v12, %v3936_v13 }
0x1d0e   :  { %v3868_v17 = vpop.eup %3867  ;;  %v3410_v18 = vadd.f32 1e-12, %v3408_v15 }
0x1d0f   :  { %v3412_v24 = vmul.f32 %v3868_v17, %v3409_v3  ;;  %vm3418_vm13 = vweird.f32 %v3868_v17 }
0x1d10   :  { %3869 = vrsqrt.f32 %v3410_v18  ;;  %vm3419_vm15 = vmor %vm3417_vm14, %vm3418_vm13  ;;  %vm3427_vm2 = vweird.f32 %v3410_v18 }
0x1d11   :  { %v3413_v20 = vmul.f32 %v3868_v17, %v3412_v24 }
0x1d13   :  { %v3414_v29 = vmul.f32 0.5, %v3413_v20 }
0x1d15   :  { %v3415_v22 = vsub.f32 1.5, %v3414_v29 }
0x1d16   :  { %v3870_v23 = vpop.eup %3869 }
0x1d17   :  { %v3422_v57 = vmul.f32 %v3870_v23, %v3410_v18  ;;  %v3416_v33 = vmul.f32 %v3868_v17, %v3415_v22  ;;  %vm3428_vm1 = vweird.f32 %v3870_v23 }
0x1d18   :  { %vm3429_vm3 = vmor %vm3427_vm2, %vm3428_vm1 }
0x1d19   :  { %v3423_v26 = vmul.f32 %v3870_v23, %v3422_v57  ;;  %v3420_v13 = vsel %vm3419_vm15, %v3868_v17, %v3416_v33 }
0x1d1a   :  { %v3431_v34 = vmul.f32 %v3420_v13, %v4723_v59 }
0x1d1b   :  { %v3424_v49 = vmul.f32 0.5, %v3423_v26 }
0x1d1c   :  { %v3434_v19 = vmul.f32 %v3730_v31, %v3431_v34 }
0x1d1d   :  { %v3425_v50 = vsub.f32 1.5, %v3424_v49 }
0x1d1e   :  { %v3437_v46 = vadd.f32 %v3731_v39, %v3434_v19 }
0x1d1f   :  { %v3426_v30 = vmul.f32 %v3870_v23, %v3425_v50 }
0x1d21   :  { %v3430_v27 = vsel %vm3429_vm3, %v3870_v23, %v3426_v30 }
0x1d22   :  { %v3432_v36 = vmul.f32 %v3430_v27, %v4729_v35 }
0x1d23   :  { %v3449_v45 = vpop.permute.xlu1 %3448 }
0x1d24   :  { %v3435_v38 = vmul.f32 %v3730_v31, %v3432_v36 }
0x1d26   :  { %v3438_v40 = vadd.f32 %v3731_v39, %v3435_v38 }
0x1d28   :  { %v3440_v53 = vrot.slane %v3438_v40, 7 }
0x1d2a   :  { %v3442_v32 = vsel %vm1207_vm8, %v3437_v46, %v3440_v53 }
0x1d2b   :  { %v3451_v0 = vsel %vm32_vm0, %v3442_v32, %v3445_v55 }
0x1d2c   :  { %v3452_v41 = vsel %vm1120_vm7, %v3451_v0, %v3449_v45 }
0x1d2d   :  { %3699 = vmatmul.msk.f32.vlgmr.msrb.gmra.mxu0 %vm3467_vm4, %v3452_v41 }
0x1daa   :  { %v3488_v51 = vpop.f32.mrf.mxu0 }
0x1dab   :  { %v3489_v25 = vadd.f32 %v3732_v43, %v3488_v51 }
0x1dad   :  { %3492 = vst.msk [vmem:[%s4799_s7] sm:$0x3] %vm3491_vm9, %v3489_v25 }

</bundles_post_ra>
